<compile_context>
chip_gen: v7x
topology: tpu7x:2x2x1
jax: 0.10.0
libtpu: 0.0.40
codegen_flags: <defaults>
</compile_context>

<pallas_src>
import functools
import math

import jax
import jax.numpy as jnp
from jax.experimental import pallas as pl
from jax.experimental.pallas import tpu as pltpu

NEG_INF = -1e30          # finite "-inf": fully-masked rows give uniform attn, not NaN
LN_EPS = 1e-5            # PyTorch nn.LayerNorm default
N_REFS_PER_LAYER = 16


# ---------------------------- in-kernel helpers (pure jnp on VMEM values) ----------------------------

def _dot(a, b):
    return jnp.dot(a, b, preferred_element_type=jnp.float32)


def _dot_nt(a, b):
    """a @ b.T without materializing a transpose: [M,D] x [N,D] -> [M,N]."""
    return jax.lax.dot_general(a, b, (((1,), (1,)), ((), ())),
                               preferred_element_type=jnp.float32)


def _softmax_lastdim(s):
    s = s - jnp.max(s, axis=-1, keepdims=True)
    p = jnp.exp(s)
    return p * pl.reciprocal(jnp.sum(p, axis=-1, keepdims=True), approx=True)


def _mha_proj(q, k, v, bias, fc_w, n_heads):
    """Multi-head attention fused with its output projection.

    q:[Tq,H] (already pre-scaled via folded weights), k,v:[Tk,H],
    bias:[Tq,Tk] additive mask, fc_w:[H,H].
    Returns concat_h(softmax(q_h k_h^T + bias) v_h) @ fc_w, computed as
    sum_h (P_h V_h) @ fc_w[h*dh:(h+1)*dh, :] so no lane concat is needed.
    """
    H = q.shape[-1]
    dh = H // n_heads
    acc = None
    for h in range(n_heads):
        sl = slice(h * dh, (h + 1) * dh)
        s = _dot_nt(q[:, sl], k[:, sl]) + bias        # [Tq, Tk]
        p = _softmax_lastdim(s)
        o_h = _dot(p, v[:, sl])                       # [Tq, dh]
        c = _dot(o_h, fc_w[sl, :])                    # [Tq, H]
        acc = c if acc is None else acc + c
    return acc


def _add_layernorm(x, res, g, b):
    y = x + res
    mean = jnp.mean(y, axis=-1, keepdims=True)
    var = jnp.mean(jnp.square(y - mean), axis=-1, keepdims=True)
    return (y - mean) * jax.lax.rsqrt(var + LN_EPS) * g + b


# ---------------------------- the fused kernel ----------------------------

def _decoder_kernel(*refs, n_layers, n_heads):
    n_in = 9 + N_REFS_PER_LAYER * n_layers
    (trg_ref, src_ref, tbias_ref, sbias_ref, pbias_ref,
     ft_w, ft_b, fc_w, fc_b) = refs[:9]
    layer_refs = refs[9:n_in]
    out_ref = refs[n_in]

    H = src_ref.shape[-1]

    src = src_ref[...]          # [Ts, H]
    tbias = tbias_ref[...]      # [T, T]  additive self-attn mask bias
    sbias = sbias_ref[...]      # [T, Ts] additive src-attn mask bias

    # atom-feature embedding:  x = ft(trg)
    x = _dot(trg_ref[...], ft_w[...]) + ft_b[...]                 # [T, H]

    for li in range(n_layers):
        (ln_g, ln_b,
         sa_wqkv, sa_bqkv, sa_fcw, sa_fcb,
         ea_wq, ea_bq, ea_wkv, ea_bkv, ea_fcw, ea_fcb,
         pf_w1, pf_b1, pf_w2, pf_b2) = layer_refs[li * N_REFS_PER_LAYER:
                                                  (li + 1) * N_REFS_PER_LAYER]
        g = ln_g[...]
        be = ln_b[...]

        # --- self attention (one fused [H,3H] QKV matmul, heads folded in-kernel) ---
        qkv = _dot(x, sa_wqkv[...]) + sa_bqkv[...]                # [T, 3H]
        a = _mha_proj(qkv[:, :H], qkv[:, H:2 * H], qkv[:, 2 * H:],
                      tbias, sa_fcw[...], n_heads) + sa_fcb[...]
        x = _add_layernorm(x, a, g, be)                           # dropout == identity

        # --- encoder(src) attention (fused [H,2H] KV matmul) ---
        q = _dot(x, ea_wq[...]) + ea_bq[...]                      # [T, H]
        kv = _dot(src, ea_wkv[...]) + ea_bkv[...]                 # [Ts, 2H]
        a = _mha_proj(q, kv[:, :H], kv[:, H:],
                      sbias, ea_fcw[...], n_heads) + ea_fcb[...]
        x = _add_layernorm(x, a, g, be)

        # --- positionwise feedforward (Conv1d kernel_size=1 == per-token linear) ---
        h1 = jnp.maximum(_dot(x, pf_w1[...]) + pf_b1[...], 0.0)
        f = _dot(h1, pf_w2[...]) + pf_b2[...]
        x = _add_layernorm(x, f, g, be)

    # --- "use norm to decide which atom is significant" pooling ---
    nrm = jnp.sqrt(jnp.sum(x * x, axis=-1, keepdims=True)) + pbias_ref[...]   # [T, 1]
    nrm = nrm - jnp.max(nrm, axis=0, keepdims=True)
    w = jnp.exp(nrm)
    w = w * pl.reciprocal(jnp.sum(w, axis=0, keepdims=True), approx=True)
    pooled = jnp.sum(w * x, axis=0, keepdims=True)                            # [1, H]

    out = _dot(pooled, fc_w[...]) + fc_b[...]                                 # [1, 256]
    out_ref[...] = jnp.maximum(out, 0.0).astype(out_ref.dtype)


# ---------------------------- wrapper ----------------------------

def decoder_forward(params, trg, src, trg_mask, src_mask, n_heads):
    B, T, A = trg.shape
    _, Ts, H = src.shape
    n_layers = len(params["layers"])
    out_dim = params["fc_w"].shape[1]
    f32 = jnp.float32

    # Additive mask biases, built ONCE and reused by every layer.
    tbias = jnp.where(jnp.broadcast_to(trg_mask, (B, 1, T, T))[:, 0] == 0,
                      NEG_INF, 0.0).astype(f32)                               # [B, T, T]
    sbias = jnp.where(jnp.broadcast_to(src_mask, (B, 1, T, Ts))[:, 0] == 0,
                      NEG_INF, 0.0).astype(f32)                               # [B, T, Ts]
    pbias = jnp.where(trg_mask.reshape(B, T, 1) == 0, NEG_INF, 0.0).astype(f32)  # [B, T, 1]

    inputs = [trg.astype(f32), src.astype(f32), tbias, sbias, pbias,
              params["ft_w"], params["ft_b"], params["fc_w"], params["fc_b"]]
    for lp in params["layers"]:
        inputs += [lp["ln_g"], lp["ln_b"],
                   lp["sa_wqkv"], lp["sa_bqkv"], lp["sa_fcw"], lp["sa_fcb"],
                   lp["ea_wq"], lp["ea_bq"], lp["ea_wkv"], lp["ea_bkv"],
                   lp["ea_fcw"], lp["ea_fcb"],
                   lp["pf_w1"], lp["pf_b1"], lp["pf_w2"], lp["pf_b2"]]

    def batch3(arr):   # per-batch block; batch dim squeezed out of the kernel view
        _, d1, d2 = arr.shape
        return pl.BlockSpec((None, d1, d2), lambda b: (b, 0, 0))

    def whole2(arr):   # full 2-D array, same block every grid step (VMEM-resident)
        d0, d1 = arr.shape
        return pl.BlockSpec((d0, d1), lambda b: (0, 0))

    in_specs = [batch3(a) for a in inputs[:5]] + [whole2(a) for a in inputs[5:]]

    out = pl.pallas_call(
        functools.partial(_decoder_kernel, n_layers=n_layers, n_heads=n_heads),
        grid=(B,),
        in_specs=in_specs,
        out_specs=pl.BlockSpec((None, 1, out_dim), lambda b: (b, 0, 0)),
        out_shape=jax.ShapeDtypeStruct((B, 1, out_dim), f32),
        compiler_params=pltpu.CompilerParams(
            dimension_semantics=("parallel",)),   # batch shards across v7x's 2 TCs
    )(*inputs)
    return out.reshape(B, out_dim)


# ---------------------------- param init (packed layout) ----------------------------

def _init_linear(key, fan_in, fan_out):
    kw, kb = jax.random.split(key)
    w = jax.random.normal(kw, (fan_in, fan_out), jnp.float32) / math.sqrt(fan_in)
    b = jax.random.normal(kb, (fan_out,), jnp.float32) * 0.01
    return w, b


def init_params(key, atom_dim, hid_dim, n_layers, n_heads, pf_dim):
    """Weights stored transposed vs. PyTorch ([in, out]); Q/K/V fused into one matrix,
    the 1/sqrt(dh) softmax scale folded into the Q weights, biases kept as [1, N] rows."""
    inv_scale = 1.0 / math.sqrt(hid_dim // n_heads)
    keys = jax.random.split(key, 2 + n_layers)
    params = {}
    w, b = _init_linear(keys[0], atom_dim, hid_dim)
    params["ft_w"], params["ft_b"] = w, b.reshape(1, hid_dim)
    w, b = _init_linear(keys[1], hid_dim, 256)
    params["fc_w"], params["fc_b"] = w, b.reshape(1, 256)

    layers = []
    for li in range(n_layers):
        lk = jax.random.split(keys[2 + li], 10)
        wq, bq = _init_linear(lk[0], hid_dim, hid_dim)
        wk, bk = _init_linear(lk[1], hid_dim, hid_dim)
        wv, bv = _init_linear(lk[2], hid_dim, hid_dim)
        sfw, sfb = _init_linear(lk[3], hid_dim, hid_dim)
        ewq, ebq = _init_linear(lk[4], hid_dim, hid_dim)
        ewk, ebk = _init_linear(lk[5], hid_dim, hid_dim)
        ewv, ebv = _init_linear(lk[6], hid_dim, hid_dim)
        efw, efb = _init_linear(lk[7], hid_dim, hid_dim)
        w1, b1 = _init_linear(lk[8], hid_dim, pf_dim)
        w2, b2 = _init_linear(lk[9], pf_dim, hid_dim)
        layers.append({
            # one LayerNorm instance reused 3x per layer, as in the PyTorch DecoderLayer
            "ln_g": jnp.ones((1, hid_dim), jnp.float32),
            "ln_b": jnp.zeros((1, hid_dim), jnp.float32),
            # self-attention: fused QKV, softmax scale folded into the Q slice
            "sa_wqkv": jnp.concatenate([wq * inv_scale, wk, wv], axis=1),
            "sa_bqkv": jnp.concatenate([bq * inv_scale, bk, bv]).reshape(1, 3 * hid_dim),
            "sa_fcw": sfw, "sa_fcb": sfb.reshape(1, hid_dim),
            # encoder(src) attention: Q from trg (pre-scaled), fused K/V from src
            "ea_wq": ewq * inv_scale, "ea_bq": (ebq * inv_scale).reshape(1, hid_dim),
            "ea_wkv": jnp.concatenate([ewk, ewv], axis=1),
            "ea_bkv": jnp.concatenate([ebk, ebv]).reshape(1, 2 * hid_dim),
            "ea_fcw": efw, "ea_fcb": efb.reshape(1, hid_dim),
            # positionwise feedforward (Conv1d k=1 == linear)
            "pf_w1": w1, "pf_b1": b1.reshape(1, pf_dim),
            "pf_w2": w2, "pf_b2": b2.reshape(1, hid_dim),
        })
    params["layers"] = layers
    # TODO(synk): Decoder.ln, Decoder.sa and Decoder.gn (GroupNorm) are created in the
    # PyTorch __init__ but never used in forward(), so no params are allocated here.
    return params


# ---------------------------- main ----------------------------

if __name__ == "__main__":
    atom_dim, hid_dim, n_layers, n_heads, pf_dim = 16, 32, 2, 4, 64
    B, T_trg, T_src = 2, 8, 12

    key = jax.random.PRNGKey(0)
    k_par, k_trg, k_src = jax.random.split(key, 3)
    params = init_params(k_par, atom_dim, hid_dim, n_layers, n_heads, pf_dim)

    trg = jax.random.normal(k_trg, (B, T_trg, atom_dim), jnp.float32)
    src = jax.random.normal(k_src, (B, T_src, hid_dim), jnp.float32)
    # trg_mask: [B, 1, T_trg, 1] (all atoms valid); src_mask: [B, 1, 1, T_src]
    trg_mask = jnp.ones((B, 1, T_trg, 1), jnp.float32)
    src_valid = jnp.stack([
        jnp.ones((T_src,), jnp.float32),
        jnp.concatenate([jnp.ones((T_src - 2,), jnp.float32),
                         jnp.zeros((2,), jnp.float32)])])
    src_mask = src_valid.reshape(B, 1, 1, T_src)

    fwd = jax.jit(functools.partial(decoder_forward, n_heads=n_heads))
    out = fwd(params, trg, src, trg_mask, src_mask)
    out = jax.block_until_ready(out)

    assert out.shape == (B, 256), out.shape
    assert bool(jnp.all(jnp.isfinite(out)))
    print("KERNEL_OK")
</pallas_src>

<mosaic_0001>
module attributes {stable_mosaic.version = 11 : i64} {
  func.func @_decoder_kernel(%arg0: i32, %arg1: memref<1x8x16xf32, #tpu.memory_space<vmem>>, %arg2: memref<1x12x32xf32, #tpu.memory_space<vmem>>, %arg3: memref<1x8x8xf32, #tpu.memory_space<vmem>>, %arg4: memref<1x8x12xf32, #tpu.memory_space<vmem>>, %arg5: memref<1x8x1xf32, #tpu.memory_space<vmem>>, %arg6: memref<16x32xf32, #tpu.memory_space<vmem>>, %arg7: memref<1x32xf32, #tpu.memory_space<vmem>>, %arg8: memref<32x256xf32, #tpu.memory_space<vmem>>, %arg9: memref<1x256xf32, #tpu.memory_space<vmem>>, %arg10: memref<1x32xf32, #tpu.memory_space<vmem>>, %arg11: memref<1x32xf32, #tpu.memory_space<vmem>>, %arg12: memref<32x96xf32, #tpu.memory_space<vmem>>, %arg13: memref<1x96xf32, #tpu.memory_space<vmem>>, %arg14: memref<32x32xf32, #tpu.memory_space<vmem>>, %arg15: memref<1x32xf32, #tpu.memory_space<vmem>>, %arg16: memref<32x32xf32, #tpu.memory_space<vmem>>, %arg17: memref<1x32xf32, #tpu.memory_space<vmem>>, %arg18: memref<32x64xf32, #tpu.memory_space<vmem>>, %arg19: memref<1x64xf32, #tpu.memory_space<vmem>>, %arg20: memref<32x32xf32, #tpu.memory_space<vmem>>, %arg21: memref<1x32xf32, #tpu.memory_space<vmem>>, %arg22: memref<32x64xf32, #tpu.memory_space<vmem>>, %arg23: memref<1x64xf32, #tpu.memory_space<vmem>>, %arg24: memref<64x32xf32, #tpu.memory_space<vmem>>, %arg25: memref<1x32xf32, #tpu.memory_space<vmem>>, %arg26: memref<1x32xf32, #tpu.memory_space<vmem>>, %arg27: memref<1x32xf32, #tpu.memory_space<vmem>>, %arg28: memref<32x96xf32, #tpu.memory_space<vmem>>, %arg29: memref<1x96xf32, #tpu.memory_space<vmem>>, %arg30: memref<32x32xf32, #tpu.memory_space<vmem>>, %arg31: memref<1x32xf32, #tpu.memory_space<vmem>>, %arg32: memref<32x32xf32, #tpu.memory_space<vmem>>, %arg33: memref<1x32xf32, #tpu.memory_space<vmem>>, %arg34: memref<32x64xf32, #tpu.memory_space<vmem>>, %arg35: memref<1x64xf32, #tpu.memory_space<vmem>>, %arg36: memref<32x32xf32, #tpu.memory_space<vmem>>, %arg37: memref<1x32xf32, #tpu.memory_space<vmem>>, %arg38: memref<32x64xf32, #tpu.memory_space<vmem>>, %arg39: memref<1x64xf32, #tpu.memory_space<vmem>>, %arg40: memref<64x32xf32, #tpu.memory_space<vmem>>, %arg41: memref<1x32xf32, #tpu.memory_space<vmem>>, %arg42: memref<1x1x256xf32, #tpu.memory_space<vmem>>) attributes {dimension_semantics = [#tpu.dimension_semantics<parallel>], iteration_bounds = array<i64: 2>, scalar_prefetch = 0 : i64, scratch_operands = 0 : i64, tpu.core_type = #tpu.core_type<tc>, window_params = [{transform_indices = @transform_0, window_bounds = array<i64: 1, 8, 16>}, {transform_indices = @transform_1, window_bounds = array<i64: 1, 12, 32>}, {transform_indices = @transform_2, window_bounds = array<i64: 1, 8, 8>}, {transform_indices = @transform_3, window_bounds = array<i64: 1, 8, 12>}, {transform_indices = @transform_4, window_bounds = array<i64: 1, 8, 1>}, {pipeline_mode = #tpu.pipeline_mode<synchronous>, transform_indices = @transform_5, window_bounds = array<i64: 16, 32>}, {pipeline_mode = #tpu.pipeline_mode<synchronous>, transform_indices = @transform_6, window_bounds = array<i64: 1, 32>}, {pipeline_mode = #tpu.pipeline_mode<synchronous>, transform_indices = @transform_7, window_bounds = array<i64: 32, 256>}, {pipeline_mode = #tpu.pipeline_mode<synchronous>, transform_indices = @transform_8, window_bounds = array<i64: 1, 256>}, {pipeline_mode = #tpu.pipeline_mode<synchronous>, transform_indices = @transform_9, window_bounds = array<i64: 1, 32>}, {pipeline_mode = #tpu.pipeline_mode<synchronous>, transform_indices = @transform_10, window_bounds = array<i64: 1, 32>}, {pipeline_mode = #tpu.pipeline_mode<synchronous>, transform_indices = @transform_11, window_bounds = array<i64: 32, 96>}, {pipeline_mode = #tpu.pipeline_mode<synchronous>, transform_indices = @transform_12, window_bounds = array<i64: 1, 96>}, {pipeline_mode = #tpu.pipeline_mode<synchronous>, transform_indices = @transform_13, window_bounds = array<i64: 32, 32>}, {pipeline_mode = #tpu.pipeline_mode<synchronous>, transform_indices = @transform_14, window_bounds = array<i64: 1, 32>}, {pipeline_mode = #tpu.pipeline_mode<synchronous>, transform_indices = @transform_15, window_bounds = array<i64: 32, 32>}, {pipeline_mode = #tpu.pipeline_mode<synchronous>, transform_indices = @transform_16, window_bounds = array<i64: 1, 32>}, {pipeline_mode = #tpu.pipeline_mode<synchronous>, transform_indices = @transform_17, window_bounds = array<i64: 32, 64>}, {pipeline_mode = #tpu.pipeline_mode<synchronous>, transform_indices = @transform_18, window_bounds = array<i64: 1, 64>}, {pipeline_mode = #tpu.pipeline_mode<synchronous>, transform_indices = @transform_19, window_bounds = array<i64: 32, 32>}, {pipeline_mode = #tpu.pipeline_mode<synchronous>, transform_indices = @transform_20, window_bounds = array<i64: 1, 32>}, {pipeline_mode = #tpu.pipeline_mode<synchronous>, transform_indices = @transform_21, window_bounds = array<i64: 32, 64>}, {pipeline_mode = #tpu.pipeline_mode<synchronous>, transform_indices = @transform_22, window_bounds = array<i64: 1, 64>}, {pipeline_mode = #tpu.pipeline_mode<synchronous>, transform_indices = @transform_23, window_bounds = array<i64: 64, 32>}, {pipeline_mode = #tpu.pipeline_mode<synchronous>, transform_indices = @transform_24, window_bounds = array<i64: 1, 32>}, {pipeline_mode = #tpu.pipeline_mode<synchronous>, transform_indices = @transform_25, window_bounds = array<i64: 1, 32>}, {pipeline_mode = #tpu.pipeline_mode<synchronous>, transform_indices = @transform_26, window_bounds = array<i64: 1, 32>}, {pipeline_mode = #tpu.pipeline_mode<synchronous>, transform_indices = @transform_27, window_bounds = array<i64: 32, 96>}, {pipeline_mode = #tpu.pipeline_mode<synchronous>, transform_indices = @transform_28, window_bounds = array<i64: 1, 96>}, {pipeline_mode = #tpu.pipeline_mode<synchronous>, transform_indices = @transform_29, window_bounds = array<i64: 32, 32>}, {pipeline_mode = #tpu.pipeline_mode<synchronous>, transform_indices = @transform_30, window_bounds = array<i64: 1, 32>}, {pipeline_mode = #tpu.pipeline_mode<synchronous>, transform_indices = @transform_31, window_bounds = array<i64: 32, 32>}, {pipeline_mode = #tpu.pipeline_mode<synchronous>, transform_indices = @transform_32, window_bounds = array<i64: 1, 32>}, {pipeline_mode = #tpu.pipeline_mode<synchronous>, transform_indices = @transform_33, window_bounds = array<i64: 32, 64>}, {pipeline_mode = #tpu.pipeline_mode<synchronous>, transform_indices = @transform_34, window_bounds = array<i64: 1, 64>}, {pipeline_mode = #tpu.pipeline_mode<synchronous>, transform_indices = @transform_35, window_bounds = array<i64: 32, 32>}, {pipeline_mode = #tpu.pipeline_mode<synchronous>, transform_indices = @transform_36, window_bounds = array<i64: 1, 32>}, {pipeline_mode = #tpu.pipeline_mode<synchronous>, transform_indices = @transform_37, window_bounds = array<i64: 32, 64>}, {pipeline_mode = #tpu.pipeline_mode<synchronous>, transform_indices = @transform_38, window_bounds = array<i64: 1, 64>}, {pipeline_mode = #tpu.pipeline_mode<synchronous>, transform_indices = @transform_39, window_bounds = array<i64: 64, 32>}, {pipeline_mode = #tpu.pipeline_mode<synchronous>, transform_indices = @transform_40, window_bounds = array<i64: 1, 32>}, {transform_indices = @transform_41, window_bounds = array<i64: 1, 1, 256>}]} {
    %c0 = arith.constant 0 : index
    %c0_0 = arith.constant 0 : index
    %c0_1 = arith.constant 0 : index
    %0 = vector.load %arg2[%c0, %c0_0, %c0_1] : memref<1x12x32xf32, #tpu.memory_space<vmem>>, vector<1x12x32xf32>
    %1 = vector.shape_cast %0 : vector<1x12x32xf32> to vector<12x32xf32>
    %c0_2 = arith.constant 0 : index
    %c0_3 = arith.constant 0 : index
    %c0_4 = arith.constant 0 : index
    %2 = vector.load %arg3[%c0_2, %c0_3, %c0_4] : memref<1x8x8xf32, #tpu.memory_space<vmem>>, vector<1x8x8xf32>
    %3 = vector.shape_cast %2 : vector<1x8x8xf32> to vector<8x8xf32>
    %c0_5 = arith.constant 0 : index
    %c0_6 = arith.constant 0 : index
    %c0_7 = arith.constant 0 : index
    %4 = vector.load %arg4[%c0_5, %c0_6, %c0_7] : memref<1x8x12xf32, #tpu.memory_space<vmem>>, vector<1x8x12xf32>
    %5 = vector.shape_cast %4 : vector<1x8x12xf32> to vector<8x12xf32>
    %c0_8 = arith.constant 0 : index
    %c0_9 = arith.constant 0 : index
    %c0_10 = arith.constant 0 : index
    %6 = vector.load %arg1[%c0_8, %c0_9, %c0_10] : memref<1x8x16xf32, #tpu.memory_space<vmem>>, vector<1x8x16xf32>
    %7 = vector.shape_cast %6 : vector<1x8x16xf32> to vector<8x16xf32>
    %c0_11 = arith.constant 0 : index
    %c0_12 = arith.constant 0 : index
    %8 = vector.load %arg6[%c0_11, %c0_12] : memref<16x32xf32, #tpu.memory_space<vmem>>, vector<16x32xf32>
    %cst = arith.constant dense<0.000000e+00> : vector<8x32xf32>
    %9 = tpu.matmul %7, %8, %cst {dimension_numbers = #tpu.dot_dimension_numbers<[1], [0], [0], [1], [0, 0, 1, 1], [], []>} : vector<8x16xf32>, vector<16x32xf32>, vector<8x32xf32> -> vector<8x32xf32>
    %c0_13 = arith.constant 0 : index
    %c0_14 = arith.constant 0 : index
    %10 = vector.load %arg7[%c0_13, %c0_14] : memref<1x32xf32, #tpu.memory_space<vmem>>, vector<1x32xf32>
    %11 = vector.broadcast %10 : vector<1x32xf32> to vector<8x32xf32>
    %12 = arith.addf %9, %11 : vector<8x32xf32>
    %c0_15 = arith.constant 0 : index
    %c0_16 = arith.constant 0 : index
    %13 = vector.load %arg10[%c0_15, %c0_16] : memref<1x32xf32, #tpu.memory_space<vmem>>, vector<1x32xf32>
    %c0_17 = arith.constant 0 : index
    %c0_18 = arith.constant 0 : index
    %14 = vector.load %arg11[%c0_17, %c0_18] : memref<1x32xf32, #tpu.memory_space<vmem>>, vector<1x32xf32>
    %c0_19 = arith.constant 0 : index
    %c0_20 = arith.constant 0 : index
    %15 = vector.load %arg12[%c0_19, %c0_20] : memref<32x96xf32, #tpu.memory_space<vmem>>, vector<32x96xf32>
    %cst_21 = arith.constant dense<0.000000e+00> : vector<8x96xf32>
    %16 = tpu.matmul %12, %15, %cst_21 {dimension_numbers = #tpu.dot_dimension_numbers<[1], [0], [0], [1], [0, 0, 1, 1], [], []>} : vector<8x32xf32>, vector<32x96xf32>, vector<8x96xf32> -> vector<8x96xf32>
    %c0_22 = arith.constant 0 : index
    %c0_23 = arith.constant 0 : index
    %17 = vector.load %arg13[%c0_22, %c0_23] : memref<1x96xf32, #tpu.memory_space<vmem>>, vector<1x96xf32>
    %18 = vector.broadcast %17 : vector<1x96xf32> to vector<8x96xf32>
    %19 = arith.addf %16, %18 : vector<8x96xf32>
    %20 = vector.extract_strided_slice %19 {offsets = [0, 0], sizes = [8, 32], strides = [1, 1]} : vector<8x96xf32> to vector<8x32xf32>
    %21 = vector.extract_strided_slice %19 {offsets = [0, 32], sizes = [8, 32], strides = [1, 1]} : vector<8x96xf32> to vector<8x32xf32>
    %22 = vector.extract_strided_slice %19 {offsets = [0, 64], sizes = [8, 32], strides = [1, 1]} : vector<8x96xf32> to vector<8x32xf32>
    %c0_24 = arith.constant 0 : index
    %c0_25 = arith.constant 0 : index
    %23 = vector.load %arg14[%c0_24, %c0_25] : memref<32x32xf32, #tpu.memory_space<vmem>>, vector<32x32xf32>
    %24 = vector.extract_strided_slice %20 {offsets = [0, 0], sizes = [8, 8], strides = [1, 1]} : vector<8x32xf32> to vector<8x8xf32>
    %25 = vector.extract_strided_slice %21 {offsets = [0, 0], sizes = [8, 8], strides = [1, 1]} : vector<8x32xf32> to vector<8x8xf32>
    %cst_26 = arith.constant dense<0.000000e+00> : vector<8x8xf32>
    %26 = tpu.matmul %24, %25, %cst_26 {dimension_numbers = #tpu.dot_dimension_numbers<[1], [1], [0], [0], [0, 0, 1, 0], [], []>} : vector<8x8xf32>, vector<8x8xf32>, vector<8x8xf32> -> vector<8x8xf32>
    %27 = arith.addf %26, %3 : vector<8x8xf32>
    %cst_27 = arith.constant dense<0xFF800000> : vector<8xf32>
    %28 = vector.multi_reduction <maximumf>, %27, %cst_27 [1] : vector<8x8xf32> to vector<8xf32>
    %29 = vector.shape_cast %28 : vector<8xf32> to vector<8x1xf32>
    %30 = vector.broadcast %29 : vector<8x1xf32> to vector<8x8xf32>
    %31 = arith.subf %27, %30 : vector<8x8xf32>
    %32 = math.exp %31 : vector<8x8xf32>
    %cst_28 = arith.constant dense<0.000000e+00> : vector<8xf32>
    %33 = vector.multi_reduction <add>, %32, %cst_28 [1] : vector<8x8xf32> to vector<8xf32>
    %34 = vector.shape_cast %33 : vector<8xf32> to vector<8x1xf32>
    %35 = tpu.reciprocal %34 {approx = true} : vector<8x1xf32> -> vector<8x1xf32>
    %36 = vector.broadcast %35 : vector<8x1xf32> to vector<8x8xf32>
    %37 = arith.mulf %32, %36 : vector<8x8xf32>
    %38 = vector.extract_strided_slice %22 {offsets = [0, 0], sizes = [8, 8], strides = [1, 1]} : vector<8x32xf32> to vector<8x8xf32>
    %cst_29 = arith.constant dense<0.000000e+00> : vector<8x8xf32>
    %39 = tpu.matmul %37, %38, %cst_29 {dimension_numbers = #tpu.dot_dimension_numbers<[1], [0], [0], [1], [0, 0, 1, 1], [], []>} : vector<8x8xf32>, vector<8x8xf32>, vector<8x8xf32> -> vector<8x8xf32>
    %40 = vector.extract_strided_slice %23 {offsets = [0, 0], sizes = [8, 32], strides = [1, 1]} : vector<32x32xf32> to vector<8x32xf32>
    %cst_30 = arith.constant dense<0.000000e+00> : vector<8x32xf32>
    %41 = tpu.matmul %39, %40, %cst_30 {dimension_numbers = #tpu.dot_dimension_numbers<[1], [0], [0], [1], [0, 0, 1, 1], [], []>} : vector<8x8xf32>, vector<8x32xf32>, vector<8x32xf32> -> vector<8x32xf32>
    %42 = vector.extract_strided_slice %20 {offsets = [0, 8], sizes = [8, 8], strides = [1, 1]} : vector<8x32xf32> to vector<8x8xf32>
    %43 = vector.extract_strided_slice %21 {offsets = [0, 8], sizes = [8, 8], strides = [1, 1]} : vector<8x32xf32> to vector<8x8xf32>
    %cst_31 = arith.constant dense<0.000000e+00> : vector<8x8xf32>
    %44 = tpu.matmul %42, %43, %cst_31 {dimension_numbers = #tpu.dot_dimension_numbers<[1], [1], [0], [0], [0, 0, 1, 0], [], []>} : vector<8x8xf32>, vector<8x8xf32>, vector<8x8xf32> -> vector<8x8xf32>
    %45 = arith.addf %44, %3 : vector<8x8xf32>
    %cst_32 = arith.constant dense<0xFF800000> : vector<8xf32>
    %46 = vector.multi_reduction <maximumf>, %45, %cst_32 [1] : vector<8x8xf32> to vector<8xf32>
    %47 = vector.shape_cast %46 : vector<8xf32> to vector<8x1xf32>
    %48 = vector.broadcast %47 : vector<8x1xf32> to vector<8x8xf32>
    %49 = arith.subf %45, %48 : vector<8x8xf32>
    %50 = math.exp %49 : vector<8x8xf32>
    %cst_33 = arith.constant dense<0.000000e+00> : vector<8xf32>
    %51 = vector.multi_reduction <add>, %50, %cst_33 [1] : vector<8x8xf32> to vector<8xf32>
    %52 = vector.shape_cast %51 : vector<8xf32> to vector<8x1xf32>
    %53 = tpu.reciprocal %52 {approx = true} : vector<8x1xf32> -> vector<8x1xf32>
    %54 = vector.broadcast %53 : vector<8x1xf32> to vector<8x8xf32>
    %55 = arith.mulf %50, %54 : vector<8x8xf32>
    %56 = vector.extract_strided_slice %22 {offsets = [0, 8], sizes = [8, 8], strides = [1, 1]} : vector<8x32xf32> to vector<8x8xf32>
    %cst_34 = arith.constant dense<0.000000e+00> : vector<8x8xf32>
    %57 = tpu.matmul %55, %56, %cst_34 {dimension_numbers = #tpu.dot_dimension_numbers<[1], [0], [0], [1], [0, 0, 1, 1], [], []>} : vector<8x8xf32>, vector<8x8xf32>, vector<8x8xf32> -> vector<8x8xf32>
    %58 = vector.extract_strided_slice %23 {offsets = [8, 0], sizes = [8, 32], strides = [1, 1]} : vector<32x32xf32> to vector<8x32xf32>
    %cst_35 = arith.constant dense<0.000000e+00> : vector<8x32xf32>
    %59 = tpu.matmul %57, %58, %cst_35 {dimension_numbers = #tpu.dot_dimension_numbers<[1], [0], [0], [1], [0, 0, 1, 1], [], []>} : vector<8x8xf32>, vector<8x32xf32>, vector<8x32xf32> -> vector<8x32xf32>
    %60 = arith.addf %41, %59 : vector<8x32xf32>
    %61 = vector.extract_strided_slice %20 {offsets = [0, 16], sizes = [8, 8], strides = [1, 1]} : vector<8x32xf32> to vector<8x8xf32>
    %62 = vector.extract_strided_slice %21 {offsets = [0, 16], sizes = [8, 8], strides = [1, 1]} : vector<8x32xf32> to vector<8x8xf32>
    %cst_36 = arith.constant dense<0.000000e+00> : vector<8x8xf32>
    %63 = tpu.matmul %61, %62, %cst_36 {dimension_numbers = #tpu.dot_dimension_numbers<[1], [1], [0], [0], [0, 0, 1, 0], [], []>} : vector<8x8xf32>, vector<8x8xf32>, vector<8x8xf32> -> vector<8x8xf32>
    %64 = arith.addf %63, %3 : vector<8x8xf32>
    %cst_37 = arith.constant dense<0xFF800000> : vector<8xf32>
    %65 = vector.multi_reduction <maximumf>, %64, %cst_37 [1] : vector<8x8xf32> to vector<8xf32>
    %66 = vector.shape_cast %65 : vector<8xf32> to vector<8x1xf32>
    %67 = vector.broadcast %66 : vector<8x1xf32> to vector<8x8xf32>
    %68 = arith.subf %64, %67 : vector<8x8xf32>
    %69 = math.exp %68 : vector<8x8xf32>
    %cst_38 = arith.constant dense<0.000000e+00> : vector<8xf32>
    %70 = vector.multi_reduction <add>, %69, %cst_38 [1] : vector<8x8xf32> to vector<8xf32>
    %71 = vector.shape_cast %70 : vector<8xf32> to vector<8x1xf32>
    %72 = tpu.reciprocal %71 {approx = true} : vector<8x1xf32> -> vector<8x1xf32>
    %73 = vector.broadcast %72 : vector<8x1xf32> to vector<8x8xf32>
    %74 = arith.mulf %69, %73 : vector<8x8xf32>
    %75 = vector.extract_strided_slice %22 {offsets = [0, 16], sizes = [8, 8], strides = [1, 1]} : vector<8x32xf32> to vector<8x8xf32>
    %cst_39 = arith.constant dense<0.000000e+00> : vector<8x8xf32>
    %76 = tpu.matmul %74, %75, %cst_39 {dimension_numbers = #tpu.dot_dimension_numbers<[1], [0], [0], [1], [0, 0, 1, 1], [], []>} : vector<8x8xf32>, vector<8x8xf32>, vector<8x8xf32> -> vector<8x8xf32>
    %77 = vector.extract_strided_slice %23 {offsets = [16, 0], sizes = [8, 32], strides = [1, 1]} : vector<32x32xf32> to vector<8x32xf32>
    %cst_40 = arith.constant dense<0.000000e+00> : vector<8x32xf32>
    %78 = tpu.matmul %76, %77, %cst_40 {dimension_numbers = #tpu.dot_dimension_numbers<[1], [0], [0], [1], [0, 0, 1, 1], [], []>} : vector<8x8xf32>, vector<8x32xf32>, vector<8x32xf32> -> vector<8x32xf32>
    %79 = arith.addf %60, %78 : vector<8x32xf32>
    %80 = vector.extract_strided_slice %20 {offsets = [0, 24], sizes = [8, 8], strides = [1, 1]} : vector<8x32xf32> to vector<8x8xf32>
    %81 = vector.extract_strided_slice %21 {offsets = [0, 24], sizes = [8, 8], strides = [1, 1]} : vector<8x32xf32> to vector<8x8xf32>
    %cst_41 = arith.constant dense<0.000000e+00> : vector<8x8xf32>
    %82 = tpu.matmul %80, %81, %cst_41 {dimension_numbers = #tpu.dot_dimension_numbers<[1], [1], [0], [0], [0, 0, 1, 0], [], []>} : vector<8x8xf32>, vector<8x8xf32>, vector<8x8xf32> -> vector<8x8xf32>
    %83 = arith.addf %82, %3 : vector<8x8xf32>
    %cst_42 = arith.constant dense<0xFF800000> : vector<8xf32>
    %84 = vector.multi_reduction <maximumf>, %83, %cst_42 [1] : vector<8x8xf32> to vector<8xf32>
    %85 = vector.shape_cast %84 : vector<8xf32> to vector<8x1xf32>
    %86 = vector.broadcast %85 : vector<8x1xf32> to vector<8x8xf32>
    %87 = arith.subf %83, %86 : vector<8x8xf32>
    %88 = math.exp %87 : vector<8x8xf32>
    %cst_43 = arith.constant dense<0.000000e+00> : vector<8xf32>
    %89 = vector.multi_reduction <add>, %88, %cst_43 [1] : vector<8x8xf32> to vector<8xf32>
    %90 = vector.shape_cast %89 : vector<8xf32> to vector<8x1xf32>
    %91 = tpu.reciprocal %90 {approx = true} : vector<8x1xf32> -> vector<8x1xf32>
    %92 = vector.broadcast %91 : vector<8x1xf32> to vector<8x8xf32>
    %93 = arith.mulf %88, %92 : vector<8x8xf32>
    %94 = vector.extract_strided_slice %22 {offsets = [0, 24], sizes = [8, 8], strides = [1, 1]} : vector<8x32xf32> to vector<8x8xf32>
    %cst_44 = arith.constant dense<0.000000e+00> : vector<8x8xf32>
    %95 = tpu.matmul %93, %94, %cst_44 {dimension_numbers = #tpu.dot_dimension_numbers<[1], [0], [0], [1], [0, 0, 1, 1], [], []>} : vector<8x8xf32>, vector<8x8xf32>, vector<8x8xf32> -> vector<8x8xf32>
    %96 = vector.extract_strided_slice %23 {offsets = [24, 0], sizes = [8, 32], strides = [1, 1]} : vector<32x32xf32> to vector<8x32xf32>
    %cst_45 = arith.constant dense<0.000000e+00> : vector<8x32xf32>
    %97 = tpu.matmul %95, %96, %cst_45 {dimension_numbers = #tpu.dot_dimension_numbers<[1], [0], [0], [1], [0, 0, 1, 1], [], []>} : vector<8x8xf32>, vector<8x32xf32>, vector<8x32xf32> -> vector<8x32xf32>
    %98 = arith.addf %79, %97 : vector<8x32xf32>
    %c0_46 = arith.constant 0 : index
    %c0_47 = arith.constant 0 : index
    %99 = vector.load %arg15[%c0_46, %c0_47] : memref<1x32xf32, #tpu.memory_space<vmem>>, vector<1x32xf32>
    %100 = vector.broadcast %99 : vector<1x32xf32> to vector<8x32xf32>
    %101 = arith.addf %98, %100 : vector<8x32xf32>
    %102 = arith.addf %12, %101 : vector<8x32xf32>
    %cst_48 = arith.constant dense<0.000000e+00> : vector<8xf32>
    %103 = vector.multi_reduction <add>, %102, %cst_48 [1] : vector<8x32xf32> to vector<8xf32>
    %104 = vector.shape_cast %103 : vector<8xf32> to vector<8x1xf32>
    %cst_49 = arith.constant 3.200000e+01 : f32
    %105 = vector.broadcast %cst_49 : f32 to vector<8x1xf32>
    %106 = arith.divf %104, %105 : vector<8x1xf32>
    %107 = vector.broadcast %106 : vector<8x1xf32> to vector<8x32xf32>
    %108 = arith.subf %102, %107 : vector<8x32xf32>
    %109 = arith.mulf %108, %108 : vector<8x32xf32>
    %cst_50 = arith.constant dense<0.000000e+00> : vector<8xf32>
    %110 = vector.multi_reduction <add>, %109, %cst_50 [1] : vector<8x32xf32> to vector<8xf32>
    %111 = vector.shape_cast %110 : vector<8xf32> to vector<8x1xf32>
    %cst_51 = arith.constant 3.200000e+01 : f32
    %112 = vector.broadcast %cst_51 : f32 to vector<8x1xf32>
    %113 = arith.divf %111, %112 : vector<8x1xf32>
    %114 = vector.broadcast %106 : vector<8x1xf32> to vector<8x32xf32>
    %115 = arith.subf %102, %114 : vector<8x32xf32>
    %cst_52 = arith.constant 9.99999974E-6 : f32
    %116 = vector.broadcast %cst_52 : f32 to vector<8x1xf32>
    %117 = arith.addf %113, %116 : vector<8x1xf32>
    %118 = math.rsqrt %117 : vector<8x1xf32>
    %119 = vector.broadcast %118 : vector<8x1xf32> to vector<8x32xf32>
    %120 = arith.mulf %115, %119 : vector<8x32xf32>
    %121 = vector.broadcast %13 : vector<1x32xf32> to vector<8x32xf32>
    %122 = arith.mulf %120, %121 : vector<8x32xf32>
    %123 = vector.broadcast %14 : vector<1x32xf32> to vector<8x32xf32>
    %124 = arith.addf %122, %123 : vector<8x32xf32>
    %c0_53 = arith.constant 0 : index
    %c0_54 = arith.constant 0 : index
    %125 = vector.load %arg16[%c0_53, %c0_54] : memref<32x32xf32, #tpu.memory_space<vmem>>, vector<32x32xf32>
    %cst_55 = arith.constant dense<0.000000e+00> : vector<8x32xf32>
    %126 = tpu.matmul %124, %125, %cst_55 {dimension_numbers = #tpu.dot_dimension_numbers<[1], [0], [0], [1], [0, 0, 1, 1], [], []>} : vector<8x32xf32>, vector<32x32xf32>, vector<8x32xf32> -> vector<8x32xf32>
    %c0_56 = arith.constant 0 : index
    %c0_57 = arith.constant 0 : index
    %127 = vector.load %arg17[%c0_56, %c0_57] : memref<1x32xf32, #tpu.memory_space<vmem>>, vector<1x32xf32>
    %128 = vector.broadcast %127 : vector<1x32xf32> to vector<8x32xf32>
    %129 = arith.addf %126, %128 : vector<8x32xf32>
    %c0_58 = arith.constant 0 : index
    %c0_59 = arith.constant 0 : index
    %130 = vector.load %arg18[%c0_58, %c0_59] : memref<32x64xf32, #tpu.memory_space<vmem>>, vector<32x64xf32>
    %cst_60 = arith.constant dense<0.000000e+00> : vector<12x64xf32>
    %131 = tpu.matmul %1, %130, %cst_60 {dimension_numbers = #tpu.dot_dimension_numbers<[1], [0], [0], [1], [0, 0, 1, 1], [], []>} : vector<12x32xf32>, vector<32x64xf32>, vector<12x64xf32> -> vector<12x64xf32>
    %c0_61 = arith.constant 0 : index
    %c0_62 = arith.constant 0 : index
    %132 = vector.load %arg19[%c0_61, %c0_62] : memref<1x64xf32, #tpu.memory_space<vmem>>, vector<1x64xf32>
    %133 = vector.broadcast %132 : vector<1x64xf32> to vector<12x64xf32>
    %134 = arith.addf %131, %133 : vector<12x64xf32>
    %135 = vector.extract_strided_slice %134 {offsets = [0, 0], sizes = [12, 32], strides = [1, 1]} : vector<12x64xf32> to vector<12x32xf32>
    %136 = vector.extract_strided_slice %134 {offsets = [0, 32], sizes = [12, 32], strides = [1, 1]} : vector<12x64xf32> to vector<12x32xf32>
    %c0_63 = arith.constant 0 : index
    %c0_64 = arith.constant 0 : index
    %137 = vector.load %arg20[%c0_63, %c0_64] : memref<32x32xf32, #tpu.memory_space<vmem>>, vector<32x32xf32>
    %138 = vector.extract_strided_slice %129 {offsets = [0, 0], sizes = [8, 8], strides = [1, 1]} : vector<8x32xf32> to vector<8x8xf32>
    %139 = vector.extract_strided_slice %135 {offsets = [0, 0], sizes = [12, 8], strides = [1, 1]} : vector<12x32xf32> to vector<12x8xf32>
    %cst_65 = arith.constant dense<0.000000e+00> : vector<8x12xf32>
    %140 = tpu.matmul %138, %139, %cst_65 {dimension_numbers = #tpu.dot_dimension_numbers<[1], [1], [0], [0], [0, 0, 1, 0], [], []>} : vector<8x8xf32>, vector<12x8xf32>, vector<8x12xf32> -> vector<8x12xf32>
    %141 = arith.addf %140, %5 : vector<8x12xf32>
    %cst_66 = arith.constant dense<0xFF800000> : vector<8xf32>
    %142 = vector.multi_reduction <maximumf>, %141, %cst_66 [1] : vector<8x12xf32> to vector<8xf32>
    %143 = vector.shape_cast %142 : vector<8xf32> to vector<8x1xf32>
    %144 = vector.broadcast %143 : vector<8x1xf32> to vector<8x12xf32>
    %145 = arith.subf %141, %144 : vector<8x12xf32>
    %146 = math.exp %145 : vector<8x12xf32>
    %cst_67 = arith.constant dense<0.000000e+00> : vector<8xf32>
    %147 = vector.multi_reduction <add>, %146, %cst_67 [1] : vector<8x12xf32> to vector<8xf32>
    %148 = vector.shape_cast %147 : vector<8xf32> to vector<8x1xf32>
    %149 = tpu.reciprocal %148 {approx = true} : vector<8x1xf32> -> vector<8x1xf32>
    %150 = vector.broadcast %149 : vector<8x1xf32> to vector<8x12xf32>
    %151 = arith.mulf %146, %150 : vector<8x12xf32>
    %152 = vector.extract_strided_slice %136 {offsets = [0, 0], sizes = [12, 8], strides = [1, 1]} : vector<12x32xf32> to vector<12x8xf32>
    %cst_68 = arith.constant dense<0.000000e+00> : vector<8x8xf32>
    %153 = tpu.matmul %151, %152, %cst_68 {dimension_numbers = #tpu.dot_dimension_numbers<[1], [0], [0], [1], [0, 0, 1, 1], [], []>} : vector<8x12xf32>, vector<12x8xf32>, vector<8x8xf32> -> vector<8x8xf32>
    %154 = vector.extract_strided_slice %137 {offsets = [0, 0], sizes = [8, 32], strides = [1, 1]} : vector<32x32xf32> to vector<8x32xf32>
    %cst_69 = arith.constant dense<0.000000e+00> : vector<8x32xf32>
    %155 = tpu.matmul %153, %154, %cst_69 {dimension_numbers = #tpu.dot_dimension_numbers<[1], [0], [0], [1], [0, 0, 1, 1], [], []>} : vector<8x8xf32>, vector<8x32xf32>, vector<8x32xf32> -> vector<8x32xf32>
    %156 = vector.extract_strided_slice %129 {offsets = [0, 8], sizes = [8, 8], strides = [1, 1]} : vector<8x32xf32> to vector<8x8xf32>
    %157 = vector.extract_strided_slice %135 {offsets = [0, 8], sizes = [12, 8], strides = [1, 1]} : vector<12x32xf32> to vector<12x8xf32>
    %cst_70 = arith.constant dense<0.000000e+00> : vector<8x12xf32>
    %158 = tpu.matmul %156, %157, %cst_70 {dimension_numbers = #tpu.dot_dimension_numbers<[1], [1], [0], [0], [0, 0, 1, 0], [], []>} : vector<8x8xf32>, vector<12x8xf32>, vector<8x12xf32> -> vector<8x12xf32>
    %159 = arith.addf %158, %5 : vector<8x12xf32>
    %cst_71 = arith.constant dense<0xFF800000> : vector<8xf32>
    %160 = vector.multi_reduction <maximumf>, %159, %cst_71 [1] : vector<8x12xf32> to vector<8xf32>
    %161 = vector.shape_cast %160 : vector<8xf32> to vector<8x1xf32>
    %162 = vector.broadcast %161 : vector<8x1xf32> to vector<8x12xf32>
    %163 = arith.subf %159, %162 : vector<8x12xf32>
    %164 = math.exp %163 : vector<8x12xf32>
    %cst_72 = arith.constant dense<0.000000e+00> : vector<8xf32>
    %165 = vector.multi_reduction <add>, %164, %cst_72 [1] : vector<8x12xf32> to vector<8xf32>
    %166 = vector.shape_cast %165 : vector<8xf32> to vector<8x1xf32>
    %167 = tpu.reciprocal %166 {approx = true} : vector<8x1xf32> -> vector<8x1xf32>
    %168 = vector.broadcast %167 : vector<8x1xf32> to vector<8x12xf32>
    %169 = arith.mulf %164, %168 : vector<8x12xf32>
    %170 = vector.extract_strided_slice %136 {offsets = [0, 8], sizes = [12, 8], strides = [1, 1]} : vector<12x32xf32> to vector<12x8xf32>
    %cst_73 = arith.constant dense<0.000000e+00> : vector<8x8xf32>
    %171 = tpu.matmul %169, %170, %cst_73 {dimension_numbers = #tpu.dot_dimension_numbers<[1], [0], [0], [1], [0, 0, 1, 1], [], []>} : vector<8x12xf32>, vector<12x8xf32>, vector<8x8xf32> -> vector<8x8xf32>
    %172 = vector.extract_strided_slice %137 {offsets = [8, 0], sizes = [8, 32], strides = [1, 1]} : vector<32x32xf32> to vector<8x32xf32>
    %cst_74 = arith.constant dense<0.000000e+00> : vector<8x32xf32>
    %173 = tpu.matmul %171, %172, %cst_74 {dimension_numbers = #tpu.dot_dimension_numbers<[1], [0], [0], [1], [0, 0, 1, 1], [], []>} : vector<8x8xf32>, vector<8x32xf32>, vector<8x32xf32> -> vector<8x32xf32>
    %174 = arith.addf %155, %173 : vector<8x32xf32>
    %175 = vector.extract_strided_slice %129 {offsets = [0, 16], sizes = [8, 8], strides = [1, 1]} : vector<8x32xf32> to vector<8x8xf32>
    %176 = vector.extract_strided_slice %135 {offsets = [0, 16], sizes = [12, 8], strides = [1, 1]} : vector<12x32xf32> to vector<12x8xf32>
    %cst_75 = arith.constant dense<0.000000e+00> : vector<8x12xf32>
    %177 = tpu.matmul %175, %176, %cst_75 {dimension_numbers = #tpu.dot_dimension_numbers<[1], [1], [0], [0], [0, 0, 1, 0], [], []>} : vector<8x8xf32>, vector<12x8xf32>, vector<8x12xf32> -> vector<8x12xf32>
    %178 = arith.addf %177, %5 : vector<8x12xf32>
    %cst_76 = arith.constant dense<0xFF800000> : vector<8xf32>
    %179 = vector.multi_reduction <maximumf>, %178, %cst_76 [1] : vector<8x12xf32> to vector<8xf32>
    %180 = vector.shape_cast %179 : vector<8xf32> to vector<8x1xf32>
    %181 = vector.broadcast %180 : vector<8x1xf32> to vector<8x12xf32>
    %182 = arith.subf %178, %181 : vector<8x12xf32>
    %183 = math.exp %182 : vector<8x12xf32>
    %cst_77 = arith.constant dense<0.000000e+00> : vector<8xf32>
    %184 = vector.multi_reduction <add>, %183, %cst_77 [1] : vector<8x12xf32> to vector<8xf32>
    %185 = vector.shape_cast %184 : vector<8xf32> to vector<8x1xf32>
    %186 = tpu.reciprocal %185 {approx = true} : vector<8x1xf32> -> vector<8x1xf32>
    %187 = vector.broadcast %186 : vector<8x1xf32> to vector<8x12xf32>
    %188 = arith.mulf %183, %187 : vector<8x12xf32>
    %189 = vector.extract_strided_slice %136 {offsets = [0, 16], sizes = [12, 8], strides = [1, 1]} : vector<12x32xf32> to vector<12x8xf32>
    %cst_78 = arith.constant dense<0.000000e+00> : vector<8x8xf32>
    %190 = tpu.matmul %188, %189, %cst_78 {dimension_numbers = #tpu.dot_dimension_numbers<[1], [0], [0], [1], [0, 0, 1, 1], [], []>} : vector<8x12xf32>, vector<12x8xf32>, vector<8x8xf32> -> vector<8x8xf32>
    %191 = vector.extract_strided_slice %137 {offsets = [16, 0], sizes = [8, 32], strides = [1, 1]} : vector<32x32xf32> to vector<8x32xf32>
    %cst_79 = arith.constant dense<0.000000e+00> : vector<8x32xf32>
    %192 = tpu.matmul %190, %191, %cst_79 {dimension_numbers = #tpu.dot_dimension_numbers<[1], [0], [0], [1], [0, 0, 1, 1], [], []>} : vector<8x8xf32>, vector<8x32xf32>, vector<8x32xf32> -> vector<8x32xf32>
    %193 = arith.addf %174, %192 : vector<8x32xf32>
    %194 = vector.extract_strided_slice %129 {offsets = [0, 24], sizes = [8, 8], strides = [1, 1]} : vector<8x32xf32> to vector<8x8xf32>
    %195 = vector.extract_strided_slice %135 {offsets = [0, 24], sizes = [12, 8], strides = [1, 1]} : vector<12x32xf32> to vector<12x8xf32>
    %cst_80 = arith.constant dense<0.000000e+00> : vector<8x12xf32>
    %196 = tpu.matmul %194, %195, %cst_80 {dimension_numbers = #tpu.dot_dimension_numbers<[1], [1], [0], [0], [0, 0, 1, 0], [], []>} : vector<8x8xf32>, vector<12x8xf32>, vector<8x12xf32> -> vector<8x12xf32>
    %197 = arith.addf %196, %5 : vector<8x12xf32>
    %cst_81 = arith.constant dense<0xFF800000> : vector<8xf32>
    %198 = vector.multi_reduction <maximumf>, %197, %cst_81 [1] : vector<8x12xf32> to vector<8xf32>
    %199 = vector.shape_cast %198 : vector<8xf32> to vector<8x1xf32>
    %200 = vector.broadcast %199 : vector<8x1xf32> to vector<8x12xf32>
    %201 = arith.subf %197, %200 : vector<8x12xf32>
    %202 = math.exp %201 : vector<8x12xf32>
    %cst_82 = arith.constant dense<0.000000e+00> : vector<8xf32>
    %203 = vector.multi_reduction <add>, %202, %cst_82 [1] : vector<8x12xf32> to vector<8xf32>
    %204 = vector.shape_cast %203 : vector<8xf32> to vector<8x1xf32>
    %205 = tpu.reciprocal %204 {approx = true} : vector<8x1xf32> -> vector<8x1xf32>
    %206 = vector.broadcast %205 : vector<8x1xf32> to vector<8x12xf32>
    %207 = arith.mulf %202, %206 : vector<8x12xf32>
    %208 = vector.extract_strided_slice %136 {offsets = [0, 24], sizes = [12, 8], strides = [1, 1]} : vector<12x32xf32> to vector<12x8xf32>
    %cst_83 = arith.constant dense<0.000000e+00> : vector<8x8xf32>
    %209 = tpu.matmul %207, %208, %cst_83 {dimension_numbers = #tpu.dot_dimension_numbers<[1], [0], [0], [1], [0, 0, 1, 1], [], []>} : vector<8x12xf32>, vector<12x8xf32>, vector<8x8xf32> -> vector<8x8xf32>
    %210 = vector.extract_strided_slice %137 {offsets = [24, 0], sizes = [8, 32], strides = [1, 1]} : vector<32x32xf32> to vector<8x32xf32>
    %cst_84 = arith.constant dense<0.000000e+00> : vector<8x32xf32>
    %211 = tpu.matmul %209, %210, %cst_84 {dimension_numbers = #tpu.dot_dimension_numbers<[1], [0], [0], [1], [0, 0, 1, 1], [], []>} : vector<8x8xf32>, vector<8x32xf32>, vector<8x32xf32> -> vector<8x32xf32>
    %212 = arith.addf %193, %211 : vector<8x32xf32>
    %c0_85 = arith.constant 0 : index
    %c0_86 = arith.constant 0 : index
    %213 = vector.load %arg21[%c0_85, %c0_86] : memref<1x32xf32, #tpu.memory_space<vmem>>, vector<1x32xf32>
    %214 = vector.broadcast %213 : vector<1x32xf32> to vector<8x32xf32>
    %215 = arith.addf %212, %214 : vector<8x32xf32>
    %216 = arith.addf %124, %215 : vector<8x32xf32>
    %cst_87 = arith.constant dense<0.000000e+00> : vector<8xf32>
    %217 = vector.multi_reduction <add>, %216, %cst_87 [1] : vector<8x32xf32> to vector<8xf32>
    %218 = vector.shape_cast %217 : vector<8xf32> to vector<8x1xf32>
    %cst_88 = arith.constant 3.200000e+01 : f32
    %219 = vector.broadcast %cst_88 : f32 to vector<8x1xf32>
    %220 = arith.divf %218, %219 : vector<8x1xf32>
    %221 = vector.broadcast %220 : vector<8x1xf32> to vector<8x32xf32>
    %222 = arith.subf %216, %221 : vector<8x32xf32>
    %223 = arith.mulf %222, %222 : vector<8x32xf32>
    %cst_89 = arith.constant dense<0.000000e+00> : vector<8xf32>
    %224 = vector.multi_reduction <add>, %223, %cst_89 [1] : vector<8x32xf32> to vector<8xf32>
    %225 = vector.shape_cast %224 : vector<8xf32> to vector<8x1xf32>
    %cst_90 = arith.constant 3.200000e+01 : f32
    %226 = vector.broadcast %cst_90 : f32 to vector<8x1xf32>
    %227 = arith.divf %225, %226 : vector<8x1xf32>
    %228 = vector.broadcast %220 : vector<8x1xf32> to vector<8x32xf32>
    %229 = arith.subf %216, %228 : vector<8x32xf32>
    %cst_91 = arith.constant 9.99999974E-6 : f32
    %230 = vector.broadcast %cst_91 : f32 to vector<8x1xf32>
    %231 = arith.addf %227, %230 : vector<8x1xf32>
    %232 = math.rsqrt %231 : vector<8x1xf32>
    %233 = vector.broadcast %232 : vector<8x1xf32> to vector<8x32xf32>
    %234 = arith.mulf %229, %233 : vector<8x32xf32>
    %235 = vector.broadcast %13 : vector<1x32xf32> to vector<8x32xf32>
    %236 = arith.mulf %234, %235 : vector<8x32xf32>
    %237 = vector.broadcast %14 : vector<1x32xf32> to vector<8x32xf32>
    %238 = arith.addf %236, %237 : vector<8x32xf32>
    %c0_92 = arith.constant 0 : index
    %c0_93 = arith.constant 0 : index
    %239 = vector.load %arg22[%c0_92, %c0_93] : memref<32x64xf32, #tpu.memory_space<vmem>>, vector<32x64xf32>
    %cst_94 = arith.constant dense<0.000000e+00> : vector<8x64xf32>
    %240 = tpu.matmul %238, %239, %cst_94 {dimension_numbers = #tpu.dot_dimension_numbers<[1], [0], [0], [1], [0, 0, 1, 1], [], []>} : vector<8x32xf32>, vector<32x64xf32>, vector<8x64xf32> -> vector<8x64xf32>
    %c0_95 = arith.constant 0 : index
    %c0_96 = arith.constant 0 : index
    %241 = vector.load %arg23[%c0_95, %c0_96] : memref<1x64xf32, #tpu.memory_space<vmem>>, vector<1x64xf32>
    %242 = vector.broadcast %241 : vector<1x64xf32> to vector<8x64xf32>
    %243 = arith.addf %240, %242 : vector<8x64xf32>
    %cst_97 = arith.constant 0.000000e+00 : f32
    %244 = vector.broadcast %cst_97 : f32 to vector<8x64xf32>
    %245 = arith.maximumf %243, %244 : vector<8x64xf32>
    %c0_98 = arith.constant 0 : index
    %c0_99 = arith.constant 0 : index
    %246 = vector.load %arg24[%c0_98, %c0_99] : memref<64x32xf32, #tpu.memory_space<vmem>>, vector<64x32xf32>
    %cst_100 = arith.constant dense<0.000000e+00> : vector<8x32xf32>
    %247 = tpu.matmul %245, %246, %cst_100 {dimension_numbers = #tpu.dot_dimension_numbers<[1], [0], [0], [1], [0, 0, 1, 1], [], []>} : vector<8x64xf32>, vector<64x32xf32>, vector<8x32xf32> -> vector<8x32xf32>
    %c0_101 = arith.constant 0 : index
    %c0_102 = arith.constant 0 : index
    %248 = vector.load %arg25[%c0_101, %c0_102] : memref<1x32xf32, #tpu.memory_space<vmem>>, vector<1x32xf32>
    %249 = vector.broadcast %248 : vector<1x32xf32> to vector<8x32xf32>
    %250 = arith.addf %247, %249 : vector<8x32xf32>
    %251 = arith.addf %238, %250 : vector<8x32xf32>
    %cst_103 = arith.constant dense<0.000000e+00> : vector<8xf32>
    %252 = vector.multi_reduction <add>, %251, %cst_103 [1] : vector<8x32xf32> to vector<8xf32>
    %253 = vector.shape_cast %252 : vector<8xf32> to vector<8x1xf32>
    %cst_104 = arith.constant 3.200000e+01 : f32
    %254 = vector.broadcast %cst_104 : f32 to vector<8x1xf32>
    %255 = arith.divf %253, %254 : vector<8x1xf32>
    %256 = vector.broadcast %255 : vector<8x1xf32> to vector<8x32xf32>
    %257 = arith.subf %251, %256 : vector<8x32xf32>
    %258 = arith.mulf %257, %257 : vector<8x32xf32>
    %cst_105 = arith.constant dense<0.000000e+00> : vector<8xf32>
    %259 = vector.multi_reduction <add>, %258, %cst_105 [1] : vector<8x32xf32> to vector<8xf32>
    %260 = vector.shape_cast %259 : vector<8xf32> to vector<8x1xf32>
    %cst_106 = arith.constant 3.200000e+01 : f32
    %261 = vector.broadcast %cst_106 : f32 to vector<8x1xf32>
    %262 = arith.divf %260, %261 : vector<8x1xf32>
    %263 = vector.broadcast %255 : vector<8x1xf32> to vector<8x32xf32>
    %264 = arith.subf %251, %263 : vector<8x32xf32>
    %cst_107 = arith.constant 9.99999974E-6 : f32
    %265 = vector.broadcast %cst_107 : f32 to vector<8x1xf32>
    %266 = arith.addf %262, %265 : vector<8x1xf32>
    %267 = math.rsqrt %266 : vector<8x1xf32>
    %268 = vector.broadcast %267 : vector<8x1xf32> to vector<8x32xf32>
    %269 = arith.mulf %264, %268 : vector<8x32xf32>
    %270 = vector.broadcast %13 : vector<1x32xf32> to vector<8x32xf32>
    %271 = arith.mulf %269, %270 : vector<8x32xf32>
    %272 = vector.broadcast %14 : vector<1x32xf32> to vector<8x32xf32>
    %273 = arith.addf %271, %272 : vector<8x32xf32>
    %c0_108 = arith.constant 0 : index
    %c0_109 = arith.constant 0 : index
    %274 = vector.load %arg26[%c0_108, %c0_109] : memref<1x32xf32, #tpu.memory_space<vmem>>, vector<1x32xf32>
    %c0_110 = arith.constant 0 : index
    %c0_111 = arith.constant 0 : index
    %275 = vector.load %arg27[%c0_110, %c0_111] : memref<1x32xf32, #tpu.memory_space<vmem>>, vector<1x32xf32>
    %c0_112 = arith.constant 0 : index
    %c0_113 = arith.constant 0 : index
    %276 = vector.load %arg28[%c0_112, %c0_113] : memref<32x96xf32, #tpu.memory_space<vmem>>, vector<32x96xf32>
    %cst_114 = arith.constant dense<0.000000e+00> : vector<8x96xf32>
    %277 = tpu.matmul %273, %276, %cst_114 {dimension_numbers = #tpu.dot_dimension_numbers<[1], [0], [0], [1], [0, 0, 1, 1], [], []>} : vector<8x32xf32>, vector<32x96xf32>, vector<8x96xf32> -> vector<8x96xf32>
    %c0_115 = arith.constant 0 : index
    %c0_116 = arith.constant 0 : index
    %278 = vector.load %arg29[%c0_115, %c0_116] : memref<1x96xf32, #tpu.memory_space<vmem>>, vector<1x96xf32>
    %279 = vector.broadcast %278 : vector<1x96xf32> to vector<8x96xf32>
    %280 = arith.addf %277, %279 : vector<8x96xf32>
    %281 = vector.extract_strided_slice %280 {offsets = [0, 0], sizes = [8, 32], strides = [1, 1]} : vector<8x96xf32> to vector<8x32xf32>
    %282 = vector.extract_strided_slice %280 {offsets = [0, 32], sizes = [8, 32], strides = [1, 1]} : vector<8x96xf32> to vector<8x32xf32>
    %283 = vector.extract_strided_slice %280 {offsets = [0, 64], sizes = [8, 32], strides = [1, 1]} : vector<8x96xf32> to vector<8x32xf32>
    %c0_117 = arith.constant 0 : index
    %c0_118 = arith.constant 0 : index
    %284 = vector.load %arg30[%c0_117, %c0_118] : memref<32x32xf32, #tpu.memory_space<vmem>>, vector<32x32xf32>
    %285 = vector.extract_strided_slice %281 {offsets = [0, 0], sizes = [8, 8], strides = [1, 1]} : vector<8x32xf32> to vector<8x8xf32>
    %286 = vector.extract_strided_slice %282 {offsets = [0, 0], sizes = [8, 8], strides = [1, 1]} : vector<8x32xf32> to vector<8x8xf32>
    %cst_119 = arith.constant dense<0.000000e+00> : vector<8x8xf32>
    %287 = tpu.matmul %285, %286, %cst_119 {dimension_numbers = #tpu.dot_dimension_numbers<[1], [1], [0], [0], [0, 0, 1, 0], [], []>} : vector<8x8xf32>, vector<8x8xf32>, vector<8x8xf32> -> vector<8x8xf32>
    %288 = arith.addf %287, %3 : vector<8x8xf32>
    %cst_120 = arith.constant dense<0xFF800000> : vector<8xf32>
    %289 = vector.multi_reduction <maximumf>, %288, %cst_120 [1] : vector<8x8xf32> to vector<8xf32>
    %290 = vector.shape_cast %289 : vector<8xf32> to vector<8x1xf32>
    %291 = vector.broadcast %290 : vector<8x1xf32> to vector<8x8xf32>
    %292 = arith.subf %288, %291 : vector<8x8xf32>
    %293 = math.exp %292 : vector<8x8xf32>
    %cst_121 = arith.constant dense<0.000000e+00> : vector<8xf32>
    %294 = vector.multi_reduction <add>, %293, %cst_121 [1] : vector<8x8xf32> to vector<8xf32>
    %295 = vector.shape_cast %294 : vector<8xf32> to vector<8x1xf32>
    %296 = tpu.reciprocal %295 {approx = true} : vector<8x1xf32> -> vector<8x1xf32>
    %297 = vector.broadcast %296 : vector<8x1xf32> to vector<8x8xf32>
    %298 = arith.mulf %293, %297 : vector<8x8xf32>
    %299 = vector.extract_strided_slice %283 {offsets = [0, 0], sizes = [8, 8], strides = [1, 1]} : vector<8x32xf32> to vector<8x8xf32>
    %cst_122 = arith.constant dense<0.000000e+00> : vector<8x8xf32>
    %300 = tpu.matmul %298, %299, %cst_122 {dimension_numbers = #tpu.dot_dimension_numbers<[1], [0], [0], [1], [0, 0, 1, 1], [], []>} : vector<8x8xf32>, vector<8x8xf32>, vector<8x8xf32> -> vector<8x8xf32>
    %301 = vector.extract_strided_slice %284 {offsets = [0, 0], sizes = [8, 32], strides = [1, 1]} : vector<32x32xf32> to vector<8x32xf32>
    %cst_123 = arith.constant dense<0.000000e+00> : vector<8x32xf32>
    %302 = tpu.matmul %300, %301, %cst_123 {dimension_numbers = #tpu.dot_dimension_numbers<[1], [0], [0], [1], [0, 0, 1, 1], [], []>} : vector<8x8xf32>, vector<8x32xf32>, vector<8x32xf32> -> vector<8x32xf32>
    %303 = vector.extract_strided_slice %281 {offsets = [0, 8], sizes = [8, 8], strides = [1, 1]} : vector<8x32xf32> to vector<8x8xf32>
    %304 = vector.extract_strided_slice %282 {offsets = [0, 8], sizes = [8, 8], strides = [1, 1]} : vector<8x32xf32> to vector<8x8xf32>
    %cst_124 = arith.constant dense<0.000000e+00> : vector<8x8xf32>
    %305 = tpu.matmul %303, %304, %cst_124 {dimension_numbers = #tpu.dot_dimension_numbers<[1], [1], [0], [0], [0, 0, 1, 0], [], []>} : vector<8x8xf32>, vector<8x8xf32>, vector<8x8xf32> -> vector<8x8xf32>
    %306 = arith.addf %305, %3 : vector<8x8xf32>
    %cst_125 = arith.constant dense<0xFF800000> : vector<8xf32>
    %307 = vector.multi_reduction <maximumf>, %306, %cst_125 [1] : vector<8x8xf32> to vector<8xf32>
    %308 = vector.shape_cast %307 : vector<8xf32> to vector<8x1xf32>
    %309 = vector.broadcast %308 : vector<8x1xf32> to vector<8x8xf32>
    %310 = arith.subf %306, %309 : vector<8x8xf32>
    %311 = math.exp %310 : vector<8x8xf32>
    %cst_126 = arith.constant dense<0.000000e+00> : vector<8xf32>
    %312 = vector.multi_reduction <add>, %311, %cst_126 [1] : vector<8x8xf32> to vector<8xf32>
    %313 = vector.shape_cast %312 : vector<8xf32> to vector<8x1xf32>
    %314 = tpu.reciprocal %313 {approx = true} : vector<8x1xf32> -> vector<8x1xf32>
    %315 = vector.broadcast %314 : vector<8x1xf32> to vector<8x8xf32>
    %316 = arith.mulf %311, %315 : vector<8x8xf32>
    %317 = vector.extract_strided_slice %283 {offsets = [0, 8], sizes = [8, 8], strides = [1, 1]} : vector<8x32xf32> to vector<8x8xf32>
    %cst_127 = arith.constant dense<0.000000e+00> : vector<8x8xf32>
    %318 = tpu.matmul %316, %317, %cst_127 {dimension_numbers = #tpu.dot_dimension_numbers<[1], [0], [0], [1], [0, 0, 1, 1], [], []>} : vector<8x8xf32>, vector<8x8xf32>, vector<8x8xf32> -> vector<8x8xf32>
    %319 = vector.extract_strided_slice %284 {offsets = [8, 0], sizes = [8, 32], strides = [1, 1]} : vector<32x32xf32> to vector<8x32xf32>
    %cst_128 = arith.constant dense<0.000000e+00> : vector<8x32xf32>
    %320 = tpu.matmul %318, %319, %cst_128 {dimension_numbers = #tpu.dot_dimension_numbers<[1], [0], [0], [1], [0, 0, 1, 1], [], []>} : vector<8x8xf32>, vector<8x32xf32>, vector<8x32xf32> -> vector<8x32xf32>
    %321 = arith.addf %302, %320 : vector<8x32xf32>
    %322 = vector.extract_strided_slice %281 {offsets = [0, 16], sizes = [8, 8], strides = [1, 1]} : vector<8x32xf32> to vector<8x8xf32>
    %323 = vector.extract_strided_slice %282 {offsets = [0, 16], sizes = [8, 8], strides = [1, 1]} : vector<8x32xf32> to vector<8x8xf32>
    %cst_129 = arith.constant dense<0.000000e+00> : vector<8x8xf32>
    %324 = tpu.matmul %322, %323, %cst_129 {dimension_numbers = #tpu.dot_dimension_numbers<[1], [1], [0], [0], [0, 0, 1, 0], [], []>} : vector<8x8xf32>, vector<8x8xf32>, vector<8x8xf32> -> vector<8x8xf32>
    %325 = arith.addf %324, %3 : vector<8x8xf32>
    %cst_130 = arith.constant dense<0xFF800000> : vector<8xf32>
    %326 = vector.multi_reduction <maximumf>, %325, %cst_130 [1] : vector<8x8xf32> to vector<8xf32>
    %327 = vector.shape_cast %326 : vector<8xf32> to vector<8x1xf32>
    %328 = vector.broadcast %327 : vector<8x1xf32> to vector<8x8xf32>
    %329 = arith.subf %325, %328 : vector<8x8xf32>
    %330 = math.exp %329 : vector<8x8xf32>
    %cst_131 = arith.constant dense<0.000000e+00> : vector<8xf32>
    %331 = vector.multi_reduction <add>, %330, %cst_131 [1] : vector<8x8xf32> to vector<8xf32>
    %332 = vector.shape_cast %331 : vector<8xf32> to vector<8x1xf32>
    %333 = tpu.reciprocal %332 {approx = true} : vector<8x1xf32> -> vector<8x1xf32>
    %334 = vector.broadcast %333 : vector<8x1xf32> to vector<8x8xf32>
    %335 = arith.mulf %330, %334 : vector<8x8xf32>
    %336 = vector.extract_strided_slice %283 {offsets = [0, 16], sizes = [8, 8], strides = [1, 1]} : vector<8x32xf32> to vector<8x8xf32>
    %cst_132 = arith.constant dense<0.000000e+00> : vector<8x8xf32>
    %337 = tpu.matmul %335, %336, %cst_132 {dimension_numbers = #tpu.dot_dimension_numbers<[1], [0], [0], [1], [0, 0, 1, 1], [], []>} : vector<8x8xf32>, vector<8x8xf32>, vector<8x8xf32> -> vector<8x8xf32>
    %338 = vector.extract_strided_slice %284 {offsets = [16, 0], sizes = [8, 32], strides = [1, 1]} : vector<32x32xf32> to vector<8x32xf32>
    %cst_133 = arith.constant dense<0.000000e+00> : vector<8x32xf32>
    %339 = tpu.matmul %337, %338, %cst_133 {dimension_numbers = #tpu.dot_dimension_numbers<[1], [0], [0], [1], [0, 0, 1, 1], [], []>} : vector<8x8xf32>, vector<8x32xf32>, vector<8x32xf32> -> vector<8x32xf32>
    %340 = arith.addf %321, %339 : vector<8x32xf32>
    %341 = vector.extract_strided_slice %281 {offsets = [0, 24], sizes = [8, 8], strides = [1, 1]} : vector<8x32xf32> to vector<8x8xf32>
    %342 = vector.extract_strided_slice %282 {offsets = [0, 24], sizes = [8, 8], strides = [1, 1]} : vector<8x32xf32> to vector<8x8xf32>
    %cst_134 = arith.constant dense<0.000000e+00> : vector<8x8xf32>
    %343 = tpu.matmul %341, %342, %cst_134 {dimension_numbers = #tpu.dot_dimension_numbers<[1], [1], [0], [0], [0, 0, 1, 0], [], []>} : vector<8x8xf32>, vector<8x8xf32>, vector<8x8xf32> -> vector<8x8xf32>
    %344 = arith.addf %343, %3 : vector<8x8xf32>
    %cst_135 = arith.constant dense<0xFF800000> : vector<8xf32>
    %345 = vector.multi_reduction <maximumf>, %344, %cst_135 [1] : vector<8x8xf32> to vector<8xf32>
    %346 = vector.shape_cast %345 : vector<8xf32> to vector<8x1xf32>
    %347 = vector.broadcast %346 : vector<8x1xf32> to vector<8x8xf32>
    %348 = arith.subf %344, %347 : vector<8x8xf32>
    %349 = math.exp %348 : vector<8x8xf32>
    %cst_136 = arith.constant dense<0.000000e+00> : vector<8xf32>
    %350 = vector.multi_reduction <add>, %349, %cst_136 [1] : vector<8x8xf32> to vector<8xf32>
    %351 = vector.shape_cast %350 : vector<8xf32> to vector<8x1xf32>
    %352 = tpu.reciprocal %351 {approx = true} : vector<8x1xf32> -> vector<8x1xf32>
    %353 = vector.broadcast %352 : vector<8x1xf32> to vector<8x8xf32>
    %354 = arith.mulf %349, %353 : vector<8x8xf32>
    %355 = vector.extract_strided_slice %283 {offsets = [0, 24], sizes = [8, 8], strides = [1, 1]} : vector<8x32xf32> to vector<8x8xf32>
    %cst_137 = arith.constant dense<0.000000e+00> : vector<8x8xf32>
    %356 = tpu.matmul %354, %355, %cst_137 {dimension_numbers = #tpu.dot_dimension_numbers<[1], [0], [0], [1], [0, 0, 1, 1], [], []>} : vector<8x8xf32>, vector<8x8xf32>, vector<8x8xf32> -> vector<8x8xf32>
    %357 = vector.extract_strided_slice %284 {offsets = [24, 0], sizes = [8, 32], strides = [1, 1]} : vector<32x32xf32> to vector<8x32xf32>
    %cst_138 = arith.constant dense<0.000000e+00> : vector<8x32xf32>
    %358 = tpu.matmul %356, %357, %cst_138 {dimension_numbers = #tpu.dot_dimension_numbers<[1], [0], [0], [1], [0, 0, 1, 1], [], []>} : vector<8x8xf32>, vector<8x32xf32>, vector<8x32xf32> -> vector<8x32xf32>
    %359 = arith.addf %340, %358 : vector<8x32xf32>
    %c0_139 = arith.constant 0 : index
    %c0_140 = arith.constant 0 : index
    %360 = vector.load %arg31[%c0_139, %c0_140] : memref<1x32xf32, #tpu.memory_space<vmem>>, vector<1x32xf32>
    %361 = vector.broadcast %360 : vector<1x32xf32> to vector<8x32xf32>
    %362 = arith.addf %359, %361 : vector<8x32xf32>
    %363 = arith.addf %273, %362 : vector<8x32xf32>
    %cst_141 = arith.constant dense<0.000000e+00> : vector<8xf32>
    %364 = vector.multi_reduction <add>, %363, %cst_141 [1] : vector<8x32xf32> to vector<8xf32>
    %365 = vector.shape_cast %364 : vector<8xf32> to vector<8x1xf32>
    %cst_142 = arith.constant 3.200000e+01 : f32
    %366 = vector.broadcast %cst_142 : f32 to vector<8x1xf32>
    %367 = arith.divf %365, %366 : vector<8x1xf32>
    %368 = vector.broadcast %367 : vector<8x1xf32> to vector<8x32xf32>
    %369 = arith.subf %363, %368 : vector<8x32xf32>
    %370 = arith.mulf %369, %369 : vector<8x32xf32>
    %cst_143 = arith.constant dense<0.000000e+00> : vector<8xf32>
    %371 = vector.multi_reduction <add>, %370, %cst_143 [1] : vector<8x32xf32> to vector<8xf32>
    %372 = vector.shape_cast %371 : vector<8xf32> to vector<8x1xf32>
    %cst_144 = arith.constant 3.200000e+01 : f32
    %373 = vector.broadcast %cst_144 : f32 to vector<8x1xf32>
    %374 = arith.divf %372, %373 : vector<8x1xf32>
    %375 = vector.broadcast %367 : vector<8x1xf32> to vector<8x32xf32>
    %376 = arith.subf %363, %375 : vector<8x32xf32>
    %cst_145 = arith.constant 9.99999974E-6 : f32
    %377 = vector.broadcast %cst_145 : f32 to vector<8x1xf32>
    %378 = arith.addf %374, %377 : vector<8x1xf32>
    %379 = math.rsqrt %378 : vector<8x1xf32>
    %380 = vector.broadcast %379 : vector<8x1xf32> to vector<8x32xf32>
    %381 = arith.mulf %376, %380 : vector<8x32xf32>
    %382 = vector.broadcast %274 : vector<1x32xf32> to vector<8x32xf32>
    %383 = arith.mulf %381, %382 : vector<8x32xf32>
    %384 = vector.broadcast %275 : vector<1x32xf32> to vector<8x32xf32>
    %385 = arith.addf %383, %384 : vector<8x32xf32>
    %c0_146 = arith.constant 0 : index
    %c0_147 = arith.constant 0 : index
    %386 = vector.load %arg32[%c0_146, %c0_147] : memref<32x32xf32, #tpu.memory_space<vmem>>, vector<32x32xf32>
    %cst_148 = arith.constant dense<0.000000e+00> : vector<8x32xf32>
    %387 = tpu.matmul %385, %386, %cst_148 {dimension_numbers = #tpu.dot_dimension_numbers<[1], [0], [0], [1], [0, 0, 1, 1], [], []>} : vector<8x32xf32>, vector<32x32xf32>, vector<8x32xf32> -> vector<8x32xf32>
    %c0_149 = arith.constant 0 : index
    %c0_150 = arith.constant 0 : index
    %388 = vector.load %arg33[%c0_149, %c0_150] : memref<1x32xf32, #tpu.memory_space<vmem>>, vector<1x32xf32>
    %389 = vector.broadcast %388 : vector<1x32xf32> to vector<8x32xf32>
    %390 = arith.addf %387, %389 : vector<8x32xf32>
    %c0_151 = arith.constant 0 : index
    %c0_152 = arith.constant 0 : index
    %391 = vector.load %arg34[%c0_151, %c0_152] : memref<32x64xf32, #tpu.memory_space<vmem>>, vector<32x64xf32>
    %cst_153 = arith.constant dense<0.000000e+00> : vector<12x64xf32>
    %392 = tpu.matmul %1, %391, %cst_153 {dimension_numbers = #tpu.dot_dimension_numbers<[1], [0], [0], [1], [0, 0, 1, 1], [], []>} : vector<12x32xf32>, vector<32x64xf32>, vector<12x64xf32> -> vector<12x64xf32>
    %c0_154 = arith.constant 0 : index
    %c0_155 = arith.constant 0 : index
    %393 = vector.load %arg35[%c0_154, %c0_155] : memref<1x64xf32, #tpu.memory_space<vmem>>, vector<1x64xf32>
    %394 = vector.broadcast %393 : vector<1x64xf32> to vector<12x64xf32>
    %395 = arith.addf %392, %394 : vector<12x64xf32>
    %396 = vector.extract_strided_slice %395 {offsets = [0, 0], sizes = [12, 32], strides = [1, 1]} : vector<12x64xf32> to vector<12x32xf32>
    %397 = vector.extract_strided_slice %395 {offsets = [0, 32], sizes = [12, 32], strides = [1, 1]} : vector<12x64xf32> to vector<12x32xf32>
    %c0_156 = arith.constant 0 : index
    %c0_157 = arith.constant 0 : index
    %398 = vector.load %arg36[%c0_156, %c0_157] : memref<32x32xf32, #tpu.memory_space<vmem>>, vector<32x32xf32>
    %399 = vector.extract_strided_slice %390 {offsets = [0, 0], sizes = [8, 8], strides = [1, 1]} : vector<8x32xf32> to vector<8x8xf32>
    %400 = vector.extract_strided_slice %396 {offsets = [0, 0], sizes = [12, 8], strides = [1, 1]} : vector<12x32xf32> to vector<12x8xf32>
    %cst_158 = arith.constant dense<0.000000e+00> : vector<8x12xf32>
    %401 = tpu.matmul %399, %400, %cst_158 {dimension_numbers = #tpu.dot_dimension_numbers<[1], [1], [0], [0], [0, 0, 1, 0], [], []>} : vector<8x8xf32>, vector<12x8xf32>, vector<8x12xf32> -> vector<8x12xf32>
    %402 = arith.addf %401, %5 : vector<8x12xf32>
    %cst_159 = arith.constant dense<0xFF800000> : vector<8xf32>
    %403 = vector.multi_reduction <maximumf>, %402, %cst_159 [1] : vector<8x12xf32> to vector<8xf32>
    %404 = vector.shape_cast %403 : vector<8xf32> to vector<8x1xf32>
    %405 = vector.broadcast %404 : vector<8x1xf32> to vector<8x12xf32>
    %406 = arith.subf %402, %405 : vector<8x12xf32>
    %407 = math.exp %406 : vector<8x12xf32>
    %cst_160 = arith.constant dense<0.000000e+00> : vector<8xf32>
    %408 = vector.multi_reduction <add>, %407, %cst_160 [1] : vector<8x12xf32> to vector<8xf32>
    %409 = vector.shape_cast %408 : vector<8xf32> to vector<8x1xf32>
    %410 = tpu.reciprocal %409 {approx = true} : vector<8x1xf32> -> vector<8x1xf32>
    %411 = vector.broadcast %410 : vector<8x1xf32> to vector<8x12xf32>
    %412 = arith.mulf %407, %411 : vector<8x12xf32>
    %413 = vector.extract_strided_slice %397 {offsets = [0, 0], sizes = [12, 8], strides = [1, 1]} : vector<12x32xf32> to vector<12x8xf32>
    %cst_161 = arith.constant dense<0.000000e+00> : vector<8x8xf32>
    %414 = tpu.matmul %412, %413, %cst_161 {dimension_numbers = #tpu.dot_dimension_numbers<[1], [0], [0], [1], [0, 0, 1, 1], [], []>} : vector<8x12xf32>, vector<12x8xf32>, vector<8x8xf32> -> vector<8x8xf32>
    %415 = vector.extract_strided_slice %398 {offsets = [0, 0], sizes = [8, 32], strides = [1, 1]} : vector<32x32xf32> to vector<8x32xf32>
    %cst_162 = arith.constant dense<0.000000e+00> : vector<8x32xf32>
    %416 = tpu.matmul %414, %415, %cst_162 {dimension_numbers = #tpu.dot_dimension_numbers<[1], [0], [0], [1], [0, 0, 1, 1], [], []>} : vector<8x8xf32>, vector<8x32xf32>, vector<8x32xf32> -> vector<8x32xf32>
    %417 = vector.extract_strided_slice %390 {offsets = [0, 8], sizes = [8, 8], strides = [1, 1]} : vector<8x32xf32> to vector<8x8xf32>
    %418 = vector.extract_strided_slice %396 {offsets = [0, 8], sizes = [12, 8], strides = [1, 1]} : vector<12x32xf32> to vector<12x8xf32>
    %cst_163 = arith.constant dense<0.000000e+00> : vector<8x12xf32>
    %419 = tpu.matmul %417, %418, %cst_163 {dimension_numbers = #tpu.dot_dimension_numbers<[1], [1], [0], [0], [0, 0, 1, 0], [], []>} : vector<8x8xf32>, vector<12x8xf32>, vector<8x12xf32> -> vector<8x12xf32>
    %420 = arith.addf %419, %5 : vector<8x12xf32>
    %cst_164 = arith.constant dense<0xFF800000> : vector<8xf32>
    %421 = vector.multi_reduction <maximumf>, %420, %cst_164 [1] : vector<8x12xf32> to vector<8xf32>
    %422 = vector.shape_cast %421 : vector<8xf32> to vector<8x1xf32>
    %423 = vector.broadcast %422 : vector<8x1xf32> to vector<8x12xf32>
    %424 = arith.subf %420, %423 : vector<8x12xf32>
    %425 = math.exp %424 : vector<8x12xf32>
    %cst_165 = arith.constant dense<0.000000e+00> : vector<8xf32>
    %426 = vector.multi_reduction <add>, %425, %cst_165 [1] : vector<8x12xf32> to vector<8xf32>
    %427 = vector.shape_cast %426 : vector<8xf32> to vector<8x1xf32>
    %428 = tpu.reciprocal %427 {approx = true} : vector<8x1xf32> -> vector<8x1xf32>
    %429 = vector.broadcast %428 : vector<8x1xf32> to vector<8x12xf32>
    %430 = arith.mulf %425, %429 : vector<8x12xf32>
    %431 = vector.extract_strided_slice %397 {offsets = [0, 8], sizes = [12, 8], strides = [1, 1]} : vector<12x32xf32> to vector<12x8xf32>
    %cst_166 = arith.constant dense<0.000000e+00> : vector<8x8xf32>
    %432 = tpu.matmul %430, %431, %cst_166 {dimension_numbers = #tpu.dot_dimension_numbers<[1], [0], [0], [1], [0, 0, 1, 1], [], []>} : vector<8x12xf32>, vector<12x8xf32>, vector<8x8xf32> -> vector<8x8xf32>
    %433 = vector.extract_strided_slice %398 {offsets = [8, 0], sizes = [8, 32], strides = [1, 1]} : vector<32x32xf32> to vector<8x32xf32>
    %cst_167 = arith.constant dense<0.000000e+00> : vector<8x32xf32>
    %434 = tpu.matmul %432, %433, %cst_167 {dimension_numbers = #tpu.dot_dimension_numbers<[1], [0], [0], [1], [0, 0, 1, 1], [], []>} : vector<8x8xf32>, vector<8x32xf32>, vector<8x32xf32> -> vector<8x32xf32>
    %435 = arith.addf %416, %434 : vector<8x32xf32>
    %436 = vector.extract_strided_slice %390 {offsets = [0, 16], sizes = [8, 8], strides = [1, 1]} : vector<8x32xf32> to vector<8x8xf32>
    %437 = vector.extract_strided_slice %396 {offsets = [0, 16], sizes = [12, 8], strides = [1, 1]} : vector<12x32xf32> to vector<12x8xf32>
    %cst_168 = arith.constant dense<0.000000e+00> : vector<8x12xf32>
    %438 = tpu.matmul %436, %437, %cst_168 {dimension_numbers = #tpu.dot_dimension_numbers<[1], [1], [0], [0], [0, 0, 1, 0], [], []>} : vector<8x8xf32>, vector<12x8xf32>, vector<8x12xf32> -> vector<8x12xf32>
    %439 = arith.addf %438, %5 : vector<8x12xf32>
    %cst_169 = arith.constant dense<0xFF800000> : vector<8xf32>
    %440 = vector.multi_reduction <maximumf>, %439, %cst_169 [1] : vector<8x12xf32> to vector<8xf32>
    %441 = vector.shape_cast %440 : vector<8xf32> to vector<8x1xf32>
    %442 = vector.broadcast %441 : vector<8x1xf32> to vector<8x12xf32>
    %443 = arith.subf %439, %442 : vector<8x12xf32>
    %444 = math.exp %443 : vector<8x12xf32>
    %cst_170 = arith.constant dense<0.000000e+00> : vector<8xf32>
    %445 = vector.multi_reduction <add>, %444, %cst_170 [1] : vector<8x12xf32> to vector<8xf32>
    %446 = vector.shape_cast %445 : vector<8xf32> to vector<8x1xf32>
    %447 = tpu.reciprocal %446 {approx = true} : vector<8x1xf32> -> vector<8x1xf32>
    %448 = vector.broadcast %447 : vector<8x1xf32> to vector<8x12xf32>
    %449 = arith.mulf %444, %448 : vector<8x12xf32>
    %450 = vector.extract_strided_slice %397 {offsets = [0, 16], sizes = [12, 8], strides = [1, 1]} : vector<12x32xf32> to vector<12x8xf32>
    %cst_171 = arith.constant dense<0.000000e+00> : vector<8x8xf32>
    %451 = tpu.matmul %449, %450, %cst_171 {dimension_numbers = #tpu.dot_dimension_numbers<[1], [0], [0], [1], [0, 0, 1, 1], [], []>} : vector<8x12xf32>, vector<12x8xf32>, vector<8x8xf32> -> vector<8x8xf32>
    %452 = vector.extract_strided_slice %398 {offsets = [16, 0], sizes = [8, 32], strides = [1, 1]} : vector<32x32xf32> to vector<8x32xf32>
    %cst_172 = arith.constant dense<0.000000e+00> : vector<8x32xf32>
    %453 = tpu.matmul %451, %452, %cst_172 {dimension_numbers = #tpu.dot_dimension_numbers<[1], [0], [0], [1], [0, 0, 1, 1], [], []>} : vector<8x8xf32>, vector<8x32xf32>, vector<8x32xf32> -> vector<8x32xf32>
    %454 = arith.addf %435, %453 : vector<8x32xf32>
    %455 = vector.extract_strided_slice %390 {offsets = [0, 24], sizes = [8, 8], strides = [1, 1]} : vector<8x32xf32> to vector<8x8xf32>
    %456 = vector.extract_strided_slice %396 {offsets = [0, 24], sizes = [12, 8], strides = [1, 1]} : vector<12x32xf32> to vector<12x8xf32>
    %cst_173 = arith.constant dense<0.000000e+00> : vector<8x12xf32>
    %457 = tpu.matmul %455, %456, %cst_173 {dimension_numbers = #tpu.dot_dimension_numbers<[1], [1], [0], [0], [0, 0, 1, 0], [], []>} : vector<8x8xf32>, vector<12x8xf32>, vector<8x12xf32> -> vector<8x12xf32>
    %458 = arith.addf %457, %5 : vector<8x12xf32>
    %cst_174 = arith.constant dense<0xFF800000> : vector<8xf32>
    %459 = vector.multi_reduction <maximumf>, %458, %cst_174 [1] : vector<8x12xf32> to vector<8xf32>
    %460 = vector.shape_cast %459 : vector<8xf32> to vector<8x1xf32>
    %461 = vector.broadcast %460 : vector<8x1xf32> to vector<8x12xf32>
    %462 = arith.subf %458, %461 : vector<8x12xf32>
    %463 = math.exp %462 : vector<8x12xf32>
    %cst_175 = arith.constant dense<0.000000e+00> : vector<8xf32>
    %464 = vector.multi_reduction <add>, %463, %cst_175 [1] : vector<8x12xf32> to vector<8xf32>
    %465 = vector.shape_cast %464 : vector<8xf32> to vector<8x1xf32>
    %466 = tpu.reciprocal %465 {approx = true} : vector<8x1xf32> -> vector<8x1xf32>
    %467 = vector.broadcast %466 : vector<8x1xf32> to vector<8x12xf32>
    %468 = arith.mulf %463, %467 : vector<8x12xf32>
    %469 = vector.extract_strided_slice %397 {offsets = [0, 24], sizes = [12, 8], strides = [1, 1]} : vector<12x32xf32> to vector<12x8xf32>
    %cst_176 = arith.constant dense<0.000000e+00> : vector<8x8xf32>
    %470 = tpu.matmul %468, %469, %cst_176 {dimension_numbers = #tpu.dot_dimension_numbers<[1], [0], [0], [1], [0, 0, 1, 1], [], []>} : vector<8x12xf32>, vector<12x8xf32>, vector<8x8xf32> -> vector<8x8xf32>
    %471 = vector.extract_strided_slice %398 {offsets = [24, 0], sizes = [8, 32], strides = [1, 1]} : vector<32x32xf32> to vector<8x32xf32>
    %cst_177 = arith.constant dense<0.000000e+00> : vector<8x32xf32>
    %472 = tpu.matmul %470, %471, %cst_177 {dimension_numbers = #tpu.dot_dimension_numbers<[1], [0], [0], [1], [0, 0, 1, 1], [], []>} : vector<8x8xf32>, vector<8x32xf32>, vector<8x32xf32> -> vector<8x32xf32>
    %473 = arith.addf %454, %472 : vector<8x32xf32>
    %c0_178 = arith.constant 0 : index
    %c0_179 = arith.constant 0 : index
    %474 = vector.load %arg37[%c0_178, %c0_179] : memref<1x32xf32, #tpu.memory_space<vmem>>, vector<1x32xf32>
    %475 = vector.broadcast %474 : vector<1x32xf32> to vector<8x32xf32>
    %476 = arith.addf %473, %475 : vector<8x32xf32>
    %477 = arith.addf %385, %476 : vector<8x32xf32>
    %cst_180 = arith.constant dense<0.000000e+00> : vector<8xf32>
    %478 = vector.multi_reduction <add>, %477, %cst_180 [1] : vector<8x32xf32> to vector<8xf32>
    %479 = vector.shape_cast %478 : vector<8xf32> to vector<8x1xf32>
    %cst_181 = arith.constant 3.200000e+01 : f32
    %480 = vector.broadcast %cst_181 : f32 to vector<8x1xf32>
    %481 = arith.divf %479, %480 : vector<8x1xf32>
    %482 = vector.broadcast %481 : vector<8x1xf32> to vector<8x32xf32>
    %483 = arith.subf %477, %482 : vector<8x32xf32>
    %484 = arith.mulf %483, %483 : vector<8x32xf32>
    %cst_182 = arith.constant dense<0.000000e+00> : vector<8xf32>
    %485 = vector.multi_reduction <add>, %484, %cst_182 [1] : vector<8x32xf32> to vector<8xf32>
    %486 = vector.shape_cast %485 : vector<8xf32> to vector<8x1xf32>
    %cst_183 = arith.constant 3.200000e+01 : f32
    %487 = vector.broadcast %cst_183 : f32 to vector<8x1xf32>
    %488 = arith.divf %486, %487 : vector<8x1xf32>
    %489 = vector.broadcast %481 : vector<8x1xf32> to vector<8x32xf32>
    %490 = arith.subf %477, %489 : vector<8x32xf32>
    %cst_184 = arith.constant 9.99999974E-6 : f32
    %491 = vector.broadcast %cst_184 : f32 to vector<8x1xf32>
    %492 = arith.addf %488, %491 : vector<8x1xf32>
    %493 = math.rsqrt %492 : vector<8x1xf32>
    %494 = vector.broadcast %493 : vector<8x1xf32> to vector<8x32xf32>
    %495 = arith.mulf %490, %494 : vector<8x32xf32>
    %496 = vector.broadcast %274 : vector<1x32xf32> to vector<8x32xf32>
    %497 = arith.mulf %495, %496 : vector<8x32xf32>
    %498 = vector.broadcast %275 : vector<1x32xf32> to vector<8x32xf32>
    %499 = arith.addf %497, %498 : vector<8x32xf32>
    %c0_185 = arith.constant 0 : index
    %c0_186 = arith.constant 0 : index
    %500 = vector.load %arg38[%c0_185, %c0_186] : memref<32x64xf32, #tpu.memory_space<vmem>>, vector<32x64xf32>
    %cst_187 = arith.constant dense<0.000000e+00> : vector<8x64xf32>
    %501 = tpu.matmul %499, %500, %cst_187 {dimension_numbers = #tpu.dot_dimension_numbers<[1], [0], [0], [1], [0, 0, 1, 1], [], []>} : vector<8x32xf32>, vector<32x64xf32>, vector<8x64xf32> -> vector<8x64xf32>
    %c0_188 = arith.constant 0 : index
    %c0_189 = arith.constant 0 : index
    %502 = vector.load %arg39[%c0_188, %c0_189] : memref<1x64xf32, #tpu.memory_space<vmem>>, vector<1x64xf32>
    %503 = vector.broadcast %502 : vector<1x64xf32> to vector<8x64xf32>
    %504 = arith.addf %501, %503 : vector<8x64xf32>
    %cst_190 = arith.constant 0.000000e+00 : f32
    %505 = vector.broadcast %cst_190 : f32 to vector<8x64xf32>
    %506 = arith.maximumf %504, %505 : vector<8x64xf32>
    %c0_191 = arith.constant 0 : index
    %c0_192 = arith.constant 0 : index
    %507 = vector.load %arg40[%c0_191, %c0_192] : memref<64x32xf32, #tpu.memory_space<vmem>>, vector<64x32xf32>
    %cst_193 = arith.constant dense<0.000000e+00> : vector<8x32xf32>
    %508 = tpu.matmul %506, %507, %cst_193 {dimension_numbers = #tpu.dot_dimension_numbers<[1], [0], [0], [1], [0, 0, 1, 1], [], []>} : vector<8x64xf32>, vector<64x32xf32>, vector<8x32xf32> -> vector<8x32xf32>
    %c0_194 = arith.constant 0 : index
    %c0_195 = arith.constant 0 : index
    %509 = vector.load %arg41[%c0_194, %c0_195] : memref<1x32xf32, #tpu.memory_space<vmem>>, vector<1x32xf32>
    %510 = vector.broadcast %509 : vector<1x32xf32> to vector<8x32xf32>
    %511 = arith.addf %508, %510 : vector<8x32xf32>
    %512 = arith.addf %499, %511 : vector<8x32xf32>
    %cst_196 = arith.constant dense<0.000000e+00> : vector<8xf32>
    %513 = vector.multi_reduction <add>, %512, %cst_196 [1] : vector<8x32xf32> to vector<8xf32>
    %514 = vector.shape_cast %513 : vector<8xf32> to vector<8x1xf32>
    %cst_197 = arith.constant 3.200000e+01 : f32
    %515 = vector.broadcast %cst_197 : f32 to vector<8x1xf32>
    %516 = arith.divf %514, %515 : vector<8x1xf32>
    %517 = vector.broadcast %516 : vector<8x1xf32> to vector<8x32xf32>
    %518 = arith.subf %512, %517 : vector<8x32xf32>
    %519 = arith.mulf %518, %518 : vector<8x32xf32>
    %cst_198 = arith.constant dense<0.000000e+00> : vector<8xf32>
    %520 = vector.multi_reduction <add>, %519, %cst_198 [1] : vector<8x32xf32> to vector<8xf32>
    %521 = vector.shape_cast %520 : vector<8xf32> to vector<8x1xf32>
    %cst_199 = arith.constant 3.200000e+01 : f32
    %522 = vector.broadcast %cst_199 : f32 to vector<8x1xf32>
    %523 = arith.divf %521, %522 : vector<8x1xf32>
    %524 = vector.broadcast %516 : vector<8x1xf32> to vector<8x32xf32>
    %525 = arith.subf %512, %524 : vector<8x32xf32>
    %cst_200 = arith.constant 9.99999974E-6 : f32
    %526 = vector.broadcast %cst_200 : f32 to vector<8x1xf32>
    %527 = arith.addf %523, %526 : vector<8x1xf32>
    %528 = math.rsqrt %527 : vector<8x1xf32>
    %529 = vector.broadcast %528 : vector<8x1xf32> to vector<8x32xf32>
    %530 = arith.mulf %525, %529 : vector<8x32xf32>
    %531 = vector.broadcast %274 : vector<1x32xf32> to vector<8x32xf32>
    %532 = arith.mulf %530, %531 : vector<8x32xf32>
    %533 = vector.broadcast %275 : vector<1x32xf32> to vector<8x32xf32>
    %534 = arith.addf %532, %533 : vector<8x32xf32>
    %535 = arith.mulf %534, %534 : vector<8x32xf32>
    %cst_201 = arith.constant dense<0.000000e+00> : vector<8xf32>
    %536 = vector.multi_reduction <add>, %535, %cst_201 [1] : vector<8x32xf32> to vector<8xf32>
    %537 = vector.shape_cast %536 : vector<8xf32> to vector<8x1xf32>
    %538 = math.sqrt %537 : vector<8x1xf32>
    %c0_202 = arith.constant 0 : index
    %c0_203 = arith.constant 0 : index
    %c0_204 = arith.constant 0 : index
    %539 = vector.load %arg5[%c0_202, %c0_203, %c0_204] : memref<1x8x1xf32, #tpu.memory_space<vmem>>, vector<1x8x1xf32>
    %540 = vector.shape_cast %539 : vector<1x8x1xf32> to vector<8x1xf32>
    %541 = arith.addf %538, %540 : vector<8x1xf32>
    %cst_205 = arith.constant dense<0xFF800000> : vector<1xf32>
    %542 = vector.multi_reduction <maximumf>, %541, %cst_205 [0] : vector<8x1xf32> to vector<1xf32>
    %543 = vector.shape_cast %542 : vector<1xf32> to vector<1x1xf32>
    %544 = vector.broadcast %543 : vector<1x1xf32> to vector<8x1xf32>
    %545 = arith.subf %541, %544 : vector<8x1xf32>
    %546 = math.exp %545 : vector<8x1xf32>
    %cst_206 = arith.constant dense<0.000000e+00> : vector<1xf32>
    %547 = vector.multi_reduction <add>, %546, %cst_206 [0] : vector<8x1xf32> to vector<1xf32>
    %548 = vector.shape_cast %547 : vector<1xf32> to vector<1x1xf32>
    %549 = tpu.reciprocal %548 {approx = true} : vector<1x1xf32> -> vector<1x1xf32>
    %550 = vector.broadcast %549 : vector<1x1xf32> to vector<8x1xf32>
    %551 = arith.mulf %546, %550 : vector<8x1xf32>
    %552 = vector.broadcast %551 : vector<8x1xf32> to vector<8x32xf32>
    %553 = arith.mulf %552, %534 : vector<8x32xf32>
    %cst_207 = arith.constant dense<0.000000e+00> : vector<32xf32>
    %554 = vector.multi_reduction <add>, %553, %cst_207 [0] : vector<8x32xf32> to vector<32xf32>
    %555 = vector.shape_cast %554 : vector<32xf32> to vector<1x32xf32>
    %c0_208 = arith.constant 0 : index
    %c0_209 = arith.constant 0 : index
    %556 = vector.load %arg8[%c0_208, %c0_209] : memref<32x256xf32, #tpu.memory_space<vmem>>, vector<32x256xf32>
    %cst_210 = arith.constant dense<0.000000e+00> : vector<1x256xf32>
    %557 = tpu.matmul %555, %556, %cst_210 {dimension_numbers = #tpu.dot_dimension_numbers<[1], [0], [0], [1], [0, 0, 1, 1], [], []>} : vector<1x32xf32>, vector<32x256xf32>, vector<1x256xf32> -> vector<1x256xf32>
    %c0_211 = arith.constant 0 : index
    %c0_212 = arith.constant 0 : index
    %558 = vector.load %arg9[%c0_211, %c0_212] : memref<1x256xf32, #tpu.memory_space<vmem>>, vector<1x256xf32>
    %559 = arith.addf %557, %558 : vector<1x256xf32>
    %cst_213 = arith.constant 0.000000e+00 : f32
    %560 = vector.broadcast %cst_213 : f32 to vector<1x256xf32>
    %561 = arith.maximumf %559, %560 : vector<1x256xf32>
    %c0_214 = arith.constant 0 : index
    %c0_215 = arith.constant 0 : index
    %c0_216 = arith.constant 0 : index
    %562 = vector.load %arg42[%c0_214, %c0_215, %c0_216] : memref<1x1x256xf32, #tpu.memory_space<vmem>>, vector<1x1x256xf32>
    %563 = vector.shape_cast %562 : vector<1x1x256xf32> to vector<1x256xf32>
    %564 = vector.shape_cast %561 : vector<1x256xf32> to vector<1x1x256xf32>
    tpu.vector_store %arg42[%c0_214, %c0_215, %c0_216], %564 {strides = array<i32>} : memref<1x1x256xf32, #tpu.memory_space<vmem>>, vector<1x1x256xf32>,
    return
  }
  func.func @transform_0(%arg0: i32) -> (i32, i32, i32) {
    %c0_i32 = arith.constant 0 : i32
    %c0_i32_0 = arith.constant 0 : i32
    %c0_i32_1 = arith.constant 0 : i32
    return %arg0, %c0_i32, %c0_i32_0 : i32, i32, i32
  }
  func.func @transform_1(%arg0: i32) -> (i32, i32, i32) {
    %c0_i32 = arith.constant 0 : i32
    %c0_i32_0 = arith.constant 0 : i32
    %c0_i32_1 = arith.constant 0 : i32
    return %arg0, %c0_i32, %c0_i32_0 : i32, i32, i32
  }
  func.func @transform_2(%arg0: i32) -> (i32, i32, i32) {
    %c0_i32 = arith.constant 0 : i32
    %c0_i32_0 = arith.constant 0 : i32
    %c0_i32_1 = arith.constant 0 : i32
    return %arg0, %c0_i32, %c0_i32_0 : i32, i32, i32
  }
  func.func @transform_3(%arg0: i32) -> (i32, i32, i32) {
    %c0_i32 = arith.constant 0 : i32
    %c0_i32_0 = arith.constant 0 : i32
    %c0_i32_1 = arith.constant 0 : i32
    return %arg0, %c0_i32, %c0_i32_0 : i32, i32, i32
  }
  func.func @transform_4(%arg0: i32) -> (i32, i32, i32) {
    %c0_i32 = arith.constant 0 : i32
    %c0_i32_0 = arith.constant 0 : i32
    %c0_i32_1 = arith.constant 0 : i32
    return %arg0, %c0_i32, %c0_i32_0 : i32, i32, i32
  }
  func.func @transform_5(%arg0: i32) -> (i32, i32) {
    %c0_i32 = arith.constant 0 : i32
    %c0_i32_0 = arith.constant 0 : i32
    %c0_i32_1 = arith.constant 0 : i32
    return %c0_i32, %c0_i32_0 : i32, i32
  }
  func.func @transform_6(%arg0: i32) -> (i32, i32) {
    %c0_i32 = arith.constant 0 : i32
    %c0_i32_0 = arith.constant 0 : i32
    %c0_i32_1 = arith.constant 0 : i32
    return %c0_i32, %c0_i32_0 : i32, i32
  }
  func.func @transform_7(%arg0: i32) -> (i32, i32) {
    %c0_i32 = arith.constant 0 : i32
    %c0_i32_0 = arith.constant 0 : i32
    %c0_i32_1 = arith.constant 0 : i32
    return %c0_i32, %c0_i32_0 : i32, i32
  }
  func.func @transform_8(%arg0: i32) -> (i32, i32) {
    %c0_i32 = arith.constant 0 : i32
    %c0_i32_0 = arith.constant 0 : i32
    %c0_i32_1 = arith.constant 0 : i32
    return %c0_i32, %c0_i32_0 : i32, i32
  }
  func.func @transform_9(%arg0: i32) -> (i32, i32) {
    %c0_i32 = arith.constant 0 : i32
    %c0_i32_0 = arith.constant 0 : i32
    %c0_i32_1 = arith.constant 0 : i32
    return %c0_i32, %c0_i32_0 : i32, i32
  }
  func.func @transform_10(%arg0: i32) -> (i32, i32) {
    %c0_i32 = arith.constant 0 : i32
    %c0_i32_0 = arith.constant 0 : i32
    %c0_i32_1 = arith.constant 0 : i32
    return %c0_i32, %c0_i32_0 : i32, i32
  }
  func.func @transform_11(%arg0: i32) -> (i32, i32) {
    %c0_i32 = arith.constant 0 : i32
    %c0_i32_0 = arith.constant 0 : i32
    %c0_i32_1 = arith.constant 0 : i32
    return %c0_i32, %c0_i32_0 : i32, i32
  }
  func.func @transform_12(%arg0: i32) -> (i32, i32) {
    %c0_i32 = arith.constant 0 : i32
    %c0_i32_0 = arith.constant 0 : i32
    %c0_i32_1 = arith.constant 0 : i32
    return %c0_i32, %c0_i32_0 : i32, i32
  }
  func.func @transform_13(%arg0: i32) -> (i32, i32) {
    %c0_i32 = arith.constant 0 : i32
    %c0_i32_0 = arith.constant 0 : i32
    %c0_i32_1 = arith.constant 0 : i32
    return %c0_i32, %c0_i32_0 : i32, i32
  }
  func.func @transform_14(%arg0: i32) -> (i32, i32) {
    %c0_i32 = arith.constant 0 : i32
    %c0_i32_0 = arith.constant 0 : i32
    %c0_i32_1 = arith.constant 0 : i32
    return %c0_i32, %c0_i32_0 : i32, i32
  }
  func.func @transform_15(%arg0: i32) -> (i32, i32) {
    %c0_i32 = arith.constant 0 : i32
    %c0_i32_0 = arith.constant 0 : i32
    %c0_i32_1 = arith.constant 0 : i32
    return %c0_i32, %c0_i32_0 : i32, i32
  }
  func.func @transform_16(%arg0: i32) -> (i32, i32) {
    %c0_i32 = arith.constant 0 : i32
    %c0_i32_0 = arith.constant 0 : i32
    %c0_i32_1 = arith.constant 0 : i32
    return %c0_i32, %c0_i32_0 : i32, i32
  }
  func.func @transform_17(%arg0: i32) -> (i32, i32) {
    %c0_i32 = arith.constant 0 : i32
    %c0_i32_0 = arith.constant 0 : i32
    %c0_i32_1 = arith.constant 0 : i32
    return %c0_i32, %c0_i32_0 : i32, i32
  }
  func.func @transform_18(%arg0: i32) -> (i32, i32) {
    %c0_i32 = arith.constant 0 : i32
    %c0_i32_0 = arith.constant 0 : i32
    %c0_i32_1 = arith.constant 0 : i32
    return %c0_i32, %c0_i32_0 : i32, i32
  }
  func.func @transform_19(%arg0: i32) -> (i32, i32) {
    %c0_i32 = arith.constant 0 : i32
    %c0_i32_0 = arith.constant 0 : i32
    %c0_i32_1 = arith.constant 0 : i32
    return %c0_i32, %c0_i32_0 : i32, i32
  }
  func.func @transform_20(%arg0: i32) -> (i32, i32) {
    %c0_i32 = arith.constant 0 : i32
    %c0_i32_0 = arith.constant 0 : i32
    %c0_i32_1 = arith.constant 0 : i32
    return %c0_i32, %c0_i32_0 : i32, i32
  }
  func.func @transform_21(%arg0: i32) -> (i32, i32) {
    %c0_i32 = arith.constant 0 : i32
    %c0_i32_0 = arith.constant 0 : i32
    %c0_i32_1 = arith.constant 0 : i32
    return %c0_i32, %c0_i32_0 : i32, i32
  }
  func.func @transform_22(%arg0: i32) -> (i32, i32) {
    %c0_i32 = arith.constant 0 : i32
    %c0_i32_0 = arith.constant 0 : i32
    %c0_i32_1 = arith.constant 0 : i32
    return %c0_i32, %c0_i32_0 : i32, i32
  }
  func.func @transform_23(%arg0: i32) -> (i32, i32) {
    %c0_i32 = arith.constant 0 : i32
    %c0_i32_0 = arith.constant 0 : i32
    %c0_i32_1 = arith.constant 0 : i32
    return %c0_i32, %c0_i32_0 : i32, i32
  }
  func.func @transform_24(%arg0: i32) -> (i32, i32) {
    %c0_i32 = arith.constant 0 : i32
    %c0_i32_0 = arith.constant 0 : i32
    %c0_i32_1 = arith.constant 0 : i32
    return %c0_i32, %c0_i32_0 : i32, i32
  }
  func.func @transform_25(%arg0: i32) -> (i32, i32) {
    %c0_i32 = arith.constant 0 : i32
    %c0_i32_0 = arith.constant 0 : i32
    %c0_i32_1 = arith.constant 0 : i32
    return %c0_i32, %c0_i32_0 : i32, i32
  }
  func.func @transform_26(%arg0: i32) -> (i32, i32) {
    %c0_i32 = arith.constant 0 : i32
    %c0_i32_0 = arith.constant 0 : i32
    %c0_i32_1 = arith.constant 0 : i32
    return %c0_i32, %c0_i32_0 : i32, i32
  }
  func.func @transform_27(%arg0: i32) -> (i32, i32) {
    %c0_i32 = arith.constant 0 : i32
    %c0_i32_0 = arith.constant 0 : i32
    %c0_i32_1 = arith.constant 0 : i32
    return %c0_i32, %c0_i32_0 : i32, i32
  }
  func.func @transform_28(%arg0: i32) -> (i32, i32) {
    %c0_i32 = arith.constant 0 : i32
    %c0_i32_0 = arith.constant 0 : i32
    %c0_i32_1 = arith.constant 0 : i32
    return %c0_i32, %c0_i32_0 : i32, i32
  }
  func.func @transform_29(%arg0: i32) -> (i32, i32) {
    %c0_i32 = arith.constant 0 : i32
    %c0_i32_0 = arith.constant 0 : i32
    %c0_i32_1 = arith.constant 0 : i32
    return %c0_i32, %c0_i32_0 : i32, i32
  }
  func.func @transform_30(%arg0: i32) -> (i32, i32) {
    %c0_i32 = arith.constant 0 : i32
    %c0_i32_0 = arith.constant 0 : i32
    %c0_i32_1 = arith.constant 0 : i32
    return %c0_i32, %c0_i32_0 : i32, i32
  }
  func.func @transform_31(%arg0: i32) -> (i32, i32) {
    %c0_i32 = arith.constant 0 : i32
    %c0_i32_0 = arith.constant 0 : i32
    %c0_i32_1 = arith.constant 0 : i32
    return %c0_i32, %c0_i32_0 : i32, i32
  }
  func.func @transform_32(%arg0: i32) -> (i32, i32) {
    %c0_i32 = arith.constant 0 : i32
    %c0_i32_0 = arith.constant 0 : i32
    %c0_i32_1 = arith.constant 0 : i32
    return %c0_i32, %c0_i32_0 : i32, i32
  }
  func.func @transform_33(%arg0: i32) -> (i32, i32) {
    %c0_i32 = arith.constant 0 : i32
    %c0_i32_0 = arith.constant 0 : i32
    %c0_i32_1 = arith.constant 0 : i32
    return %c0_i32, %c0_i32_0 : i32, i32
  }
  func.func @transform_34(%arg0: i32) -> (i32, i32) {
    %c0_i32 = arith.constant 0 : i32
    %c0_i32_0 = arith.constant 0 : i32
    %c0_i32_1 = arith.constant 0 : i32
    return %c0_i32, %c0_i32_0 : i32, i32
  }
  func.func @transform_35(%arg0: i32) -> (i32, i32) {
    %c0_i32 = arith.constant 0 : i32
    %c0_i32_0 = arith.constant 0 : i32
    %c0_i32_1 = arith.constant 0 : i32
    return %c0_i32, %c0_i32_0 : i32, i32
  }
  func.func @transform_36(%arg0: i32) -> (i32, i32) {
    %c0_i32 = arith.constant 0 : i32
    %c0_i32_0 = arith.constant 0 : i32
    %c0_i32_1 = arith.constant 0 : i32
    return %c0_i32, %c0_i32_0 : i32, i32
  }
  func.func @transform_37(%arg0: i32) -> (i32, i32) {
    %c0_i32 = arith.constant 0 : i32
    %c0_i32_0 = arith.constant 0 : i32
    %c0_i32_1 = arith.constant 0 : i32
    return %c0_i32, %c0_i32_0 : i32, i32
  }
  func.func @transform_38(%arg0: i32) -> (i32, i32) {
    %c0_i32 = arith.constant 0 : i32
    %c0_i32_0 = arith.constant 0 : i32
    %c0_i32_1 = arith.constant 0 : i32
    return %c0_i32, %c0_i32_0 : i32, i32
  }
  func.func @transform_39(%arg0: i32) -> (i32, i32) {
    %c0_i32 = arith.constant 0 : i32
    %c0_i32_0 = arith.constant 0 : i32
    %c0_i32_1 = arith.constant 0 : i32
    return %c0_i32, %c0_i32_0 : i32, i32
  }
  func.func @transform_40(%arg0: i32) -> (i32, i32) {
    %c0_i32 = arith.constant 0 : i32
    %c0_i32_0 = arith.constant 0 : i32
    %c0_i32_1 = arith.constant 0 : i32
    return %c0_i32, %c0_i32_0 : i32, i32
  }
  func.func @transform_41(%arg0: i32) -> (i32, i32, i32) {
    %c0_i32 = arith.constant 0 : i32
    %c0_i32_0 = arith.constant 0 : i32
    %c0_i32_1 = arith.constant 0 : i32
    return %arg0, %c0_i32, %c0_i32_0 : i32, i32, i32
  }
}

</mosaic_0001>

<bundles_post_ra>
// kernel: decoder_forward.1
= control target key start
LH: loop header
LB: loop body
LE: loop exit
PB: predicated region body
PF: predicated region fallthrough
CT: control target
= control target key end

     0   :  { %s9306_s6 = smov 1   ;;  %s9307_s10 = smov 2   ;;  %s10634_s0 = inlined_call_operand.smem [shape: u32[42], index: -1, kind: input, shape index: {}] }
   0x1   :  { %s9398_s5 = sld [smem:[%s10634_s0]]   ;;  %s9308_s14 = smov 3  }
   0x2   :  { %s9403_s9 = sld [smem:[%s10634_s0 + %s9306_s6]]   ;;  %s9309_s18 = smov 4  }
   0x3   :  { %s9408_s13 = sld [smem:[%s10634_s0 + %s9307_s10]]   ;;  %s9310_s22 = smov 5  }
   0x4   :  { %s9413_s17 = sld [smem:[%s10634_s0 + %s9308_s14]]   ;;  %s9311_s26 = smov 6  }
   0x5   :  { %s9418_s21 = sld [smem:[%s10634_s0 + %s9309_s18]]   ;;  %s9312_s30 = smov 7  }
   0x6   :  { %s9423_s25 = sld [smem:[%s10634_s0 + %s9310_s22]]   ;;  %s9313_s4 = smov 8  }
   0x7   :  { %10698 = sst [smem:[#allocation52_spill]] %s9398_s5  ;;  %s9314_s10 = smov 9  }
   0x8   :  { %10699 = sst [smem:[#allocation53_spill]] %s9403_s9  ;;  %s9315_s15 = smov 10  }
   0x9   :  { %10700 = sst [smem:[#allocation54_spill]] %s9408_s13  ;;  %s9316_s20 = smov 11  }
   0xa   :  { %10701 = sst [smem:[#allocation55_spill]] %s9413_s17  ;;  %s9318_s1 = smov 13  }
   0xb   :  { %10702 = sst [smem:[#allocation56_spill]] %s9418_s21  ;;  %s9319_s7 = smov 14  }
   0xc   :  { %s9428_s29 = sld [smem:[%s10634_s0 + %s9311_s26]]   ;;  %s9317_s26 = smov 12  }
   0xd   :  { %s9433_s3 = sld [smem:[%s10634_s0 + %s9312_s30]]   ;;  %s9321_s22 = smov 16  }
   0xe   :  { %s9438_s8 = sld [smem:[%s10634_s0 + %s9313_s4]]   ;;  %s9322_s28 = smov 17  }
   0xf   :  { %s9443_s14 = sld [smem:[%s10634_s0 + %s9314_s10]]  }
  0x10   :  { %s9448_s19 = sld [smem:[%s10634_s0 + %s9315_s15]]   ;;  %s9320_s15 = smov 15  }
  0x11   :  { %s9453_s24 = sld [smem:[%s10634_s0 + %s9316_s20]]  }
  0x12   :  { %s9458_s30 = sld [smem:[%s10634_s0 + %s9317_s26]]  }
  0x13   :  { %10703 = sst [smem:[#allocation57_spill]] %s9433_s3 }
  0x14   :  { %10704 = sst [smem:[#allocation58_spill]] %s9438_s8 }
  0x15   :  { %10705 = sst [smem:[#allocation59_spill]] %s9443_s14 }
  0x16   :  { %s9463_s6 = sld [smem:[%s10634_s0 + %s9318_s1]]  }
  0x17   :  { %10706 = sst [smem:[#allocation60_spill]] %s9453_s24 }
  0x18   :  { %s9468_s12 = sld [smem:[%s10634_s0 + %s9319_s7]]   ;;  %s9323_s7 = smov 18  }
  0x19   :  { %s9473_s20 = sld [smem:[%s10634_s0 + %s9320_s15]]   ;;  %s9324_s15 = smov 19  }
  0x1a   :  { %s9478_s27 = sld [smem:[%s10634_s0 + %s9321_s22]]   ;;  %s9325_s22 = smov 20  }
  0x1b   :  { %s9483_s4 = sld [smem:[%s10634_s0 + %s9322_s28]]   ;;  %s9326_s28 = smov 21  }
  0x1c   :  { %10707 = sst [smem:[#allocation61_spill]] %s9463_s6 }
  0x1d   :  { %s9488_s3 = sld [smem:[%s10634_s0 + %s9323_s7]]   ;;  %s9327_s7 = smov 22  }
  0x1e   :  { %10708 = sst [smem:[#allocation62_spill]] %s9468_s12 }
  0x1f   :  { %10709 = sst [smem:[#allocation63_spill]] %s9473_s20 }
  0x20   :  { %10710 = sst [smem:[#allocation64_spill]] %s9478_s27 }
  0x21   :  { %10711 = sst [smem:[#allocation65_spill]] %s9483_s4 }
  0x22   :  { %s9493_s21 = sld [smem:[%s10634_s0 + %s9324_s15]]   ;;  %s9328_s15 = smov 23  }
  0x23   :  { %10712 = sst [smem:[#allocation66_spill]] %s9488_s3 }
  0x24   :  { %s9498_s17 = sld [smem:[%s10634_s0 + %s9325_s22]]   ;;  %s9329_s22 = smov 24  }
  0x25   :  { %s9503_s20 = sld [smem:[%s10634_s0 + %s9326_s28]]   ;;  %s9330_s28 = smov 25  }
  0x26   :  { %s9508_s9 = sld [smem:[%s10634_s0 + %s9327_s7]]   ;;  %s9331_s7 = smov 26  }
  0x27   :  { %s9518_s4 = sld [smem:[%s10634_s0 + %s9329_s22]]   ;;  %s9333_s22 = smov 28  }
  0x28   :  { %10713 = sst [smem:[#allocation67_spill]] %s9493_s21 }
  0x29   :  { %s9513_s21 = sld [smem:[%s10634_s0 + %s9328_s15]]   ;;  %s9332_s15 = smov 27  }
  0x2a   :  { %10714 = sst [smem:[#allocation68_spill]] %s9498_s17 }
  0x2b   :  { %10715 = sst [smem:[#allocation69_spill]] %s9503_s20 }
  0x2c   :  { %10716 = sst [smem:[#allocation70_spill]] %s9508_s9 }
  0x2d   :  { %10718 = sst [smem:[#allocation72_spill]] %s9518_s4 }
  0x2e   :  { %s9523_s20 = sld [smem:[%s10634_s0 + %s9330_s28]]   ;;  %s9334_s28 = smov 29  }
  0x2f   :  { %10717 = sst [smem:[#allocation71_spill]] %s9513_s21 }
  0x30   :  { %s9528_s6 = sld [smem:[%s10634_s0 + %s9331_s7]]   ;;  %s9335_s7 = smov 30  }
  0x31   :  { %s9533_s21 = sld [smem:[%s10634_s0 + %s9332_s15]]   ;;  %s9336_s15 = smov 31  }
  0x32   :  { %s9538_s13 = sld [smem:[%s10634_s0 + %s9333_s22]]   ;;  %s9337_s22 = smov 32  }
  0x33   :  { %s9543_s24 = sld [smem:[%s10634_s0 + %s9334_s28]]   ;;  %s9338_s28 = smov 33  }
  0x34   :  { %s9548_s5 = sld [smem:[%s10634_s0 + %s9335_s7]]   ;;  %s9339_s7 = smov 34  }
  0x36   :  { %10719 = sst [smem:[#allocation73_spill]] %s9528_s6 }
  0x37   :  { %10720 = sst [smem:[#allocation74_spill]] %s9533_s21 }
  0x38   :  { %10721 = sst [smem:[#allocation75_spill]] %s9538_s13 }
  0x39   :  { %10722 = sst [smem:[#allocation76_spill]] %s9543_s24 }
  0x3a   :  { %10723 = sst [smem:[#allocation77_spill]] %s9548_s5 }
  0x3b   :  { %s9553_s21 = sld [smem:[%s10634_s0 + %s9336_s15]]   ;;  %s9340_s15 = smov 35  }
  0x3c   :  { %s9558_s6 = sld [smem:[%s10634_s0 + %s9337_s22]]   ;;  %s9341_s22 = smov 36  }
  0x3d   :  { %s9563_s24 = sld [smem:[%s10634_s0 + %s9338_s28]]   ;;  %s9342_s28 = smov 37  }
  0x3e   :  { %s9568_s5 = sld [smem:[%s10634_s0 + %s9339_s7]]   ;;  %s9343_s7 = smov 38  }
  0x3f   :  { %s9578_s4 = sld [smem:[%s10634_s0 + %s9341_s22]]   ;;  %s9345_s22 = smov 40  }
  0x40   :  { %s9588_s17 = sld [smem:[%s10634_s0 + %s9343_s7]]  }
  0x41   :  { %10724 = sst [smem:[#allocation78_spill]] %s9553_s21 }
  0x42   :  { %10725 = sst [smem:[#allocation79_spill]] %s9558_s6 }
  0x43   :  { %10726 = sst [smem:[#allocation80_spill]] %s9563_s24 }
  0x44   :  { %10727 = sst [smem:[#allocation81_spill]] %s9568_s5 }
  0x45   :  { %s9573_s21 = sld [smem:[%s10634_s0 + %s9340_s15]]   ;;  %s9344_s15 = smov 39  }
  0x46   :  { %10729 = sst [smem:[#allocation83_spill]] %s9578_s4 }
  0x47   :  { %s9583_s24 = sld [smem:[%s10634_s0 + %s9342_s28]]   ;;  %s9346_s28 = smov 41  }
  0x48   :  { %s9598_s27 = sld [smem:[%s10634_s0 + %s9345_s22]]  }
  0x4b   :  { %10728 = sst [smem:[#allocation82_spill]] %s9573_s21 }
  0x4c   :  { %s9593_s21 = sld [smem:[%s10634_s0 + %s9344_s15]]  }
  0x4d   :  { %10730 = sst [smem:[#allocation84_spill]] %s9583_s24 }
  0x4e   :  { %s9603_s24 = sld [smem:[%s10634_s0 + %s9346_s28]]  }
  0x52   :  { %10731 = sst [smem:[#allocation85_spill]] %s9593_s21 }
  0x54   :  { %10732 = sst [smem:[#allocation86_spill]] %s9603_s24 }
  0x55   :  { %88 = vsyncpa [#allocation3], 0 }
  0x56   :  { %90 = vsyncpa [#allocation3 + $0x1], 0 }
  0x57   :  { %91 = vsyncpa [#allocation5], 0 }
  0x58   :  { %92 = vsyncpa [#allocation8], 0 }
  0x59   :  { %93 = vsyncpa [#allocation11], 0 }
  0x5a   :  { %94 = vsyncpa [#allocation14], 0 }
  0x5b   :  { %95 = vsyncpa [#allocation17], 0 }
  0x5c   :  { %96 = vsyncpa [#allocation20], 0 }
  0x5d   :  { %97 = vsyncpa [#allocation23], 0 }
  0x5e   :  { %98 = vsyncpa [#allocation26], 0 }
  0x5f   :  { %99 = vsyncpa [#allocation29], 0 }
  0x60   :  { %100 = vsyncpa [#allocation32], 0 }
  0x61   :  { %101 = vsyncpa [#allocation35], 0 }
  0x62   :  { %102 = vsyncpa [#allocation38], 0  ;;  %s9605_s7 = smov 0   ;;  %s9607_s10 = smov 0  }
  0x63   :  { %s9609_s0 = smov 0   ;;  %s9611_s11 = smov 0  }
  0x64 LB: > { %s10733_s14 = sld [smem:[#allocation59_spill]]  ;;  %s10735_s12 = sld [smem:[#allocation62_spill]]  ;;  %s9292_s7 = sphi %s9605_s7, %s10818_s7   ;;  %s9304_s11 = sphi %s9611_s11, %s10821_s11   ;;  %s9300_s0 = sphi %s9609_s0, %s10820_s0   ;;  %s9296_s10 = sphi %s9607_s10, %s10819_s10  }
  0x65   : > { %s10734_s13 = sld [smem:[#allocation75_spill]]  ;;  %s10736_s9 = sld [smem:[#allocation70_spill]] }
  0x66   : > { %s10737_s6 = sld [smem:[#allocation79_spill]]  ;;  %s10738_s5 = sld [smem:[#allocation81_spill]] }
  0x67   : > { %s10739_s4 = sld [smem:[#allocation83_spill]]  ;;  %s10740_s3 = sld [smem:[#allocation66_spill]] }
  0x68   : > { %s10741_s8 = sld [smem:[#allocation58_spill]]  ;;  %s9347_s15 = smov [#allocation4]  }
  0x69   : > { %s1037_s16 = sshll.u32 %s9347_s15, 4  ;;  %s9626_s18 = sadd.s32 4294967295, %s9304_s11   ;;  %s9631_s16 = int_to_ptr.vmem [resolvable:$true] %s1037_s16 }
  0x6a   : > { %p7158_p0 = scmp.ge.s32.totalorder %s9304_s11, 1  ;;  %p10654_p1 = scmp.eq.s32.totalorder %s9626_s18, 0 }
  0x6b   : > { %p1025_p2 = scmp.lt.s32.totalorder %s9304_s11, 3  ;;  %s9348_s23 = smov [#allocation7]  }
  0x6c   : > { %s1065_s26 = sshll.u32 %s9348_s23, 4  ;;  %s9349_s1 = smov [#allocation10]   ;;  %s9645_s26 = int_to_ptr.vmem [resolvable:$true] %s1065_s26 }
  0x6d   : > { %p9633_p3 = pnand %p7158_p0, %p1025_p2  ;;  %s1087_s2 = sshll.u32 %s9349_s1, 4  ;;  %s9647_s2 = int_to_ptr.vmem [resolvable:$true] %s1087_s2 }
  0x6e   : > { %s8548_s15 = scalar_lea.hbm %s9423_s25, 256 }
  0x6f   : > { %s10742_s22 = scalar_select %p9633_p3, 1, 0 }
  0x70   : > { %p8157_p4 = pneg %p9633_p3  ;;  %p8549_p6 = scmp.ne.s32.totalorder %s9423_s25, %s8548_s15 }
  0x71   : > { %p8555_p10 = scmp.lt.u32.totalorder %s8548_s15, %s9423_s25 }
  0x72   : > { %p9641_p5 = pnand %p8157_p4, %p10654_p1 }
  0x74   : > { %p9653_p7 = pneg %p9641_p5 }
  0x76   : > { %p8551_p8 = pnand %p9653_p7, %p8549_p6 }
  0x78   : > { %p8552_p9 = pneg %p8551_p8 }
  0x7a   : > { %p8557_p11 = pnand %p8555_p10, %p8552_p9 }
  0x7c   : > { %8560 = shalt.err (!%p8557_p11)
}
  0x7d   : > { %s8561_s23 = scalar_lea.vmem %s9631_s16, 256  ;;  %p8569_p2 = scmp.lt.s32.totalorder %s9631_s16, %s9631_s16 }
  0x7e   : > { %p8562_p12 = scmp.ne.s32.totalorder %s9631_s16, %s8561_s23  ;;  %p8570_p4 = scmp.lt.s32.totalorder %s8561_s23, %s8561_s23 }
  0x80   : > { %p8564_p13 = pnand %p8562_p12, %p9653_p7  ;;  %p8571_p1 = por %p8570_p4, %p8569_p2 }
  0x82   : > { %p8565_p0 = pneg %p8564_p13 }
  0x84   : > { %p8572_p3 = pnand %p8571_p1, %p8565_p0 }
  0x86   : > { %8575 = shalt.err (!%p8572_p3)
}
  0x87   : > { %s10657_s1 = smov 128   ;;  %s10659_s15 = smov 8  }
  0x88   : > { %8160 = dma.hbm_to_vmem [thread:$0]  (!%p9641_p5), %s9423_s25, 256, %s9631_s16, [#allocation5], %s10657_s1, %s10657_s1, %s10659_s15  }
  0x89   : > { %s8576_s21 = scalar_lea.hbm %s10741_s8, 32 }
  0x8a   : > { %p8577_p6 = scmp.ne.s32.totalorder %s10741_s8, %s8576_s21  ;;  %p8583_p3 = scmp.lt.u32.totalorder %s8576_s21, %s10741_s8 }
  0x8c   : > { %p8579_p8 = pnand %p8577_p6, %p9653_p7 }
  0x8e   : > { %p8580_p1 = pneg %p8579_p8 }
  0x90   : > { %p8585_p9 = pnand %p8583_p3, %p8580_p1 }
  0x92   : > { %8588 = shalt.err (!%p8585_p9)
}
  0x93   : > { %s8589_s23 = scalar_lea.vmem %s9645_s26, 32  ;;  %p8597_p13 = scmp.lt.s32.totalorder %s9645_s26, %s9645_s26 }
  0x94   : > { %p8590_p10 = scmp.ne.s32.totalorder %s9645_s26, %s8589_s23  ;;  %p8598_p0 = scmp.lt.s32.totalorder %s8589_s23, %s8589_s23 }
  0x96   : > { %p8592_p11 = pnand %p8590_p10, %p9653_p7  ;;  %p8599_p2 = por %p8598_p0, %p8597_p13 }
  0x98   : > { %p8593_p12 = pneg %p8592_p11 }
  0x9a   : > { %p8600_p4 = pnand %p8599_p2, %p8593_p12 }
  0x9c   : > { %8603 = shalt.err (!%p8600_p4)
}
  0x9d   : > { %8166 = dma.hbm_to_vmem [thread:$0]  (!%p9641_p5), %s10741_s8, 32, %s9645_s26, [#allocation8]  }
  0x9e   : > { %s8604_s21 = scalar_lea.hbm %s9448_s19, 16 }
  0x9f   : > { %p8605_p6 = scmp.ne.s32.totalorder %s9448_s19, %s8604_s21  ;;  %p8611_p3 = scmp.lt.u32.totalorder %s8604_s21, %s9448_s19 }
  0xa1   : > { %p8607_p8 = pnand %p8605_p6, %p9653_p7 }
  0xa3   : > { %p8608_p1 = pneg %p8607_p8 }
  0xa5   : > { %p8613_p9 = pnand %p8611_p3, %p8608_p1 }
  0xa7   : > { %8616 = shalt.err (!%p8613_p9)
}
  0xa8   : > { %s8617_s16 = scalar_lea.vmem %s9647_s2, 16  ;;  %s8624_s23 = scalar_lea.vmem %s9647_s2, 32 }
  0xa9   : > { %p8618_p10 = scmp.ne.s32.totalorder %s9647_s2, %s8617_s16  ;;  %p8625_p13 = scmp.lt.s32.totalorder %s9647_s2, %s9647_s2 }
  0xaa   : > { %p8626_p0 = scmp.lt.s32.totalorder %s8624_s23, %s8617_s16 }
  0xab   : > { %p8620_p11 = pnand %p8618_p10, %p9653_p7 }
  0xac   : > { %p8627_p2 = por %p8626_p0, %p8625_p13 }
  0xad   : > { %p8621_p12 = pneg %p8620_p11 }
  0xaf   : > { %p8628_p4 = pnand %p8627_p2, %p8621_p12 }
  0xb1   : > { %8631 = shalt.err (!%p8628_p4)
}
  0xb2   : > { %8172 = dma.hbm_to_vmem [thread:$0]  (!%p9641_p5), %s9448_s19, 16, %s9647_s2, [#allocation11]  }
  0xb3   : > { %s9352_s26 = smov [#allocation13]   ;;  %s9353_s1 = smov [#allocation16]  }
  0xb4   : > { %s1115_s21 = sshll.u32 %s9352_s26, 4  ;;  %s1143_s15 = sshll.u32 %s9353_s1, 4  ;;  %s1116_s21 = int_to_ptr.vmem [resolvable:$true] %s1115_s21  ;;  %s1144_s15 = int_to_ptr.vmem [resolvable:$true] %s1143_s15 }
  0xb5   : > { %s8632_s8 = scalar_lea.hbm %s10735_s12, 16 }
  0xb6   : > { %p8633_p6 = scmp.ne.s32.totalorder %s10735_s12, %s8632_s8  ;;  %p8639_p3 = scmp.lt.u32.totalorder %s8632_s8, %s10735_s12 }
  0xb8   : > { %p8635_p8 = pnand %p8633_p6, %p9653_p7 }
  0xba   : > { %p8636_p1 = pneg %p8635_p8 }
  0xbc   : > { %p8641_p9 = pnand %p8639_p3, %p8636_p1 }
  0xbe   : > { %8644 = shalt.err (!%p8641_p9)
}
  0xbf   : > { %s8645_s16 = scalar_lea.vmem %s1116_s21, 16  ;;  %s8652_s2 = scalar_lea.vmem %s1116_s21, 32 }
  0xc0   : > { %p8646_p10 = scmp.ne.s32.totalorder %s1116_s21, %s8645_s16  ;;  %p8653_p13 = scmp.lt.s32.totalorder %s1116_s21, %s1116_s21 }
  0xc1   : > { %p8654_p0 = scmp.lt.s32.totalorder %s8652_s2, %s8645_s16 }
  0xc2   : > { %p8648_p11 = pnand %p8646_p10, %p9653_p7 }
  0xc3   : > { %p8655_p2 = por %p8654_p0, %p8653_p13 }
  0xc4   : > { %p8649_p12 = pneg %p8648_p11 }
  0xc6   : > { %p8656_p4 = pnand %p8655_p2, %p8649_p12 }
  0xc8   : > { %8659 = shalt.err (!%p8656_p4)
}
  0xc9   : > { %8178 = dma.hbm_to_vmem [thread:$0]  (!%p9641_p5), %s10735_s12, 16, %s1116_s21, [#allocation14]  }
  0xca   : > { %s8660_s8 = scalar_lea.hbm %s10740_s3, 16 }
  0xcb   : > { %p8661_p6 = scmp.ne.s32.totalorder %s10740_s3, %s8660_s8  ;;  %p8667_p3 = scmp.lt.u32.totalorder %s8660_s8, %s10740_s3 }
  0xcd   : > { %p8663_p8 = pnand %p8661_p6, %p9653_p7 }
  0xcf   : > { %p8664_p1 = pneg %p8663_p8 }
  0xd1   : > { %p8669_p9 = pnand %p8667_p3, %p8664_p1 }
  0xd3   : > { %8672 = shalt.err (!%p8669_p9)
}
  0xd4   : > { %s8673_s1 = scalar_lea.vmem %s1144_s15, 16  ;;  %s8680_s23 = scalar_lea.vmem %s1144_s15, 32 }
  0xd5   : > { %p8674_p10 = scmp.ne.s32.totalorder %s1144_s15, %s8673_s1  ;;  %p8681_p13 = scmp.lt.s32.totalorder %s1144_s15, %s1144_s15 }
  0xd6   : > { %p8682_p0 = scmp.lt.s32.totalorder %s8680_s23, %s8673_s1 }
  0xd7   : > { %p8676_p11 = pnand %p8674_p10, %p9653_p7 }
  0xd8   : > { %p8683_p2 = por %p8682_p0, %p8681_p13 }
  0xd9   : > { %p8677_p12 = pneg %p8676_p11 }
  0xdb   : > { %p8684_p4 = pnand %p8683_p2, %p8677_p12 }
  0xdd   : > { %8687 = shalt.err (!%p8684_p4)
}
  0xde   : > { %8184 = dma.hbm_to_vmem [thread:$0]  (!%p9641_p5), %s10740_s3, 16, %s1144_s15, [#allocation17]  }
  0xdf   : > { %s9354_s26 = smov [#allocation19]   ;;  %s9355_s16 = smov [#allocation22]  }
  0xe0   : > { %s1171_s21 = sshll.u32 %s9354_s26, 4  ;;  %s1196_s2 = sshll.u32 %s9355_s16, 4  ;;  %s1172_s21 = int_to_ptr.vmem [resolvable:$true] %s1171_s21  ;;  %s1197_s2 = int_to_ptr.vmem [resolvable:$true] %s1196_s2 }
  0xe1   : > { %s8688_s8 = scalar_lea.hbm %s10736_s9, 16 }
  0xe2   : > { %p8689_p6 = scmp.ne.s32.totalorder %s10736_s9, %s8688_s8  ;;  %p8695_p3 = scmp.lt.u32.totalorder %s8688_s8, %s10736_s9 }
  0xe4   : > { %p8691_p8 = pnand %p8689_p6, %p9653_p7 }
  0xe6   : > { %p8692_p1 = pneg %p8691_p8 }
  0xe8   : > { %p8697_p9 = pnand %p8695_p3, %p8692_p1 }
  0xea   : > { %8700 = shalt.err (!%p8697_p9)
}
  0xeb   : > { %s8701_s1 = scalar_lea.vmem %s1172_s21, 16  ;;  %s8708_s15 = scalar_lea.vmem %s1172_s21, 32 }
  0xec   : > { %p8702_p10 = scmp.ne.s32.totalorder %s1172_s21, %s8701_s1  ;;  %p8709_p13 = scmp.lt.s32.totalorder %s1172_s21, %s1172_s21 }
  0xed   : > { %p8710_p0 = scmp.lt.s32.totalorder %s8708_s15, %s8701_s1 }
  0xee   : > { %p8704_p11 = pnand %p8702_p10, %p9653_p7 }
  0xef   : > { %p8711_p2 = por %p8710_p0, %p8709_p13 }
  0xf0   : > { %p8705_p12 = pneg %p8704_p11 }
  0xf2   : > { %p8712_p4 = pnand %p8711_p2, %p8705_p12 }
  0xf4   : > { %8715 = shalt.err (!%p8712_p4)
}
  0xf5   : > { %8190 = dma.hbm_to_vmem [thread:$0]  (!%p9641_p5), %s10736_s9, 16, %s1172_s21, [#allocation20]  }
  0xf6   : > { %s8716_s23 = scalar_lea.hbm %s9523_s20, 16 }
  0xf7   : > { %p8717_p6 = scmp.ne.s32.totalorder %s9523_s20, %s8716_s23  ;;  %p8723_p3 = scmp.lt.u32.totalorder %s8716_s23, %s9523_s20 }
  0xf9   : > { %p8719_p8 = pnand %p8717_p6, %p9653_p7 }
  0xfb   : > { %p8720_p1 = pneg %p8719_p8 }
  0xfd   : > { %p8725_p9 = pnand %p8723_p3, %p8720_p1 }
  0xff   : > { %8728 = shalt.err (!%p8725_p9)
}
 0x100   : > { %s8729_s26 = scalar_lea.vmem %s1197_s2, 16  ;;  %s8736_s16 = scalar_lea.vmem %s1197_s2, 32 }
 0x101   : > { %p8730_p10 = scmp.ne.s32.totalorder %s1197_s2, %s8729_s26  ;;  %p8737_p13 = scmp.lt.s32.totalorder %s1197_s2, %s1197_s2 }
 0x102   : > { %p8738_p0 = scmp.lt.s32.totalorder %s8736_s16, %s8729_s26 }
 0x103   : > { %p8732_p11 = pnand %p8730_p10, %p9653_p7 }
 0x104   : > { %p8739_p2 = por %p8738_p0, %p8737_p13 }
 0x105   : > { %p8733_p12 = pneg %p8732_p11 }
 0x107   : > { %p8740_p4 = pnand %p8739_p2, %p8733_p12 }
 0x109   : > { %8743 = shalt.err (!%p8740_p4)
}
 0x10a   : > { %8196 = dma.hbm_to_vmem [thread:$0]  (!%p9641_p5), %s9523_s20, 16, %s1197_s2, [#allocation23]  }
 0x10b   : > { %s9356_s21 = smov [#allocation25]   ;;  %s9357_s1 = smov [#allocation28]  }
 0x10c   : > { %s1221_s8 = sshll.u32 %s9356_s21, 4  ;;  %s1251_s15 = sshll.u32 %s9357_s1, 4  ;;  %s1222_s8 = int_to_ptr.vmem [resolvable:$true] %s1221_s8  ;;  %s1252_s15 = int_to_ptr.vmem [resolvable:$true] %s1251_s15 }
 0x10d   : > { %s8744_s23 = scalar_lea.hbm %s10734_s13, 16 }
 0x10e   : > { %p8745_p6 = scmp.ne.s32.totalorder %s10734_s13, %s8744_s23  ;;  %p8751_p3 = scmp.lt.u32.totalorder %s8744_s23, %s10734_s13 }
 0x110   : > { %p8747_p8 = pnand %p8745_p6, %p9653_p7 }
 0x112   : > { %p8748_p1 = pneg %p8747_p8 }
 0x114   : > { %p8753_p9 = pnand %p8751_p3, %p8748_p1 }
 0x116   : > { %8756 = shalt.err (!%p8753_p9)
}
 0x117   : > { %s8757_s26 = scalar_lea.vmem %s1222_s8, 16  ;;  %s8764_s2 = scalar_lea.vmem %s1222_s8, 32 }
 0x118   : > { %p8758_p10 = scmp.ne.s32.totalorder %s1222_s8, %s8757_s26  ;;  %p8765_p13 = scmp.lt.s32.totalorder %s1222_s8, %s1222_s8 }
 0x119   : > { %p8766_p0 = scmp.lt.s32.totalorder %s8764_s2, %s8757_s26 }
 0x11a   : > { %p8760_p11 = pnand %p8758_p10, %p9653_p7 }
 0x11b   : > { %p8767_p2 = por %p8766_p0, %p8765_p13 }
 0x11c   : > { %p8761_p12 = pneg %p8760_p11 }
 0x11e   : > { %p8768_p4 = pnand %p8767_p2, %p8761_p12 }
 0x120   : > { %8771 = shalt.err (!%p8768_p4)
}
 0x121   : > { %8202 = dma.hbm_to_vmem [thread:$0]  (!%p9641_p5), %s10734_s13, 16, %s1222_s8, [#allocation26]  }
 0x122   : > { %s8772_s16 = scalar_lea.hbm %s10737_s6, 16 }
 0x123   : > { %p8773_p6 = scmp.ne.s32.totalorder %s10737_s6, %s8772_s16  ;;  %p8779_p3 = scmp.lt.u32.totalorder %s8772_s16, %s10737_s6 }
 0x125   : > { %p8775_p8 = pnand %p8773_p6, %p9653_p7 }
 0x127   : > { %p8776_p1 = pneg %p8775_p8 }
 0x129   : > { %p8781_p9 = pnand %p8779_p3, %p8776_p1 }
 0x12b   : > { %8784 = shalt.err (!%p8781_p9)
}
 0x12c   : > { %s8785_s21 = scalar_lea.vmem %s1252_s15, 16  ;;  %s8792_s1 = scalar_lea.vmem %s1252_s15, 32 }
 0x12d   : > { %p8786_p10 = scmp.ne.s32.totalorder %s1252_s15, %s8785_s21  ;;  %p8793_p13 = scmp.lt.s32.totalorder %s1252_s15, %s1252_s15 }
 0x12e   : > { %p8794_p0 = scmp.lt.s32.totalorder %s8792_s1, %s8785_s21 }
 0x12f   : > { %p8788_p11 = pnand %p8786_p10, %p9653_p7 }
 0x130   : > { %p8795_p2 = por %p8794_p0, %p8793_p13 }
 0x131   : > { %p8789_p12 = pneg %p8788_p11 }
 0x133   : > { %p8796_p4 = pnand %p8795_p2, %p8789_p12 }
 0x135   : > { %8799 = shalt.err (!%p8796_p4)
}
 0x136   : > { %8208 = dma.hbm_to_vmem [thread:$0]  (!%p9641_p5), %s10737_s6, 16, %s1252_s15, [#allocation29]  }
 0x137   : > { %s9358_s8 = smov [#allocation31]   ;;  %s9359_s26 = smov [#allocation34]  }
 0x138   : > { %s1275_s23 = sshll.u32 %s9358_s8, 4  ;;  %s1299_s2 = sshll.u32 %s9359_s26, 4  ;;  %s1276_s23 = int_to_ptr.vmem [resolvable:$true] %s1275_s23  ;;  %s1300_s2 = int_to_ptr.vmem [resolvable:$true] %s1299_s2 }
 0x139   : > { %s8800_s16 = scalar_lea.hbm %s10738_s5, 16 }
 0x13a   : > { %p8801_p6 = scmp.ne.s32.totalorder %s10738_s5, %s8800_s16  ;;  %p8807_p3 = scmp.lt.u32.totalorder %s8800_s16, %s10738_s5 }
 0x13c   : > { %p8803_p8 = pnand %p8801_p6, %p9653_p7 }
 0x13e   : > { %p8804_p1 = pneg %p8803_p8 }
 0x140   : > { %p8809_p9 = pnand %p8807_p3, %p8804_p1 }
 0x142   : > { %8812 = shalt.err (!%p8809_p9)
}
 0x143   : > { %s8813_s21 = scalar_lea.vmem %s1276_s23, 16  ;;  %s8820_s15 = scalar_lea.vmem %s1276_s23, 32 }
 0x144   : > { %p8814_p10 = scmp.ne.s32.totalorder %s1276_s23, %s8813_s21  ;;  %p8821_p13 = scmp.lt.s32.totalorder %s1276_s23, %s1276_s23 }
 0x145   : > { %p8822_p0 = scmp.lt.s32.totalorder %s8820_s15, %s8813_s21 }
 0x146   : > { %p8816_p11 = pnand %p8814_p10, %p9653_p7 }
 0x147   : > { %p8823_p2 = por %p8822_p0, %p8821_p13 }
 0x148   : > { %p8817_p12 = pneg %p8816_p11 }
 0x14a   : > { %p8824_p4 = pnand %p8823_p2, %p8817_p12 }
 0x14c   : > { %8827 = shalt.err (!%p8824_p4)
}
 0x14d   : > { %8214 = dma.hbm_to_vmem [thread:$0]  (!%p9641_p5), %s10738_s5, 16, %s1276_s23, [#allocation32]  }
 0x14e   : > { %s8828_s1 = scalar_lea.hbm %s10739_s4, 16 }
 0x14f   : > { %p8829_p6 = scmp.ne.s32.totalorder %s10739_s4, %s8828_s1  ;;  %p8835_p3 = scmp.lt.u32.totalorder %s8828_s1, %s10739_s4 }
 0x151   : > { %p8831_p8 = pnand %p8829_p6, %p9653_p7 }
 0x153   : > { %p8832_p1 = pneg %p8831_p8 }
 0x155   : > { %p8837_p9 = pnand %p8835_p3, %p8832_p1 }
 0x157   : > { %8840 = shalt.err (!%p8837_p9)
}
 0x158   : > { %s8841_s8 = scalar_lea.vmem %s1300_s2, 16  ;;  %s8848_s26 = scalar_lea.vmem %s1300_s2, 32 }
 0x159   : > { %p8842_p10 = scmp.ne.s32.totalorder %s1300_s2, %s8841_s8  ;;  %p8849_p13 = scmp.lt.s32.totalorder %s1300_s2, %s1300_s2 }
 0x15a   : > { %p8850_p0 = scmp.lt.s32.totalorder %s8848_s26, %s8841_s8 }
 0x15b   : > { %p8844_p11 = pnand %p8842_p10, %p9653_p7 }
 0x15c   : > { %p8851_p2 = por %p8850_p0, %p8849_p13 }
 0x15d   : > { %p8845_p12 = pneg %p8844_p11 }
 0x15f   : > { %p8852_p4 = pnand %p8851_p2, %p8845_p12 }
 0x161   : > { %8855 = shalt.err (!%p8852_p4)
}
 0x162   : > { %8220 = dma.hbm_to_vmem [thread:$0]  (!%p9641_p5), %s10739_s4, 16, %s1300_s2, [#allocation35]  }
 0x163   : > { %s9360_s23 = smov [#allocation6]   ;;  %s9361_s21 = smov [#allocation9]  }
 0x164   : > { %s1051_s16 = sshll.u32 %s9360_s23, 4  ;;  %s1076_s15 = sshll.u32 %s9361_s21, 4  ;;  %s1052_s16 = int_to_ptr.vmem [resolvable:$true] %s1051_s16  ;;  %s1077_s15 = int_to_ptr.vmem [resolvable:$true] %s1076_s15 }
 0x165   : > { %s8856_s1 = scalar_lea.hbm %s9428_s29, 16 }
 0x166   : > { %p8857_p6 = scmp.ne.s32.totalorder %s9428_s29, %s8856_s1  ;;  %p8863_p3 = scmp.lt.u32.totalorder %s8856_s1, %s9428_s29 }
 0x168   : > { %p8859_p8 = pnand %p8857_p6, %p9653_p7 }
 0x16a   : > { %p8860_p1 = pneg %p8859_p8 }
 0x16c   : > { %p8865_p9 = pnand %p8863_p3, %p8860_p1 }
 0x16e   : > { %8868 = shalt.err (!%p8865_p9)
}
 0x16f   : > { %s8869_s8 = scalar_lea.vmem %s1052_s16, 16  ;;  %s8876_s2 = scalar_lea.vmem %s1052_s16, 32 }
 0x170   : > { %p8870_p10 = scmp.ne.s32.totalorder %s1052_s16, %s8869_s8  ;;  %p8877_p13 = scmp.lt.s32.totalorder %s1052_s16, %s1052_s16 }
 0x171   : > { %p8878_p0 = scmp.lt.s32.totalorder %s8876_s2, %s8869_s8 }
 0x172   : > { %p8872_p11 = pnand %p8870_p10, %p9653_p7 }
 0x173   : > { %p8879_p2 = por %p8878_p0, %p8877_p13 }
 0x174   : > { %p8873_p12 = pneg %p8872_p11 }
 0x176   : > { %p8880_p4 = pnand %p8879_p2, %p8873_p12 }
 0x178   : > { %8883 = shalt.err (!%p8880_p4)
}
 0x179   : > { %8163 = dma.hbm_to_vmem [thread:$0]  (!%p9641_p5), %s9428_s29, 16, %s1052_s16, [#allocation5]  }
 0x17a   : > { %s8884_s26 = scalar_lea.hbm %s10733_s14, 16 }
 0x17b   : > { %p8885_p6 = scmp.ne.s32.totalorder %s10733_s14, %s8884_s26  ;;  %p8891_p3 = scmp.lt.u32.totalorder %s8884_s26, %s10733_s14 }
 0x17d   : > { %p8887_p8 = pnand %p8885_p6, %p9653_p7 }
 0x17f   : > { %p8888_p1 = pneg %p8887_p8 }
 0x181   : > { %p8893_p9 = pnand %p8891_p3, %p8888_p1 }
 0x183   : > { %8896 = shalt.err (!%p8893_p9)
}
 0x184   : > { %s8897_s23 = scalar_lea.vmem %s1077_s15, 16  ;;  %s8904_s21 = scalar_lea.vmem %s1077_s15, 32 }
 0x185   : > { %p8898_p10 = scmp.ne.s32.totalorder %s1077_s15, %s8897_s23  ;;  %p8905_p13 = scmp.lt.s32.totalorder %s1077_s15, %s1077_s15 }
 0x186   : > { %p8906_p0 = scmp.lt.s32.totalorder %s8904_s21, %s8897_s23 }
 0x187   : > { %p8900_p11 = pnand %p8898_p10, %p9653_p7 }
 0x188   : > { %p8907_p2 = por %p8906_p0, %p8905_p13 }
 0x189   : > { %p8901_p12 = pneg %p8900_p11 }
 0x18b   : > { %p8908_p4 = pnand %p8907_p2, %p8901_p12 }
 0x18d   : > { %8911 = shalt.err (!%p8908_p4)
}
 0x18e   : > { %8169 = dma.hbm_to_vmem [thread:$0]  (!%p9641_p5), %s10733_s14, 16, %s1077_s15, [#allocation8]  }
 0x18f   : > { %s9362_s16 = smov [#allocation12]   ;;  %s9363_s8 = smov [#allocation15]  }
 0x190   : > { %s1101_s1 = sshll.u32 %s9362_s16, 4  ;;  %s1129_s2 = sshll.u32 %s9363_s8, 4  ;;  %s1102_s1 = int_to_ptr.vmem [resolvable:$true] %s1101_s1  ;;  %s1130_s2 = int_to_ptr.vmem [resolvable:$true] %s1129_s2 }
 0x191   : > { %s8912_s26 = scalar_lea.hbm %s9458_s30, 16 }
 0x192   : > { %p8913_p6 = scmp.ne.s32.totalorder %s9458_s30, %s8912_s26  ;;  %p8919_p3 = scmp.lt.u32.totalorder %s8912_s26, %s9458_s30 }
 0x194   : > { %p8915_p8 = pnand %p8913_p6, %p9653_p7 }
 0x196   : > { %p8916_p1 = pneg %p8915_p8 }
 0x198   : > { %p8921_p9 = pnand %p8919_p3, %p8916_p1 }
 0x19a   : > { %8924 = shalt.err (!%p8921_p9)
}
 0x19b   : > { %s8925_s23 = scalar_lea.vmem %s1102_s1, 16  ;;  %s8932_s15 = scalar_lea.vmem %s1102_s1, 32 }
 0x19c   : > { %p8926_p10 = scmp.ne.s32.totalorder %s1102_s1, %s8925_s23  ;;  %p8933_p13 = scmp.lt.s32.totalorder %s1102_s1, %s1102_s1 }
 0x19d   : > { %p8934_p0 = scmp.lt.s32.totalorder %s8932_s15, %s8925_s23 }
 0x19e   : > { %p8928_p11 = pnand %p8926_p10, %p9653_p7 }
 0x19f   : > { %p8935_p2 = por %p8934_p0, %p8933_p13 }
 0x1a0   : > { %p8929_p12 = pneg %p8928_p11 }
 0x1a2   : > { %p8936_p4 = pnand %p8935_p2, %p8929_p12 }
 0x1a4   : > { %8939 = shalt.err (!%p8936_p4)
}
 0x1a5   : > { %s10745_s21 = sld [smem:[#allocation64_spill]] }
 0x1a6   : > { %8175 = dma.hbm_to_vmem [thread:$0]  (!%p9641_p5), %s9458_s30, 16, %s1102_s1, [#allocation11]  }
 0x1ab   : > { %s8940_s16 = scalar_lea.hbm %s10745_s21, 16 }
 0x1ac   : > { %p8941_p6 = scmp.ne.s32.totalorder %s10745_s21, %s8940_s16  ;;  %p8947_p3 = scmp.lt.u32.totalorder %s8940_s16, %s10745_s21 }
 0x1ae   : > { %p8943_p8 = pnand %p8941_p6, %p9653_p7 }
 0x1b0   : > { %p8944_p1 = pneg %p8943_p8 }
 0x1b2   : > { %p8949_p9 = pnand %p8947_p3, %p8944_p1 }
 0x1b4   : > { %8952 = shalt.err (!%p8949_p9)
}
 0x1b5   : > { %s8953_s8 = scalar_lea.vmem %s1130_s2, 16  ;;  %s8960_s26 = scalar_lea.vmem %s1130_s2, 32 }
 0x1b6   : > { %p8954_p10 = scmp.ne.s32.totalorder %s1130_s2, %s8953_s8  ;;  %p8961_p13 = scmp.lt.s32.totalorder %s1130_s2, %s1130_s2 }
 0x1b7   : > { %p8962_p0 = scmp.lt.s32.totalorder %s8960_s26, %s8953_s8 }
 0x1b8   : > { %p8956_p11 = pnand %p8954_p10, %p9653_p7 }
 0x1b9   : > { %p8963_p2 = por %p8962_p0, %p8961_p13 }
 0x1ba   : > { %p8957_p12 = pneg %p8956_p11 }
 0x1bc   : > { %p8964_p4 = pnand %p8963_p2, %p8957_p12 }
 0x1be   : > { %8967 = shalt.err (!%p8964_p4)
}
 0x1bf   : > { %s10746_s1 = sld [smem:[#allocation68_spill]]  ;;  %s9364_s23 = smov [#allocation18]  }
 0x1c0   : > { %8181 = dma.hbm_to_vmem [thread:$0]  (!%p9641_p5), %s10745_s21, 16, %s1130_s2, [#allocation14]  }
 0x1c1   : > { %s1157_s15 = sshll.u32 %s9364_s23, 4  ;;  %s9365_s16 = smov [#allocation21]   ;;  %s1158_s15 = int_to_ptr.vmem [resolvable:$true] %s1157_s15 }
 0x1c2   : > { %s1185_s3 = sshll.u32 %s9365_s16, 4  ;;  %s1186_s3 = int_to_ptr.vmem [resolvable:$true] %s1185_s3 }
 0x1c5   : > { %s8968_s4 = scalar_lea.hbm %s10746_s1, 16 }
 0x1c6   : > { %p8969_p6 = scmp.ne.s32.totalorder %s10746_s1, %s8968_s4  ;;  %p8975_p3 = scmp.lt.u32.totalorder %s8968_s4, %s10746_s1 }
 0x1c8   : > { %p8971_p8 = pnand %p8969_p6, %p9653_p7 }
 0x1ca   : > { %p8972_p1 = pneg %p8971_p8 }
 0x1cc   : > { %p8977_p9 = pnand %p8975_p3, %p8972_p1 }
 0x1ce   : > { %8980 = shalt.err (!%p8977_p9)
}
 0x1cf   : > { %s8981_s8 = scalar_lea.vmem %s1158_s15, 16  ;;  %s8988_s2 = scalar_lea.vmem %s1158_s15, 32 }
 0x1d0   : > { %p8982_p10 = scmp.ne.s32.totalorder %s1158_s15, %s8981_s8  ;;  %p8989_p13 = scmp.lt.s32.totalorder %s1158_s15, %s1158_s15 }
 0x1d1   : > { %p8990_p0 = scmp.lt.s32.totalorder %s8988_s2, %s8981_s8 }
 0x1d2   : > { %p8984_p11 = pnand %p8982_p10, %p9653_p7 }
 0x1d3   : > { %p8991_p2 = por %p8990_p0, %p8989_p13 }
 0x1d4   : > { %p8985_p12 = pneg %p8984_p11 }
 0x1d6   : > { %p8992_p4 = pnand %p8991_p2, %p8985_p12 }
 0x1d8   : > { %8995 = shalt.err (!%p8992_p4)
}
 0x1d9   : > { %s10747_s26 = sld [smem:[#allocation72_spill]] }
 0x1da   : > { %8187 = dma.hbm_to_vmem [thread:$0]  (!%p9641_p5), %s10746_s1, 16, %s1158_s15, [#allocation17]  }
 0x1df   : > { %s8996_s4 = scalar_lea.hbm %s10747_s26, 16 }
 0x1e0   : > { %p8997_p6 = scmp.ne.s32.totalorder %s10747_s26, %s8996_s4  ;;  %p9003_p3 = scmp.lt.u32.totalorder %s8996_s4, %s10747_s26 }
 0x1e2   : > { %p8999_p8 = pnand %p8997_p6, %p9653_p7 }
 0x1e4   : > { %p9000_p1 = pneg %p8999_p8 }
 0x1e6   : > { %p9005_p9 = pnand %p9003_p3, %p9000_p1 }
 0x1e8   : > { %9008 = shalt.err (!%p9005_p9)
}
 0x1e9   : > { %s9009_s23 = scalar_lea.vmem %s1186_s3, 16  ;;  %s9016_s16 = scalar_lea.vmem %s1186_s3, 32 }
 0x1ea   : > { %p9010_p10 = scmp.ne.s32.totalorder %s1186_s3, %s9009_s23  ;;  %p9017_p13 = scmp.lt.s32.totalorder %s1186_s3, %s1186_s3 }
 0x1eb   : > { %p9018_p0 = scmp.lt.s32.totalorder %s9016_s16, %s9009_s23 }
 0x1ec   : > { %p9012_p11 = pnand %p9010_p10, %p9653_p7 }
 0x1ed   : > { %p9019_p2 = por %p9018_p0, %p9017_p13 }
 0x1ee   : > { %p9013_p12 = pneg %p9012_p11 }
 0x1f0   : > { %p9020_p4 = pnand %p9019_p2, %p9013_p12 }
 0x1f2   : > { %9023 = shalt.err (!%p9020_p4)
}
 0x1f3   : > { %s10748_s15 = sld [smem:[#allocation73_spill]]  ;;  %s9366_s8 = smov [#allocation24]  }
 0x1f4   : > { %8193 = dma.hbm_to_vmem [thread:$0]  (!%p9641_p5), %s10747_s26, 16, %s1186_s3, [#allocation20]  }
 0x1f5   : > { %s1207_s2 = sshll.u32 %s9366_s8, 4  ;;  %s9367_s4 = smov [#allocation27]   ;;  %s1208_s2 = int_to_ptr.vmem [resolvable:$true] %s1207_s2 }
 0x1f6   : > { %s1237_s1 = sshll.u32 %s9367_s4, 4  ;;  %s1238_s1 = int_to_ptr.vmem [resolvable:$true] %s1237_s1 }
 0x1f9   : > { %s9024_s5 = scalar_lea.hbm %s10748_s15, 16 }
 0x1fa   : > { %p9025_p6 = scmp.ne.s32.totalorder %s10748_s15, %s9024_s5  ;;  %p9031_p3 = scmp.lt.u32.totalorder %s9024_s5, %s10748_s15 }
 0x1fc   : > { %p9027_p8 = pnand %p9025_p6, %p9653_p7 }
 0x1fe   : > { %p9028_p1 = pneg %p9027_p8 }
 0x200   : > { %p9033_p9 = pnand %p9031_p3, %p9028_p1 }
 0x202   : > { %9036 = shalt.err (!%p9033_p9)
}
 0x203   : > { %s9037_s23 = scalar_lea.vmem %s1208_s2, 16  ;;  %s9044_s3 = scalar_lea.vmem %s1208_s2, 32 }
 0x204   : > { %p9038_p10 = scmp.ne.s32.totalorder %s1208_s2, %s9037_s23  ;;  %p9045_p13 = scmp.lt.s32.totalorder %s1208_s2, %s1208_s2 }
 0x205   : > { %p9046_p0 = scmp.lt.s32.totalorder %s9044_s3, %s9037_s23 }
 0x206   : > { %p9040_p11 = pnand %p9038_p10, %p9653_p7 }
 0x207   : > { %p9047_p2 = por %p9046_p0, %p9045_p13 }
 0x208   : > { %p9041_p12 = pneg %p9040_p11 }
 0x20a   : > { %p9048_p4 = pnand %p9047_p2, %p9041_p12 }
 0x20c   : > { %9051 = shalt.err (!%p9048_p4)
}
 0x20d   : > { %s10749_s16 = sld [smem:[#allocation78_spill]] }
 0x20e   : > { %8199 = dma.hbm_to_vmem [thread:$0]  (!%p9641_p5), %s10748_s15, 16, %s1208_s2, [#allocation23]  }
 0x213   : > { %s9052_s5 = scalar_lea.hbm %s10749_s16, 512 }
 0x214   : > { %p9053_p6 = scmp.ne.s32.totalorder %s10749_s16, %s9052_s5  ;;  %p9059_p3 = scmp.lt.u32.totalorder %s9052_s5, %s10749_s16 }
 0x216   : > { %p9055_p8 = pnand %p9053_p6, %p9653_p7 }
 0x218   : > { %p9056_p1 = pneg %p9055_p8 }
 0x21a   : > { %p9061_p9 = pnand %p9059_p3, %p9056_p1 }
 0x21c   : > { %9064 = shalt.err (!%p9061_p9)
}
 0x21d   : > { %s9065_s8 = scalar_lea.vmem %s1238_s1, 512  ;;  %p9073_p13 = scmp.lt.s32.totalorder %s1238_s1, %s1238_s1 }
 0x21e   : > { %p9066_p10 = scmp.ne.s32.totalorder %s1238_s1, %s9065_s8  ;;  %p9074_p0 = scmp.lt.s32.totalorder %s9065_s8, %s9065_s8 }
 0x220   : > { %p9068_p11 = pnand %p9066_p10, %p9653_p7  ;;  %p9075_p2 = por %p9074_p0, %p9073_p13 }
 0x222   : > { %p9069_p12 = pneg %p9068_p11 }
 0x224   : > { %p9076_p4 = pnand %p9075_p2, %p9069_p12 }
 0x226   : > { %9079 = shalt.err (!%p9076_p4)
}
 0x227   : > { %s10750_s2 = smov 8   ;;  %s10751_s4 = smov 128  }
 0x228   : > { %s10752_s23 = sld [smem:[#allocation80_spill]]  ;;  %s9368_s3 = smov [#allocation30]  }
 0x229   : > { %8205 = dma.hbm_to_vmem [thread:$0]  (!%p9641_p5), %s10749_s16, 512, %s1238_s1, [#allocation26], %s10751_s4, %s10751_s4, %s10750_s2  }
 0x22a   : > { %s1261_s5 = sshll.u32 %s9368_s3, 4  ;;  %s9369_s6 = smov [#allocation33]   ;;  %s1262_s5 = int_to_ptr.vmem [resolvable:$true] %s1261_s5 }
 0x22b   : > { %s1285_s9 = sshll.u32 %s9369_s6, 4  ;;  %s1286_s9 = int_to_ptr.vmem [resolvable:$true] %s1285_s9 }
 0x22e   : > { %s9080_s8 = scalar_lea.hbm %s10752_s23, 512 }
 0x22f   : > { %p9081_p6 = scmp.ne.s32.totalorder %s10752_s23, %s9080_s8  ;;  %p9087_p3 = scmp.lt.u32.totalorder %s9080_s8, %s10752_s23 }
 0x231   : > { %p9083_p8 = pnand %p9081_p6, %p9653_p7 }
 0x233   : > { %p9084_p1 = pneg %p9083_p8 }
 0x235   : > { %p9089_p9 = pnand %p9087_p3, %p9084_p1 }
 0x237   : > { %9092 = shalt.err (!%p9089_p9)
}
 0x238   : > { %s9093_s12 = scalar_lea.vmem %s1262_s5, 512  ;;  %p9101_p13 = scmp.lt.s32.totalorder %s1262_s5, %s1262_s5 }
 0x239   : > { %p9094_p10 = scmp.ne.s32.totalorder %s1262_s5, %s9093_s12  ;;  %p9102_p0 = scmp.lt.s32.totalorder %s9093_s12, %s9093_s12 }
 0x23b   : > { %p9096_p11 = pnand %p9094_p10, %p9653_p7  ;;  %p9103_p2 = por %p9102_p0, %p9101_p13 }
 0x23d   : > { %p9097_p12 = pneg %p9096_p11 }
 0x23f   : > { %p9104_p4 = pnand %p9103_p2, %p9097_p12 }
 0x241   : > { %9107 = shalt.err (!%p9104_p4)
}
 0x242   : > { %s10753_s6 = sld [smem:[#allocation82_spill]] }
 0x243   : > { %8211 = dma.hbm_to_vmem [thread:$0]  (!%p9641_p5), %s10752_s23, 512, %s1262_s5, [#allocation29], %s10751_s4, %s10751_s4, %s10750_s2  }
 0x248   : > { %s9108_s1 = scalar_lea.hbm %s10753_s6, 512 }
 0x249   : > { %p9109_p6 = scmp.ne.s32.totalorder %s10753_s6, %s9108_s1  ;;  %p9115_p3 = scmp.lt.u32.totalorder %s9108_s1, %s10753_s6 }
 0x24b   : > { %p9111_p8 = pnand %p9109_p6, %p9653_p7 }
 0x24d   : > { %p9112_p1 = pneg %p9111_p8 }
 0x24f   : > { %p9117_p9 = pnand %p9115_p3, %p9112_p1 }
 0x251   : > { %9120 = shalt.err (!%p9117_p9)
}
 0x252   : > { %s9121_s12 = scalar_lea.vmem %s1286_s9, 512  ;;  %p9129_p13 = scmp.lt.s32.totalorder %s1286_s9, %s1286_s9 }
 0x253   : > { %p9122_p10 = scmp.ne.s32.totalorder %s1286_s9, %s9121_s12  ;;  %p9130_p0 = scmp.lt.s32.totalorder %s9121_s12, %s9121_s12 }
 0x255   : > { %p9124_p11 = pnand %p9122_p10, %p9653_p7  ;;  %p9131_p2 = por %p9130_p0, %p9129_p13 }
 0x257   : > { %p9125_p12 = pneg %p9124_p11 }
 0x259   : > { %p9132_p4 = pnand %p9131_p2, %p9125_p12 }
 0x25b   : > { %9135 = shalt.err (!%p9132_p4)
}
 0x25c   : > { %8217 = dma.hbm_to_vmem [thread:$0]  (!%p9641_p5), %s10753_s6, 512, %s1286_s9, [#allocation32], %s10751_s4, %s10751_s4, %s10750_s2  }
 0x25d   : > { %s9370_s3 = smov [#allocation36]   ;;  %s9371_s8 = smov [#allocation37]  }
 0x25e   : > { %s1313_s5 = sshll.u32 %s9370_s3, 4  ;;  %s1327_s1 = sshll.u32 %s9371_s8, 4  ;;  %s1314_s5 = int_to_ptr.vmem [resolvable:$true] %s1313_s5  ;;  %s1328_s1 = int_to_ptr.vmem [resolvable:$true] %s1327_s1 }
 0x25f   : > { %s9136_s12 = scalar_lea.hbm %s9588_s17, 16 }
 0x260   : > { %p9137_p6 = scmp.ne.s32.totalorder %s9588_s17, %s9136_s12  ;;  %p9143_p3 = scmp.lt.u32.totalorder %s9136_s12, %s9588_s17 }
 0x262   : > { %p9139_p8 = pnand %p9137_p6, %p9653_p7 }
 0x264   : > { %p9140_p1 = pneg %p9139_p8 }
 0x266   : > { %p9145_p9 = pnand %p9143_p3, %p9140_p1 }
 0x268   : > { %9148 = shalt.err (!%p9145_p9)
}
 0x269   : > { %s9149_s13 = scalar_lea.vmem %s1314_s5, 16  ;;  %s9156_s9 = scalar_lea.vmem %s1314_s5, 32 }
 0x26a   : > { %p9150_p10 = scmp.ne.s32.totalorder %s1314_s5, %s9149_s13  ;;  %p9157_p13 = scmp.lt.s32.totalorder %s1314_s5, %s1314_s5 }
 0x26b   : > { %p9158_p0 = scmp.lt.s32.totalorder %s9156_s9, %s9149_s13 }
 0x26c   : > { %p9152_p11 = pnand %p9150_p10, %p9653_p7 }
 0x26d   : > { %p9159_p2 = por %p9158_p0, %p9157_p13 }
 0x26e   : > { %p9153_p12 = pneg %p9152_p11 }
 0x270   : > { %p9160_p4 = pnand %p9159_p2, %p9153_p12 }
 0x272   : > { %9163 = shalt.err (!%p9160_p4)
}
 0x273   : > { %8223 = dma.hbm_to_vmem [thread:$0]  (!%p9641_p5), %s9588_s17, 16, %s1314_s5, [#allocation35]  }
 0x274   : > { %s9164_s2 = scalar_lea.hbm %s9598_s27, 16 }
 0x275   : > { %p9165_p6 = scmp.ne.s32.totalorder %s9598_s27, %s9164_s2  ;;  %p9171_p3 = scmp.lt.u32.totalorder %s9164_s2, %s9598_s27 }
 0x277   : > { %p9167_p8 = pnand %p9165_p6, %p9653_p7 }
 0x279   : > { %p9168_p1 = pneg %p9167_p8 }
 0x27b   : > { %p9173_p9 = pnand %p9171_p3, %p9168_p1 }
 0x27d   : > { %9176 = shalt.err (!%p9173_p9)
}
 0x27e   : > { %s9177_s13 = scalar_lea.vmem %s1328_s1, 16  ;;  %s9184_s4 = scalar_lea.vmem %s1328_s1, 32 }
 0x27f   : > { %p9178_p10 = scmp.ne.s32.totalorder %s1328_s1, %s9177_s13  ;;  %p9185_p13 = scmp.lt.s32.totalorder %s1328_s1, %s1328_s1 }
 0x280   : > { %p9186_p0 = scmp.lt.s32.totalorder %s9184_s4, %s9177_s13 }
 0x281   : > { %p9180_p11 = pnand %p9178_p10, %p9653_p7 }
 0x282   : > { %p9187_p2 = por %p9186_p0, %p9185_p13 }
 0x283   : > { %p9181_p12 = pneg %p9180_p11 }
 0x285   : > { %p9188_p4 = pnand %p9187_p2, %p9181_p12 }
 0x287   : > { %9191 = shalt.err (!%p9188_p4)
}
 0x288   : > { %s10754_s24 = sld [smem:[#allocation52_spill]]  ;;  %s9914_s3 = sadd.s32 1, %s9304_s11  }
 0x289   : > { %8226 = dma.hbm_to_vmem [thread:$0]  (!%p9641_p5), %s9598_s27, 16, %s1328_s1, [#allocation38]  }
 0x28a   : > { %s112_s28 = ssub.s32 %s9304_s11, %s9914_s3  ;;  %s115_s5 = sadd.s32 1, %s9300_s0 }
 0x28b   : > { %p113_p7 = scmp.eq.s32.totalorder %s112_s28, 0  ;;  %p122_p6 = scmp.ne.s32.totalorder %s9300_s0, %s9296_s10 }
 0x28c   : > { %p123_p8 = scmp.eq.s32.totalorder %s9304_s11, 0  ;;  %p128_p1 = scmp.ne.s32.totalorder %s9296_s10, %s9292_s7 }
 0x28d   : > { %s9925_s8 = scalar_select %p113_p7, %s9300_s0, %s115_s5  }
 0x28e   : > { %p124_p3 = por %p123_p8, %p122_p6  ;;  %p10755_p9 = scmp.eq.s32.totalorder %s9626_s18, 0 }
 0x28f   : > { %p8254_p11 = scmp.lt.s32.totalorder %s9304_s11, 2  ;;  %s1338_s1 = sand.u32 1, %s9300_s0  }
 0x290   : > { %p9929_p10 = por %p10755_p9, %p128_p1  ;;  %s7183_s9 = sshll.u32 %s1338_s1, 3 }
 0x291   : > { %s7184_s2 = sshll.u32 %s9304_s11, 7  ;;  %s1342_s7 = scalar_lea.vmem [#allocation2], %s7183_s9 }
 0x292   : > { %s10756_s12 = scalar_select %p9929_p10, 1, 0 }
 0x293   : > { %s9937_s13 = scalar_lea.hbm %s10754_s24, %s7184_s2  ;;  %s1349_s4 = sshll.u32 %s1342_s7, 4  ;;  %s9939_s4 = int_to_ptr.vmem [resolvable:$true] %s1349_s4 }
 0x294   : > { %p9941_p5 = pnand %p8254_p11, %p124_p3  ;;  %s1339_s5 = scalar_lea.sflag [#allocation3], %s1338_s1 }
 0x295   : > { %s9192_s6 = scalar_lea.hbm %s9937_s13, 128  ;;  %s9197_s11 = scalar_lea.hbm %s10754_s24, 256 }
 0x296   : > { %p9193_p12 = scmp.ne.s32.totalorder %s9937_s13, %s9192_s6  ;;  %p9194_p13 = pneg %p9941_p5 }
 0x297   : > { %p9198_p4 = scmp.lt.u32.totalorder %s9937_s13, %s10754_s24  ;;  %p9199_p7 = scmp.lt.u32.totalorder %s9197_s11, %s9192_s6 }
 0x298   : > { %p9195_p0 = pnand %p9194_p13, %p9193_p12  ;;  %p9201_p8 = scmp.lt.u32.totalorder %s9192_s6, %s9937_s13 }
 0x299   : > { %p9200_p6 = por %p9199_p7, %p9198_p4 }
 0x29a   : > { %p9196_p2 = pneg %p9195_p0 }
 0x29b   : > { %p9202_p1 = por %p9201_p8, %p9200_p6 }
 0x29d   : > { %p9203_p3 = pnand %p9202_p1, %p9196_p2 }
 0x29f   : > { %9206 = shalt.err (!%p9203_p3)
}
 0x2a0   : > { %s9207_s1 = scalar_lea.vmem %s9939_s4, 128  ;;  %s9372_s9 = smov [#allocation2]  }
 0x2a1   : > { %p9208_p9 = scmp.ne.s32.totalorder %s9939_s4, %s9207_s1  ;;  %s9212_s2 = sshll.u32 %s9372_s9, 4  ;;  %s9213_s2 = int_to_ptr.vmem [resolvable:$false] %s9212_s2 }
 0x2a2   : > { %s9214_s7 = scalar_lea.vmem %s9213_s2, 256  ;;  %p9215_p12 = scmp.lt.s32.totalorder %s9939_s4, %s9213_s2 }
 0x2a3   : > { %p9210_p11 = pnand %p9208_p9, %p9194_p13  ;;  %p9216_p0 = scmp.lt.s32.totalorder %s9214_s7, %s9207_s1 }
 0x2a5   : > { %p9211_p10 = pneg %p9210_p11  ;;  %p9217_p4 = por %p9216_p0, %p9215_p12 }
 0x2a7   : > { %p9218_p7 = pnand %p9217_p4, %p9211_p10 }
 0x2a9   : > { %9221 = shalt.err (!%p9218_p7)
}
 0x2aa   : > { %8230 = dma.hbm_to_vmem [thread:$0]  (!%p9941_p5), %s9937_s13, 128, %s9939_s4, %s1339_s5  }
 0x2ab   : > { %p10758_p2 = scmp.ne.s32.totalorder %s10742_s22, 0 }
 0x2ac   : > { %s1389_s6 = sand.u32 (!%p10758_p2), 1, %s9296_s10   ;;  %p10759_p13 = scmp.ne.s32.totalorder (!%p10758_p2), %s10756_s12, 0 }
 0x2ad   : > { %1387 = sbr.rel (%p10758_p2) target bundleno = 14767 (0x39af), region = 184  ;;  %s9969_s11 = sshll.u32 (!%p10758_p2), %s1389_s6, 3 }
 0x2ae   : > { %s1390_s9 = scalar_lea.sflag (!%p10758_p2), [#allocation3], %s1389_s6  ;;  %s1393_s2 = scalar_lea.vmem (!%p10758_p2), [#allocation2], %s9969_s11 }
 0x2b4   : > { %9239 = dma.done.wait (%p10759_p13), %s1390_s9, 128  }
 0x2b5   : > { %9241 = vsyncadd (%p10759_p13), %s1390_s9, 4294967168  ;;  %p10760_p10 = scmp.eq.s32.totalorder %s9626_s18, 0 }
 0x2b7   : > { %9243 = dma.done.wait (%p10760_p10), [#allocation5], 272   ;;  %p10761_p5 = pmov %p10760_p10 }
 0x2b9   : > { %9245 = vsyncadd (%p10761_p5), [#allocation5], 4294967024  ;;  %p10762_p6 = pmov %p10761_p5 }
 0x2ba   : > { %p10763_p8 = pmov %p10761_p5 }
 0x2bb   : > { %9247 = dma.done.wait (%p10762_p6), [#allocation8], 48  }
 0x2bc   : > { %9249 = vsyncadd (%p10763_p8), [#allocation8], 4294967248  ;;  %p10764_p1 = pmov %p10761_p5 }
 0x2be   : > { %9251 = dma.done.wait (%p10764_p1), [#allocation11], 32   ;;  %p10765_p3 = pmov %p10764_p1 }
 0x2bf   : > { %p10766_p9 = pmov %p10764_p1 }
 0x2c0   : > { %9253 = vsyncadd (%p10765_p3), [#allocation11], 4294967264 }
 0x2c1   : > { %9255 = dma.done.wait (%p10766_p9), [#allocation14], 32   ;;  %p10767_p11 = pmov %p10764_p1 }
 0x2c2   : > { %p10768_p12 = pmov %p10764_p1 }
 0x2c3   : > { %9257 = vsyncadd (%p10767_p11), [#allocation14], 4294967264 }
 0x2c4   : > { %9259 = dma.done.wait (%p10768_p12), [#allocation17], 32   ;;  %p10769_p0 = pmov %p10764_p1 }
 0x2c6   : > { %9261 = vsyncadd (%p10769_p0), [#allocation17], 4294967264  ;;  %p10770_p4 = pmov %p10769_p0 }
 0x2c7   : > { %p10771_p7 = pmov %p10769_p0 }
 0x2c8   : > { %9263 = dma.done.wait (%p10770_p4), [#allocation20], 32  }
 0x2c9   : > { %9265 = vsyncadd (%p10771_p7), [#allocation20], 4294967264  ;;  %p10772_p2 = pmov %p10769_p0 }
 0x2ca   : > { %p10773_p13 = pmov %p10769_p0 }
 0x2cb   : > { %9267 = dma.done.wait (%p10772_p2), [#allocation23], 32  }
 0x2cc   : > { %9269 = vsyncadd (%p10773_p13), [#allocation23], 4294967264  ;;  %p10774_p10 = pmov %p10769_p0 }
 0x2cd   : > { %p10775_p5 = pmov %p10769_p0 }
 0x2ce   : > { %9271 = dma.done.wait (%p10774_p10), [#allocation26], 528  }
 0x2cf   : > { %9273 = vsyncadd (%p10775_p5), [#allocation26], 4294966768  ;;  %p10776_p6 = pmov %p10769_p0 }
 0x2d0   : > { %p10777_p8 = pmov %p10769_p0 }
 0x2d1   : > { %9275 = dma.done.wait (%p10776_p6), [#allocation29], 528  }
 0x2d2   : > { %9277 = vsyncadd (%p10777_p8), [#allocation29], 4294966768  ;;  %p10778_p1 = pmov %p10769_p0 }
 0x2d3   : > { %p10779_p3 = pmov %p10769_p0 }
 0x2d4   : > { %9279 = dma.done.wait (%p10778_p1), [#allocation32], 528  }
 0x2d5   : > { %9281 = vsyncadd (%p10779_p3), [#allocation32], 4294966768  ;;  %p10780_p9 = pmov %p10769_p0 }
 0x2d6   : > { %p10781_p11 = pmov %p10769_p0 }
 0x2d7   : > { %9283 = dma.done.wait (%p10780_p9), [#allocation35], 32  }
 0x2d8   : > { %9285 = vsyncadd (%p10781_p11), [#allocation35], 4294967264  ;;  %p10782_p12 = pmov %p10769_p0 }
 0x2da   : > { %9287 = dma.done.wait (%p10782_p12), [#allocation38], 16  }
 0x2db   : > { %9289 = vsyncadd (%p10769_p0), [#allocation38], 4294967280  ;;  %s10783_s22 = sld [smem:[#allocation60_spill]]  ;;  %v9373_v0 = vmov 0.0|0.0   ;;  %vm9374_vm0 = vmmov 0   ;;  %v9375_v1 = vmov 0.0  }
 0x2dc   : > { %7912 = vmatprep.subr.bf16.mxu0 %v9373_v0  ;;  %7511 = vmatprep.mubr.msk.f32.mxu0 %vm9374_vm0, %v9375_v1  ;;  %v1626_v2 = vld [vmem:[#allocation4] sm:$0xff]  ;;  %v1627_v3 = vld [vmem:[#allocation4 + $0x8] sm:$0xff]  ;;  %v1625_v8 = vld [vmem:[%s1393_s2] sm:$0xff]  ;;  %vm1635_vm1 = vcmask 130048   ;;  %vm1722_vm2 = vcmask 261120   ;;  %s10684_s12 = smov 120  }
 0x2dd   : > { %7915 = vmatprep.subr.bf16.mxu1 %v9373_v0  ;;  %7522 = vmatprep.mubr.msk.f32.mxu1 %vm9374_vm0, %v9375_v1  ;;  %v7913_v4 = vpack.c.bf16 %v1627_v3, %v1626_v2  ;;  %v7216_v12 = vld [vmem:[#allocation6] ss:$0 sm:$0xff]  ;;  %v7218_v16 = vld [vmem:[#allocation12] ss:$0 sm:$0xff]  ;;  %s10686_s13 = smov 96   ;;  %s10688_s4 = smov 88  }
 0x2de   : > { %s10784_s28 = sld [smem:[#allocation54_spill]]  ;;  %vm1803_vm3 = vcmask 64512   ;;  %p1600_p4 = scmp.lt.s32.totalorder %s9626_s18, 1  ;;  %vm3050_vm5 = vcmask 97280   ;;  %vm3070_vm6 = vcmask 1043456   ;;  %vm9387_vm7 = vmmov 1  }
 0x2df   : > { %7914 = vmatpush3.bf16.msra.mxu0 %v7913_v4  ;;  %s10785_s7 = sld [smem:[#allocation61_spill]]  ;;  %s10672_s11 = smov 56   ;;  %vm10191_vm4 = vmpackc.low %vm1803_vm3, %vm1803_vm3  ;;  %vm4080_vm9 = vcmask 523264   ;;  %vm6632_vm12 = vcmask 7168  }
 0x2e0   : > { %7525 = vmatprep.subr.mxu0 %v9375_v1  ;;  %s10823_s18 = smov (!%p1600_p4, %s9626_s18), 1  ;;  %s10673_s9 = smov 64   ;;  %vm10218_vm8 = vmpackc.low %vm3070_vm6, %vm9387_vm7 }
 0x2e1   : > { %v1711_v5 = vld [vmem:[%s10783_s22] sm:$0xff]  ;;  %v1712_v6 = vld [vmem:[%s10783_s22 + $0x8] sm:$0xff]  ;;  %v1713_v9 = vld [vmem:[%s10783_s22 + $0x10] sm:$0xff]  ;;  %s10071_s5 = sshll.u32 %s10823_s18, 3  ;;  %s10678_s2 = smov 80  }
 0x2e2   : > { %v7916_v7 = vpack.c.bf16 %v1712_v6, %v1711_v5  ;;  %7512 = vmatmul.mubr.msk.f32.vlgmr.msra.gmra.mrb[0].mxu0 %vm1635_vm1, %v1625_v8  ;;  %v1714_v10 = vld [vmem:[%s10783_s22 + $0x18] sm:$0xff]  ;;  %s10812_s14 = sld [smem:[#allocation77_spill]] }
 0x2e3   : > { %7527 = vmatprep.mubr.msk.f32.mxu0 %vm9374_vm0, %v9375_v1  ;;  %v7919_v11 = vpack.c.bf16 %v1714_v10, %v1713_v9 }
 0x2e4   : > { %7917 = vmatpush3.bf16.msra.mxu1 %v7916_v7  ;;  %s10075_s1 = scalar_lea.vmem %s10784_s28, %s10071_s5  ;;  %s10682_s28 = smov 112  }
 0x2e5   : > { %7918 = vmatprep.subr.bf16.mxu1 %v9373_v0  ;;  %v10078_v23 = vld [vmem:[%s10075_s1] sm:$0xff]  ;;  %s10786_s6 = smov %s10785_s7  ;;  %v1797_v42 = vld [vmem:[%s10785_s7 + $0x8] sm:$0xff]  ;;  %s10676_s7 = smov 72  }
 0x2e6   : > { %v1796_v51 = vld [vmem:[%s10786_s6] sm:$0xff] }
 0x2e8   : > { %7920 = vmatpush3.bf16.msra.mxu1 %v7919_v11 }
 0x2e9   : > { %7535 = vmatprep.subr.mxu1 %v9375_v1 }
 0x3b5   : > { %v1705_v13 = vpop.f32.mrb[0].mxu0 }
 0x3b6   : > { %v10041_v14 = vadd.f32 %v7216_v12, %v1705_v13  ;;  %v7513_v15 = vpop.f32.mrb[1].mxu0 }
 0x3b8   : > { %7523 = vmatmul.mubr.msk.f32.vlgmr.msra.gmra.mrb[0].mxu1 %vm1722_vm2, %v10041_v14 }
 0x3b9   : > { %7537 = vmatprep.mubr.msk.f32.mxu1 %vm9374_vm0, %v9375_v1 }
 0x48b   : > { %v1792_v17 = vpop.f32.mrb[0].mxu1 }
 0x48c   : > { %v10047_v18 = vadd.f32 %v7218_v16, %v1792_v17  ;;  %v7524_v19 = vpop.f32.mrb[1].mxu1  ;;  %v1798_v17 = vld [vmem:[%s10786_s6 + $0x10] sm:$0xff] }
 0x48e   : > { %1965 = vrot.lane.b32.xlu1 %v10047_v18, %s10684_s12  ;;  %1801 = vrot.lane.b32.xlu0 %v10047_v18, %s10686_s13 }
 0x492   : > { %1967 = vrot.lane.b32.xlu0 %v10047_v18, %s10688_s4 }
 0x500   : > { %v1802_v20 = vpop.permute.xlu0 %1801  ;;  %v1966_v22 = vpop.permute.xlu1 %1965 }
 0x501   : > { %7526 = vmatpush3.xpose.msk.msra.mxu0 %vm1803_vm3, %v1802_v20 }
 0x502   : > { %7530 = vmatprep.subr.mxu0 %v9375_v1 }
 0x504   : > { %7528 = vmatmul.mubr.msk.f32.vlgmr.msra.gmra.mrb[2].mxu0 %vm1803_vm3, %v10047_v18  ;;  %v1968_v21 = vpop.permute.xlu0 %1967 }
 0x505   : > { %7536 = vmatpush3.xpose.msk.msra.mxu1 %vm1803_vm3, %v1968_v21  ;;  %7532 = vmatprep.mubr.msk.f32.mxu0 %vm9374_vm0, %v9375_v1 }
 0x506   : > { %7545 = vmatprep.subr.mxu1 %v9375_v1 }
 0x508   : > { %7538 = vmatmul.mubr.msk.f32.vlgmr.msra.gmra.mrb[2].mxu1 %vm1803_vm3, %v1966_v22 }
 0x509   : > { %7547 = vmatprep.mubr.msk.f32.mxu1 %vm9374_vm0, %v9375_v1  ;;  %7546 = vmatpush3.msra.mxu1 %v1797_v42 }
 0x50a   : > { %7555 = vmatprep.subr.mxu1 %v9375_v1 }
 0x5d7   : > { %v1874_v24 = vpop.f32.mrb[2].mxu0 }
 0x5d8   : > { %v1875_v25 = vadd.f32 %v1874_v24, %v10078_v23  ;;  %v7529_v26 = vpop.f32.mrb[3].mxu0 }
 0x5da   : > { %v1878_v27 = vsel %vm1803_vm3, %v1875_v25, -inf }
 0x5db   : > { %v2039_v28 = vpop.f32.mrb[2].mxu1  ;;  %1879 = vmax.xlane.f32.xlu1 %v1878_v27 }
 0x5dc   : > { %v2040_v29 = vadd.f32 %v2039_v28, %v10078_v23  ;;  %v7539_v30 = vpop.f32.mrb[3].mxu1 }
 0x5de   : > { %v2043_v31 = vsel %vm1803_vm3, %v2040_v29, -inf }
 0x5df   : > { %2044 = vmax.xlane.f32.xlu0 %v2043_v31  ;;  %v1799_v31 = vld [vmem:[%s10786_s6 + $0x18] sm:$0xff]  ;;  %s10802_s6 = sld [smem:[#allocation71_spill]] }
 0x668   : > { %v1880_v32 = vpop.xlane.xlu1 %1879 }
 0x669   : > { %v1881_v33 = vsub.f32 %v1875_v25, %v1880_v32 }
 0x66b   : > { %v1882_v34 = vmul.f32 1.442695, %v1881_v33 }
 0x66c   : > { %v2045_v35 = vpop.xlane.xlu0 %2044 }
 0x66d   : > { %8464 = vpow2.f32 %v1882_v34  ;;  %v2046_v36 = vsub.f32 %v2040_v29, %v2045_v35 }
 0x66f   : > { %v2047_v37 = vmul.f32 1.442695, %v2046_v36 }
 0x671   : > { %8466 = vpow2.f32 %v2047_v37 }
 0x677   : > { %v8465_v38 = vpop.eup %8464 }
 0x678   : > { %v1884_v39 = vsel %vm1803_vm3, %v8465_v38, 0.0 }
 0x679   : > { %1885 = vadd.xlane.f32.xlu0 %v1884_v39 }
 0x67b   : > { %v8467_v40 = vpop.eup %8466 }
 0x67c   : > { %v2049_v41 = vsel %vm1803_vm3, %v8467_v40, 0.0 }
 0x67d   : > { %2050 = vadd.xlane.f32.xlu1 %v2049_v41 }
 0x68e   : > { %2054 = vrot.lane.b32.xlu1 %v10047_v18, %s10672_s11  ;;  %s10680_s11 = smov 104  }
 0x68f   : > { %1889 = vrot.lane.b32.xlu0 %v10047_v18, %s10673_s9  ;;  %s10674_s9 = smov 48  }
 0x692   : > { %2278 = vrot.lane.b32.xlu1 %v10047_v18, %s10678_s2  ;;  %s10789_s2 = sld [smem:[#allocation63_spill]] }
 0x693   : > { %2276 = vrot.lane.b32.xlu0 %v10047_v18, %s10682_s28 }
 0x706   : > { %v1886_v43 = vpop.xlane.xlu0 %1885 }
 0x707   : > { %8468 = vrcp.f32 %v1886_v43 }
 0x70a   : > { %v1890_v44 = vpop.permute.xlu0 %1889  ;;  %v2051_v45 = vpop.xlane.xlu1 %2050 }
 0x70b   : > { %8470 = vrcp.f32 %v2051_v45  ;;  %7531 = vmatpush3.msra.mxu0 %v1890_v44 }
 0x70c   : > { %7540 = vmatprep.subr.mxu0 %v9375_v1 }
 0x70e   : > { %v2055_v48 = vpop.permute.xlu1 %2054  ;;  %v2277_v57 = vpop.permute.xlu0 %2276 }
 0x711   : > { %v8469_v46 = vpop.eup %8468 }
 0x712   : > { %v1888_v47 = vmul.f32 %v8469_v46, %v8465_v38  ;;  %v2279_v55 = vpop.permute.xlu1 %2278 }
 0x714   : > { %7533 = vmatmul.mubr.msk.f32.vlgmr.msra.gmra.mrb[4].mxu0 %vm1803_vm3, %v1888_v47 }
 0x715   : > { %v8471_v49 = vpop.eup %8470  ;;  %7541 = vmatpush3.msra.mxu0 %v2055_v48  ;;  %7542 = vmatprep.mubr.msk.f32.mxu0 %vm9374_vm0, %v9375_v1 }
 0x716   : > { %v2053_v50 = vmul.f32 %v8471_v49, %v8467_v40  ;;  %7550 = vmatprep.subr.mxu0 %v9375_v1  ;;  %v7236_v40 = vld [vmem:[#allocation13] ss:$0 sm:$0xff] }
 0x718   : > { %7543 = vmatmul.mubr.msk.f32.vlgmr.msra.gmra.mrb[6].mxu0 %vm1803_vm3, %v2053_v50 }
 0x719   : > { %7552 = vmatprep.mubr.msk.f32.mxu0 %vm9374_vm0, %v9375_v1  ;;  %7551 = vmatpush3.msra.mxu0 %v1796_v51 }
 0x71a   : > { %7560 = vmatprep.subr.mxu0 %v9375_v1 }
 0x7e7   : > { %v1961_v52 = vpop.f32.mrb[4].mxu0 }
 0x7e8   : > { %v7534_v53 = vpop.f32.mrb[5].mxu0  ;;  %7553 = vmatmul.mubr.msk.f32.vlgmr.msra.gmra.mrb[8].mxu0 %vm1803_vm3, %v1961_v52 }
 0x7e9   : > { %7562 = vmatprep.mubr.msk.f32.mxu0 %vm9374_vm0, %v9375_v1 }
 0x7eb   : > { %v2126_v54 = vpop.f32.mrb[6].mxu0 }
 0x7ec   : > { %v7544_v56 = vpop.f32.mrb[7].mxu0  ;;  %7548 = vmatmul.mubr.msk.f32.vlgmr.msra.gmra.mrb[4].mxu1 %vm1803_vm3, %v2126_v54 }
 0x7ed   : > { %7556 = vmatpush3.xpose.msk.msra.mxu1 %vm1803_vm3, %v2279_v55  ;;  %7557 = vmatprep.mubr.msk.f32.mxu1 %vm9374_vm0, %v9375_v1 }
 0x7ee   : > { %7565 = vmatprep.subr.mxu1 %v9375_v1 }
 0x7f0   : > { %7558 = vmatmul.mubr.msk.f32.vlgmr.msra.gmra.mrb[6].mxu1 %vm1803_vm3, %v2277_v57 }
 0x7f1   : > { %7567 = vmatprep.mubr.msk.f32.mxu1 %vm9374_vm0, %v9375_v1  ;;  %7566 = vmatpush3.msra.mxu1 %v1798_v17 }
 0x7f2   : > { %7575 = vmatprep.subr.mxu1 %v9375_v1 }
 0x8bb   : > { %v2272_v58 = vpop.f32.mrb[8].mxu0 }
 0x8bc   : > { %v7554_v59 = vpop.f32.mrb[9].mxu0 }
 0x8bd   : > { %v2792_v59 = vld [vmem:[%s10789_s2 + $0x8] sm:$0xff] }
 0x8bf   : > { %v2199_v60 = vpop.f32.mrb[4].mxu1 }
 0x8c0   : > { %v2273_v61 = vadd.f32 %v2272_v58, %v2199_v60  ;;  %v7549_v62 = vpop.f32.mrb[5].mxu1  ;;  %v2791_v58 = vld [vmem:[%s10789_s2] sm:$0xff] }
 0x8c1   : > { %v7922_v60 = vpack.c.bf16 %v2792_v59, %v2791_v58  ;;  %v2794_v62 = vld [vmem:[%s10789_s2 + $0x18] sm:$0xff] }
 0x8c3   : > { %v2350_v63 = vpop.f32.mrb[6].mxu1 }
 0x8c4   : > { %v2351_v2 = vadd.f32 %v2350_v63, %v10078_v23  ;;  %v7559_v3 = vpop.f32.mrb[7].mxu1 }
 0x8c6   : > { %v2354_v4 = vsel %vm1803_vm3, %v2351_v2, -inf }
 0x8c7   : > { %2355 = vmax.xlane.f32.xlu1 %v2354_v4 }
 0x8d8   : > { %2517 = vrot.lane.b32.xlu1 %v10047_v18, %s10676_s7  ;;  %s10788_s7 = sld [smem:[#allocation53_spill]] }
 0x8dc   : > { %2515 = vrot.lane.b32.xlu1 %v10047_v18, %s10680_s11  ;;  %s7331_s11 = sshll.u32 %s10823_s18, 4 }
 0x8de   : > { %s1604_s28 = scalar_lea.vmem %s10788_s7, %s7331_s11  ;;  %s10790_s11 = sld [smem:[#allocation55_spill]] }
 0x8df   : > { %v10160_v56 = vld [vmem:[%s1604_s28] sm:$0xff]  ;;  %v10163_v57 = vld [vmem:[%s1604_s28 + $0x8] sm:$0xf]  ;;  %s10795_s7 = sld [smem:[#allocation67_spill]] }
 0x8e4   : > { %s10208_s28 = scalar_lea.vmem %s10790_s11, %s10071_s5  ;;  %s10797_s11 = smov 112  }
 0x954   : > { %v2356_v5 = vpop.xlane.xlu1 %2355 }
 0x955   : > { %v2357_v6 = vsub.f32 %v2351_v2, %v2356_v5 }
 0x957   : > { %v2358_v7 = vmul.f32 1.442695, %v2357_v6  ;;  %v10177_v6 = vld [vmem:[#allocation9] ss:$0 sm:$0xff] }
 0x958   : > { %v2518_v13 = vpop.permute.xlu1 %2517 }
 0x959   : > { %8472 = vpow2.f32 %v2358_v7 }
 0x95c   : > { %v2516_v16 = vpop.permute.xlu1 %2515 }
 0x963   : > { %v8473_v8 = vpop.eup %8472 }
 0x964   : > { %v2360_v9 = vsel %vm1803_vm3, %v8473_v8, 0.0 }
 0x965   : > { %2361 = vadd.xlane.f32.xlu0 %v2360_v9 }
 0x97b   : > { %2365 = vrot.lane.b32.xlu0 %v10047_v18, %s10674_s9  ;;  %s10675_s9 = smov 40  }
 0x9f2   : > { %v2362_v10 = vpop.xlane.xlu0 %2361 }
 0x9f3   : > { %8474 = vrcp.f32 %v2362_v10 }
 0x9f6   : > { %v2366_v11 = vpop.permute.xlu0 %2365 }
 0x9f7   : > { %7561 = vmatpush3.msra.mxu0 %v2366_v11  ;;  %v7241_v11 = vld [vmem:[#allocation16] ss:$0 sm:$0xff] }
 0x9f8   : > { %7570 = vmatprep.subr.mxu0 %v9375_v1 }
 0x9fd   : > { %v8475_v12 = vpop.eup %8474 }
 0x9fe   : > { %v2364_v15 = vmul.f32 %v8475_v12, %v8473_v8  ;;  %v10179_v8 = vld [vmem:[#allocation10] ss:$0 sm:$0xff] }
 0xa00   : > { %7563 = vmatmul.mubr.msk.f32.vlgmr.msra.gmra.mrb[10].mxu0 %vm1803_vm3, %v2364_v15 }
 0xa01   : > { %7571 = vmatpush3.xpose.msk.msra.mxu0 %vm1803_vm3, %v2518_v13  ;;  %7572 = vmatprep.mubr.msk.f32.mxu0 %vm9374_vm0, %v9375_v1 }
 0xa02   : > { %7580 = vmatprep.subr.mxu0 %v9375_v1 }
 0xa04   : > { %7573 = vmatmul.mubr.msk.f32.vlgmr.msra.gmra.mrb[12].mxu0 %vm1803_vm3, %v2516_v16 }
 0xa05   : > { %7582 = vmatprep.mubr.msk.f32.mxu0 %vm9374_vm0, %v9375_v1  ;;  %7581 = vmatpush3.msra.mxu0 %v1799_v31 }
 0xad3   : > { %v2437_v19 = vpop.f32.mrb[10].mxu0 }
 0xad4   : > { %v7564_v20 = vpop.f32.mrb[11].mxu0  ;;  %7568 = vmatmul.mubr.msk.f32.vlgmr.msra.gmra.mrb[8].mxu1 %vm1803_vm3, %v2437_v19 }
 0xad5   : > { %7577 = vmatprep.mubr.msk.f32.mxu1 %vm9374_vm0, %v9375_v1 }
 0xad7   : > { %v2589_v21 = vpop.f32.mrb[12].mxu0 }
 0xad8   : > { %v2590_v22 = vadd.f32 %v2589_v21, %v10078_v23  ;;  %v7574_v24 = vpop.f32.mrb[13].mxu0  ;;  %v7239_v21 = vld [vmem:[#allocation15] ss:$0 sm:$0xff] }
 0xada   : > { %v2593_v25 = vsel %vm1803_vm3, %v2590_v22, -inf }
 0xadb   : > { %2594 = vmax.xlane.f32.xlu0 %v2593_v25 }
 0xaf1   : > { %2604 = vrot.lane.b32.xlu0 %v10047_v18, %s10675_s9  ;;  %s10787_s9 = sld [smem:[#allocation65_spill]] }
 0xaf7   : > { %v2875_v51 = vld [vmem:[%s10787_s9] sm:$0xff]  ;;  %v2876_v52 = vld [vmem:[%s10787_s9 + $0x8] sm:$0xff]  ;;  %v2878_v54 = vld [vmem:[%s10787_s9 + $0x18] sm:$0xff] }
 0xaf8   : > { %v7927_v53 = vpack.c.bf16 %v2876_v52, %v2875_v51 }
 0xafa   : > { %7928 = vmatprep.subr.bf16.mxu0 %v7927_v53 }
 0xb68   : > { %v2595_v26 = vpop.xlane.xlu0 %2594 }
 0xb69   : > { %v2596_v27 = vsub.f32 %v2590_v22, %v2595_v26  ;;  %v10211_v26 = vld [vmem:[%s10208_s28] sm:$0xff] }
 0xb6b   : > { %v2597_v28 = vmul.f32 1.442695, %v2596_v27 }
 0xb6c   : > { %v2605_v29 = vpop.permute.xlu0 %2604 }
 0xb6d   : > { %8476 = vpow2.f32 %v2597_v28  ;;  %7576 = vmatpush3.msra.mxu1 %v2605_v29 }
 0xb6e   : > { %7921 = vmatprep.subr.bf16.mxu1 %v9373_v0 }
 0xb77   : > { %v8477_v30 = vpop.eup %8476 }
 0xb78   : > { %v2599_v23 = vsel %vm1803_vm3, %v8477_v30, 0.0 }
 0xb79   : > { %2600 = vadd.xlane.f32.xlu1 %v2599_v23 }
 0xba7   : > { %v2510_v32 = vpop.f32.mrb[8].mxu1 }
 0xba8   : > { %v2514_v33 = vadd.f32 %v2510_v32, %v2273_v61  ;;  %v7569_v34 = vpop.f32.mrb[9].mxu1  ;;  %v2793_v61 = vld [vmem:[%s10789_s2 + $0x10] sm:$0xff]  ;;  %s10801_s2 = sld [smem:[#allocation69_spill]] }
 0xba9   : > { %v7925_v63 = vpack.c.bf16 %v2794_v62, %v2793_v61 }
 0xc06   : > { %v2601_v35 = vpop.xlane.xlu1 %2600 }
 0xc07   : > { %8478 = vrcp.f32 %v2601_v35 }
 0xc11   : > { %v8479_v18 = vpop.eup %8478 }
 0xc12   : > { %v2603_v36 = vmul.f32 %v8479_v18, %v8477_v30 }
 0xc14   : > { %7578 = vmatmul.mubr.msk.f32.vlgmr.msra.gmra.mrb[10].mxu1 %vm1803_vm3, %v2603_v36 }
 0xc15   : > { %7593 = vmatprep.mubr.msk.f32.mxu1 %vm9374_vm0, %v9375_v1  ;;  %7923 = vmatpush3.bf16.msra.mxu1 %v7922_v60 }
 0xc16   : > { %7924 = vmatprep.subr.bf16.mxu1 %v9373_v0 }
 0xc19   : > { %7926 = vmatpush3.bf16.msra.mxu1 %v7925_v63 }
 0xc1a   : > { %7935 = vmatprep.subr.bf16.mxu1 %v9373_v0 }
 0xce7   : > { %v2676_v37 = vpop.f32.mrb[10].mxu1 }
 0xce8   : > { %v7579_v38 = vpop.f32.mrb[11].mxu1  ;;  %7583 = vmatmul.mubr.msk.f32.vlgmr.msra.gmra.mrb[14].mxu0 %vm1803_vm3, %v2676_v37 }
 0xce9   : > { %7930 = vmatpush3.bf16.msra.mxu0 %v7927_v53  ;;  %7604 = vmatprep.mubr.msk.f32.mxu0 %vm1722_vm2, %v10160_v56 }
 0xdbb   : > { %v2749_v39 = vpop.f32.mrb[14].mxu0 }
 0xdbc   : > { %v2753_v41 = vadd.f32 %v2749_v39, %v2514_v33  ;;  %v7584_v42 = vpop.f32.mrb[15].mxu0 }
 0xdbe   : > { %v2761_v43 = vadd.f32 %v7236_v40, %v2753_v41 }
 0xdc0   : > { %v2762_v44 = vadd.f32 %v2761_v43, %v10041_v14  ;;  %v2877_v14 = vld [vmem:[%s10787_s9 + $0x10] sm:$0xff]  ;;  %s10806_s9 = smov 120  }
 0xdc1   : > { %v7931_v55 = vpack.c.bf16 %v2878_v54, %v2877_v14 }
 0xdc2   : > { %v2763_v45 = vsel %vm1722_vm2, %v2762_v44, 0.0 }
 0xdc3   : > { %2764 = vadd.xlane.f32.xlu1 %v2763_v45  ;;  %7932 = vmatprep.subr.bf16.mxu0 %v7931_v55 }
 0xdc4   : > { %7934 = vmatpush3.bf16.msra.mxu0 %v7931_v55 }
 0xdc5   : > { %7939 = vmatprep.subr.bf16.mxu0 %v9373_v0 }
 0xdc7   : > { %7605 = vmatmul.mubr.msk.f32.vlgmr.msra.gmra.mrb[16].mxu0 %vm1722_vm2, %v10163_v57 }
 0xdc8   : > { %7618 = vmatprep.mubr.msk.f32.mxu0 %vm9374_vm0, %v9375_v1 }
 0xe50   : > { %v2765_v46 = vpop.xlane.xlu1 %2764 }
 0xe51   : > { %v2767_v47 = vmul.f32 0.03125, %v2765_v46 }
 0xe53   : > { %v2768_v48 = vsub.f32 %v2762_v44, %v2767_v47  ;;  %v2967_v47 = vld [vmem:[%s10795_s7] sm:$0xff] }
 0xe55   : > { %v2769_v49 = vmul.f32 %v2768_v48, %v2768_v48 }
 0xe57   : > { %v2770_v50 = vsel %vm1722_vm2, %v2769_v49, 0.0 }
 0xe58   : > { %2771 = vadd.xlane.f32.xlu1 %v2770_v50 }
 0xe9a   : > { %v7606_v12 = vpop.f32.mrb[16].mxu0 }
 0xe9b   : > { %v2964_v13 = vadd.f32 %v7606_v12, %v7241_v11  ;;  %v2958_v15 = vpop.f32.mrb[17].mxu0 }
 0xe9c   : > { %v2959_v16 = vadd.f32 %v7241_v11, %v2958_v15 }
 0xe9e   : > { %v10195_v19 = vpack.i.bf16 %v2964_v13, %v2959_v16  ;;  %v7936_v20 = vpack.c.bf16 %v2964_v13, %v2959_v16 }
 0xea0   : > { %8399 = vrot.lane.b32.xlu0 %v10195_v19, %s10684_s12 }
 0xee5   : > { %v2772_v2 = vpop.xlane.xlu1 %2771 }
 0xee6   : > { %v2773_v3 = vmul.f32 0.03125, %v2772_v2 }
 0xee8   : > { %v2774_v4 = vadd.f32 1e-05, %v2773_v3 }
 0xeea   : > { %8480 = vrsqrt.f32 %v2774_v4 }
 0xef4   : > { %v8481_v5 = vpop.eup %8480 }
 0xef5   : > { %v2776_v7 = vmul.f32 %v8481_v5, %v2768_v48 }
 0xef7   : > { %v2783_v9 = vmul.f32 %v10177_v6, %v2776_v7 }
 0xef9   : > { %v10183_v10 = vadd.f32 %v10179_v8, %v2783_v9 }
 0xefb   : > { %7594 = vmatmul.mubr.msk.f32.vlgmr.msra.gmra.mrb[12].mxu1 %vm1722_vm2, %v10183_v10 }
 0xefc   : > { %7611 = vmatprep.mubr.msk.f32.mxu1 %vm9374_vm0, %v9375_v1  ;;  %7938 = vmatpush3.bf16.xpose.msk.msra.mxu1 %vm10191_vm4, %v7936_v20 }
 0xefd   : > { %7947 = vmatprep.subr.bf16.mxu1 %v9373_v0 }
 0xf12   : > { %v8400_v40 = vpop.permute.xlu0 %8399 }
 0xf13   : > { %v8402_v42 = vunpack.i.h.bf16 %v8400_v40  ;;  %v8401_v43 = vunpack.i.l.bf16 %v8400_v40 }
 0xf15   : > { %v7944_v45 = vpack.c.bf16 %v8402_v42, %v8401_v43 }
 0xfce   : > { %v2871_v22 = vpop.f32.mrb[12].mxu1 }
 0xfcf   : > { %v2872_v24 = vadd.f32 %v7239_v21, %v2871_v22  ;;  %v7595_v25 = vpop.f32.mrb[13].mxu1 }
 0xfd1   : > { %3143 = vrot.lane.b32.xlu0 %v2872_v24, %s10684_s12  ;;  %7612 = vmatmul.mubr.msk.f32.vlgmr.msra.gmra.mrb[14].mxu1 %vm1803_vm3, %v2872_v24  ;;  %s10796_s12 = smov %s10795_s7  ;;  %s10798_s7 = smov 104  }
 0xfd2   : > { %7632 = vmatprep.mubr.msk.f32.mxu1 %vm9374_vm0, %v9375_v1  ;;  %v2968_v9 = vld [vmem:[%s10796_s12 + $0x8] sm:$0xff] }
0x1043   : > { %v3144_v46 = vpop.permute.xlu0 %3143 }
0x10a4   : > { %v3046_v27 = vpop.f32.mrb[14].mxu1 }
0x10a5   : > { %v3047_v28 = vadd.f32 %v3046_v27, %v10211_v26  ;;  %v7613_v29 = vpop.f32.mrb[15].mxu1 }
0x10a7   : > { %v3051_v30 = vsel %vm3050_vm5, %v3047_v28, -inf }
0x10a8   : > { %3052 = vmax.xlane.f32.xlu1 %v3051_v30 }
0x1135   : > { %v3053_v23 = vpop.xlane.xlu1 %3052 }
0x1136   : > { %v3054_v31 = vsub.f32 %v3047_v28, %v3053_v23 }
0x1138   : > { %v3055_v32 = vmul.f32 1.442695, %v3054_v31 }
0x113a   : > { %8482 = vpow2.f32 %v3055_v32 }
0x1144   : > { %v8483_v33 = vpop.eup %8482 }
0x1145   : > { %v3057_v34 = vsel %vm3050_vm5, %v8483_v33, 0.0 }
0x1146   : > { %3058 = vadd.xlane.f32.xlu1 %v3057_v34 }
0x1157   : > { %8394 = vrot.lane.b32.xlu1 %v10195_v19, %s10686_s13  ;;  %s10799_s13 = smov 80  }
0x11d3   : > { %v3059_v35 = vpop.xlane.xlu1 %3058 }
0x11d4   : > { %8484 = vrcp.f32 %v3059_v35 }
0x11d7   : > { %v8395_v18 = vpop.permute.xlu1 %8394 }
0x11d8   : > { %v8397_v36 = vunpack.i.h.bf16 %v8395_v18  ;;  %v8396_v37 = vunpack.i.l.bf16 %v8395_v18 }
0x11da   : > { %v7940_v39 = vpack.c.bf16 %v8397_v36, %v8396_v37 }
0x11dc   : > { %7942 = vmatpush3.bf16.msk.msra.mxu0 %vm10218_vm8, %v7940_v39 }
0x11dd   : > { %7943 = vmatprep.subr.bf16.mxu0 %v9373_v0 }
0x11de   : > { %v8485_v41 = vpop.eup %8484 }
0x11df   : > { %v3061_v44 = vmul.f32 %v8485_v41, %v8483_v33 }
0x11e1   : > { %7619 = vmatmul.mubr.msk.f32.vlgmr.msra.gmra.mrb[18].mxu0 %vm3050_vm5, %v3061_v44 }
0x11e2   : > { %7625 = vmatprep.mubr.msk.f32.mxu0 %vm9374_vm0, %v9375_v1 }
0x11e5   : > { %7946 = vmatpush3.bf16.xpose.msk.msra.mxu0 %vm10191_vm4, %v7944_v45 }
0x11e6   : > { %7640 = vmatprep.subr.mxu0 %v9375_v1 }
0x11ec   : > { %7626 = vmatmul.mubr.msk.f32.vlgmr.msra.gmra.mrb[20].mxu0 %vm1803_vm3, %v3144_v46 }
0x11ed   : > { %7642 = vmatprep.mubr.msk.f32.mxu0 %vm9374_vm0, %v9375_v1  ;;  %7641 = vmatpush3.msra.mxu0 %v2967_v47 }
0x11ee   : > { %7955 = vmatprep.subr.bf16.mxu0 %v9373_v0 }
0x12b4   : > { %v3139_v48 = vpop.f32.mrb[18].mxu0 }
0x12b5   : > { %v7620_v49 = vpop.f32.mrb[19].mxu0  ;;  %7643 = vmatmul.mubr.msk.f32.vlgmr.msra.gmra.mrb[22].mxu0 %vm1803_vm3, %v3139_v48 }
0x12b6   : > { %7656 = vmatprep.mubr.msk.f32.mxu0 %vm9374_vm0, %v9375_v1 }
0x12bf   : > { %v3221_v50 = vpop.f32.mrb[20].mxu0 }
0x12c0   : > { %v3222_v51 = vadd.f32 %v3221_v50, %v10211_v26  ;;  %v7627_v52 = vpop.f32.mrb[21].mxu0 }
0x12c2   : > { %v3225_v53 = vsel %vm3050_vm5, %v3222_v51, -inf }
0x12c3   : > { %3226 = vmax.xlane.f32.xlu0 %v3225_v53 }
0x12d9   : > { %8404 = vrot.lane.b32.xlu0 %v10195_v19, %s10688_s4  ;;  %s10800_s4 = smov 72  }
0x12dd   : > { %3462 = vrot.lane.b32.xlu0 %v2872_v24, %s10797_s11 }
0x12e1   : > { %8414 = vrot.lane.b32.xlu0 %v10195_v19, %s10798_s7 }
0x12e5   : > { %3709 = vrot.lane.b32.xlu0 %v2872_v24, %s10798_s7 }
0x1350   : > { %v3227_v14 = vpop.xlane.xlu0 %3226 }
0x1351   : > { %v3228_v54 = vsub.f32 %v3222_v51, %v3227_v14 }
0x1353   : > { %v3229_v55 = vmul.f32 1.442695, %v3228_v54 }
0x1354   : > { %v8405_v58 = vpop.permute.xlu0 %8404 }
0x1355   : > { %8486 = vpow2.f32 %v3229_v55  ;;  %v8407_v59 = vunpack.i.h.bf16 %v8405_v58  ;;  %v8406_v60 = vunpack.i.l.bf16 %v8405_v58  ;;  %v2969_v55 = vld [vmem:[%s10796_s12 + $0x10] sm:$0xff] }
0x1357   : > { %v7948_v61 = vpack.c.bf16 %v8407_v59, %v8406_v60 }
0x1358   : > { %v3463_v12 = vpop.permute.xlu0 %3462 }
0x1359   : > { %7950 = vmatpush3.bf16.msk.msra.mxu1 %vm10218_vm8, %v7948_v61 }
0x135a   : > { %7635 = vmatprep.subr.mxu1 %v9375_v1 }
0x135c   : > { %v8415_v21 = vpop.permute.xlu0 %8414 }
0x135d   : > { %v8417_v24 = vunpack.i.h.bf16 %v8415_v21  ;;  %v8416_v25 = vunpack.i.l.bf16 %v8415_v21 }
0x135f   : > { %v8487_v62 = vpop.eup %8486  ;;  %v7960_v27 = vpack.c.bf16 %v8417_v24, %v8416_v25 }
0x1360   : > { %v3231_v63 = vsel %vm3050_vm5, %v8487_v62, 0.0  ;;  %v3710_v28 = vpop.permute.xlu0 %3709 }
0x1361   : > { %3232 = vadd.xlane.f32.xlu1 %v3231_v63 }
0x1372   : > { %8409 = vrot.lane.b32.xlu1 %v10195_v19, %s10797_s11 }
0x1388   : > { %v3458_v2 = vpop.f32.mrb[22].mxu0 }
0x1389   : > { %v7644_v3 = vpop.f32.mrb[23].mxu0 }
0x13ee   : > { %v3233_v4 = vpop.xlane.xlu1 %3232 }
0x13ef   : > { %8488 = vrcp.f32 %v3233_v4  ;;  %v2970_v4 = vld [vmem:[%s10796_s12 + $0x18] sm:$0xff]  ;;  %s10807_s12 = smov 64  }
0x13f2   : > { %v8410_v11 = vpop.permute.xlu1 %8409 }
0x13f3   : > { %v8412_v13 = vunpack.i.h.bf16 %v8410_v11  ;;  %v8411_v15 = vunpack.i.l.bf16 %v8410_v11 }
0x13f5   : > { %v7952_v16 = vpack.c.bf16 %v8412_v13, %v8411_v15  ;;  %v7268_v15 = vld [vmem:[#allocation18] ss:$0 sm:$0xff] }
0x13f9   : > { %v8489_v5 = vpop.eup %8488 }
0x13fa   : > { %v3235_v7 = vmul.f32 %v8489_v5, %v8487_v62 }
0x13fc   : > { %7633 = vmatmul.mubr.msk.f32.vlgmr.msra.gmra.mrb[16].mxu1 %vm3050_vm5, %v3235_v7 }
0x13fd   : > { %7636 = vmatpush3.msra.mxu1 %v2968_v9  ;;  %7637 = vmatprep.mubr.msk.f32.mxu1 %vm9374_vm0, %v9375_v1 }
0x13fe   : > { %7951 = vmatprep.subr.bf16.mxu1 %v9373_v0 }
0x14cf   : > { %v3312_v20 = vpop.f32.mrb[16].mxu1 }
0x14d0   : > { %v7634_v22 = vpop.f32.mrb[17].mxu1  ;;  %7638 = vmatmul.mubr.msk.f32.vlgmr.msra.gmra.mrb[18].mxu1 %vm1803_vm3, %v3312_v20 }
0x14d1   : > { %7954 = vmatpush3.bf16.xpose.msk.msra.mxu1 %vm10191_vm4, %v7952_v16  ;;  %7649 = vmatprep.mubr.msk.f32.mxu1 %vm9374_vm0, %v9375_v1 }
0x14d2   : > { %7959 = vmatprep.subr.bf16.mxu1 %v9373_v0 }
0x14d8   : > { %7650 = vmatmul.mubr.msk.f32.vlgmr.msra.gmra.mrb[20].mxu1 %vm1803_vm3, %v3463_v12 }
0x14d9   : > { %7962 = vmatpush3.bf16.xpose.msk.msra.mxu1 %vm10191_vm4, %v7960_v27  ;;  %7668 = vmatprep.mubr.msk.f32.mxu1 %vm9374_vm0, %v9375_v1 }
0x14da   : > { %7967 = vmatprep.subr.bf16.mxu1 %v9373_v0 }
0x14e0   : > { %7669 = vmatmul.mubr.msk.f32.vlgmr.msra.gmra.mrb[22].mxu1 %vm1803_vm3, %v3710_v28 }
0x14e1   : > { %7691 = vmatprep.mubr.msk.f32.mxu1 %vm9374_vm0, %v9375_v1 }
0x15a3   : > { %v3385_v29 = vpop.f32.mrb[18].mxu1 }
0x15a4   : > { %v10273_v30 = vadd.f32 %v3458_v2, %v3385_v29  ;;  %v7639_v23 = vpop.f32.mrb[19].mxu1 }
0x15a5   : > { %v3980_v23 = vld [vmem:[%s10801_s2] sm:$0xff] }
0x15ab   : > { %v3540_v31 = vpop.f32.mrb[20].mxu1 }
0x15ac   : > { %v3541_v32 = vadd.f32 %v3540_v31, %v10211_v26  ;;  %v7651_v33 = vpop.f32.mrb[21].mxu1  ;;  %v3981_v31 = vld [vmem:[%s10801_s2 + $0x8] sm:$0xff] }
0x15ad   : > { %v3983_v33 = vld [vmem:[%s10801_s2 + $0x18] sm:$0xff] }
0x15ae   : > { %v3544_v34 = vsel %vm3050_vm5, %v3541_v32, -inf }
0x15af   : > { %3545 = vmax.xlane.f32.xlu1 %v3544_v34 }
0x15b3   : > { %v3787_v35 = vpop.f32.mrb[22].mxu1 }
0x15b4   : > { %v3788_v18 = vadd.f32 %v3787_v35, %v10211_v26  ;;  %v7670_v36 = vpop.f32.mrb[23].mxu1  ;;  %v4065_v35 = vld [vmem:[%s10802_s6] sm:$0xff] }
0x15b5   : > { %v4067_v36 = vld [vmem:[%s10802_s6 + $0x10] sm:$0xff] }
0x15b6   : > { %v3791_v37 = vsel %vm3050_vm5, %v3788_v18, -inf }
0x15b7   : > { %3792 = vmax.xlane.f32.xlu1 %v3791_v37 }
0x163c   : > { %v3546_v39 = vpop.xlane.xlu1 %3545 }
0x163d   : > { %v3547_v40 = vsub.f32 %v3541_v32, %v3546_v39  ;;  %v7968_v32 = vpack.c.bf16 %v3981_v31, %v3980_v23  ;;  %v4068_v39 = vld [vmem:[%s10802_s6 + $0x18] sm:$0xff] }
0x163f   : > { %v3548_v41 = vmul.f32 1.442695, %v3547_v40  ;;  %7969 = vmatpush3.bf16.msra.mxu1 %v7968_v32  ;;  %v7977_v40 = vpack.c.bf16 %v4068_v39, %v4067_v36 }
0x1640   : > { %7970 = vmatprep.subr.bf16.mxu1 %v9373_v0 }
0x1641   : > { %8490 = vpow2.f32 %v3548_v41  ;;  %v4069_v41 = vld [vmem:[%s10802_s6 + $0x20] sm:$0xff] }
0x1644   : > { %v3793_v42 = vpop.xlane.xlu1 %3792 }
0x1645   : > { %v3794_v43 = vsub.f32 %v3788_v18, %v3793_v42  ;;  %v4066_v18 = vld [vmem:[%s10802_s6 + $0x8] sm:$0xff] }
0x1646   : > { %v7974_v37 = vpack.c.bf16 %v4066_v18, %v4065_v35  ;;  %v4070_v42 = vld [vmem:[%s10802_s6 + $0x28] sm:$0xff] }
0x1647   : > { %v3795_v44 = vmul.f32 1.442695, %v3794_v43  ;;  %v7980_v43 = vpack.c.bf16 %v4070_v42, %v4069_v41 }
0x1649   : > { %8492 = vpow2.f32 %v3795_v44 }
0x164b   : > { %v8491_v45 = vpop.eup %8490 }
0x164c   : > { %v3550_v46 = vsel %vm3050_vm5, %v8491_v45, 0.0 }
0x164d   : > { %3551 = vadd.xlane.f32.xlu0 %v3550_v46 }
0x1653   : > { %v8493_v47 = vpop.eup %8492 }
0x1654   : > { %v3797_v48 = vsel %vm3050_vm5, %v8493_v47, 0.0 }
0x1655   : > { %3798 = vadd.xlane.f32.xlu1 %v3797_v48 }
0x1663   : > { %8419 = vrot.lane.b32.xlu0 %v10195_v19, %s10799_s13 }
0x1666   : > { %8424 = vrot.lane.b32.xlu1 %v10195_v19, %s10800_s4 }
0x16da   : > { %v3552_v49 = vpop.xlane.xlu0 %3551 }
0x16db   : > { %8494 = vrcp.f32 %v3552_v49 }
0x16de   : > { %v8420_v50 = vpop.permute.xlu0 %8419 }
0x16df   : > { %v8422_v51 = vunpack.i.h.bf16 %v8420_v50  ;;  %v8421_v52 = vunpack.i.l.bf16 %v8420_v50 }
0x16e1   : > { %v7956_v53 = vpack.c.bf16 %v8422_v51, %v8421_v52  ;;  %v4071_v51 = vld [vmem:[%s10802_s6 + $0x30] sm:$0xff]  ;;  %v4072_v52 = vld [vmem:[%s10802_s6 + $0x38] sm:$0xff]  ;;  %s10805_s6 = smov 96  }
0x16e2   : > { %v3799_v19 = vpop.xlane.xlu1 %3798 }
0x16e3   : > { %7958 = vmatpush3.bf16.msk.msra.mxu0 %vm10218_vm8, %v7956_v53  ;;  %8496 = vrcp.f32 %v3799_v19  ;;  %v7983_v53 = vpack.c.bf16 %v4072_v52, %v4071_v51 }
0x16e4   : > { %7659 = vmatprep.subr.mxu0 %v9375_v1 }
0x16e5   : > { %v8495_v14 = vpop.eup %8494 }
0x16e6   : > { %v3554_v54 = vmul.f32 %v8495_v14, %v8491_v45  ;;  %v8425_v58 = vpop.permute.xlu1 %8424  ;;  %v7269_v14 = vld [vmem:[#allocation19] ss:$0 sm:$0xff] }
0x16e7   : > { %v8427_v59 = vunpack.i.h.bf16 %v8425_v58  ;;  %v8426_v60 = vunpack.i.l.bf16 %v8425_v58 }
0x16e8   : > { %7657 = vmatmul.mubr.msk.f32.vlgmr.msra.gmra.mrb[24].mxu0 %vm3050_vm5, %v3554_v54 }
0x16e9   : > { %7660 = vmatpush3.msra.mxu0 %v2969_v55  ;;  %7661 = vmatprep.mubr.msk.f32.mxu0 %vm9374_vm0, %v9375_v1  ;;  %v7964_v62 = vpack.c.bf16 %v8427_v59, %v8426_v60  ;;  %v7271_v59 = vld [vmem:[#allocation21] ss:$0 sm:$0xff] }
0x16ea   : > { %7963 = vmatprep.subr.bf16.mxu0 %v9373_v0 }
0x16ed   : > { %v8497_v61 = vpop.eup %8496 }
0x16ee   : > { %v3801_v3 = vmul.f32 %v8497_v61, %v8493_v47 }
0x17bb   : > { %v3631_v63 = vpop.f32.mrb[24].mxu0 }
0x17bc   : > { %v7658_v2 = vpop.f32.mrb[25].mxu0  ;;  %7662 = vmatmul.mubr.msk.f32.vlgmr.msra.gmra.mrb[26].mxu0 %vm1803_vm3, %v3631_v63 }
0x17bd   : > { %7966 = vmatpush3.bf16.msk.msra.mxu0 %vm10218_vm8, %v7964_v62  ;;  %7675 = vmatprep.mubr.msk.f32.mxu0 %vm9374_vm0, %v9375_v1 }
0x17be   : > { %7678 = vmatprep.subr.mxu0 %v9375_v1 }
0x17c0   : > { %7676 = vmatmul.mubr.msk.f32.vlgmr.msra.gmra.mrb[28].mxu0 %vm3050_vm5, %v3801_v3 }
0x17c1   : > { %7680 = vmatprep.mubr.msk.f32.mxu0 %vm9374_vm0, %v9375_v1  ;;  %7679 = vmatpush3.msra.mxu0 %v2970_v4 }
0x17c2   : > { %7973 = vmatprep.subr.bf16.mxu0 %v9373_v0 }
0x188f   : > { %v3704_v5 = vpop.f32.mrb[26].mxu0 }
0x1890   : > { %v3708_v7 = vadd.f32 %v3704_v5, %v10273_v30  ;;  %v7663_v9 = vpop.f32.mrb[27].mxu0 }
0x1893   : > { %v3878_v11 = vpop.f32.mrb[28].mxu0 }
0x1894   : > { %v7677_v12 = vpop.f32.mrb[29].mxu0  ;;  %7681 = vmatmul.mubr.msk.f32.vlgmr.msra.gmra.mrb[30].mxu0 %vm1803_vm3, %v3878_v11 }
0x1895   : > { %7710 = vmatprep.mubr.msk.f32.mxu0 %vm9374_vm0, %v9375_v1  ;;  %7975 = vmatpush3.bf16.msra.mxu0 %v7974_v37 }
0x1896   : > { %7976 = vmatprep.subr.bf16.mxu0 %v9373_v0 }
0x1899   : > { %7978 = vmatpush3.bf16.msra.mxu0 %v7977_v40 }
0x189a   : > { %7979 = vmatprep.subr.bf16.mxu0 %v9373_v0 }
0x189d   : > { %7981 = vmatpush3.bf16.msra.mxu0 %v7980_v43 }
0x189e   : > { %7982 = vmatprep.subr.bf16.mxu0 %v9373_v0 }
0x18a1   : > { %7984 = vmatpush3.bf16.msra.mxu0 %v7983_v53 }
0x18a2   : > { %7729 = vmatprep.subr.mxu0 %v9375_v1 }
0x1967   : > { %v3951_v13 = vpop.f32.mrb[30].mxu0 }
0x1968   : > { %v3955_v16 = vadd.f32 %v3951_v13, %v3708_v7  ;;  %v7682_v20 = vpop.f32.mrb[31].mxu0 }
0x196a   : > { %v3963_v21 = vadd.f32 %v7268_v15, %v3955_v16 }
0x196c   : > { %v3964_v22 = vadd.f32 %v3963_v21, %v10183_v10  ;;  %v3982_v10 = vld [vmem:[%s10801_s2 + $0x10] sm:$0xff]  ;;  %s10803_s2 = sld [smem:[#allocation74_spill]] }
0x196d   : > { %v7971_v34 = vpack.c.bf16 %v3983_v33, %v3982_v10 }
0x196e   : > { %v3965_v24 = vsel %vm1722_vm2, %v3964_v22, 0.0 }
0x196f   : > { %3966 = vadd.xlane.f32.xlu0 %v3965_v24  ;;  %7972 = vmatpush3.bf16.msra.mxu1 %v7971_v34  ;;  %v10373_v34 = vld [vmem:[%s10075_s1] sm:$0xff]  ;;  %s10808_s1 = sld [smem:[#allocation76_spill]] }
0x1970   : > { %7985 = vmatprep.subr.bf16.mxu1 %v9373_v0 }
0x1972   : > { %v4172_v11 = vld [vmem:[%s10803_s2] sm:$0xff]  ;;  %v4173_v12 = vld [vmem:[%s10803_s2 + $0x8] sm:$0xff]  ;;  %v4174_v15 = vld [vmem:[%s10803_s2 + $0x10] sm:$0xff] }
0x1973   : > { %v7986_v13 = vpack.c.bf16 %v4173_v12, %v4172_v11  ;;  %v4175_v16 = vld [vmem:[%s10803_s2 + $0x18] sm:$0xff]  ;;  %s10804_s2 = smov 88  }
0x1974   : > { %v7989_v20 = vpack.c.bf16 %v4175_v16, %v4174_v15 }
0x1975   : > { %v4257_v53 = vld [vmem:[%s10808_s1 + $0x8] sm:$0xff] }
0x19fc   : > { %v3967_v25 = vpop.xlane.xlu0 %3966 }
0x19fd   : > { %v3968_v27 = vmul.f32 0.03125, %v3967_v25 }
0x19ff   : > { %v3969_v28 = vsub.f32 %v3964_v22, %v3968_v27 }
0x1a01   : > { %v3970_v29 = vmul.f32 %v3969_v28, %v3969_v28 }
0x1a03   : > { %v3971_v30 = vsel %vm1722_vm2, %v3970_v29, 0.0 }
0x1a04   : > { %3972 = vadd.xlane.f32.xlu1 %v3971_v30  ;;  %v7273_v30 = vld [vmem:[#allocation25] ss:$0 sm:$0xff] }
0x1a91   : > { %v3973_v44 = vpop.xlane.xlu1 %3972 }
0x1a92   : > { %v3974_v45 = vmul.f32 0.03125, %v3973_v44 }
0x1a94   : > { %v3975_v46 = vadd.f32 1e-05, %v3974_v45 }
0x1a96   : > { %8498 = vrsqrt.f32 %v3975_v46 }
0x1aa0   : > { %v8499_v47 = vpop.eup %8498 }
0x1aa1   : > { %v3977_v48 = vmul.f32 %v8499_v47, %v3969_v28 }
0x1aa3   : > { %v3978_v49 = vmul.f32 %v10177_v6, %v3977_v48 }
0x1aa5   : > { %v3979_v50 = vadd.f32 %v10179_v8, %v3978_v49 }
0x1aa7   : > { %7692 = vmatmul.mubr.msk.f32.vlgmr.msra.gmra.mrb[24].mxu1 %vm1722_vm2, %v3979_v50 }
0x1aa8   : > { %7721 = vmatprep.mubr.msk.f32.mxu1 %vm9374_vm0, %v9375_v1  ;;  %7987 = vmatpush3.bf16.msra.mxu1 %v7986_v13 }
0x1aa9   : > { %7988 = vmatprep.subr.bf16.mxu1 %v9373_v0 }
0x1aac   : > { %7990 = vmatpush3.bf16.msra.mxu1 %v7989_v20 }
0x1aad   : > { %7724 = vmatprep.subr.mxu1 %v9375_v1 }
0x1b7a   : > { %v4060_v54 = vpop.f32.mrb[24].mxu1 }
0x1b7b   : > { %v4061_v55 = vadd.f32 %v7269_v14, %v4060_v54  ;;  %v7693_v19 = vpop.f32.mrb[25].mxu1 }
0x1b7d   : > { %v4064_v58 = vmax.f32 %v4061_v55, 0.0 }
0x1b7f   : > { %7711 = vmatmul.mubr.msk.f32.vlgmr.msra.gmra.mrb[32].mxu0 %vm4080_vm9, %v4064_v58 }
0x1b80   : > { %7731 = vmatprep.mubr.msk.f32.mxu0 %vm9374_vm0, %v9375_v1 }
0x1c52   : > { %v4150_v60 = vpop.f32.mrb[32].mxu0 }
0x1c53   : > { %v4151_v61 = vadd.f32 %v7271_v59, %v4150_v60  ;;  %v7712_v62 = vpop.f32.mrb[33].mxu0 }
0x1c55   : > { %v4154_v63 = vadd.f32 %v4151_v61, %v3979_v50  ;;  %v4256_v61 = vld [vmem:[%s10808_s1] sm:$0xff] }
0x1c57   : > { %v4155_v2 = vsel %vm1722_vm2, %v4154_v63, 0.0 }
0x1c58   : > { %4156 = vadd.xlane.f32.xlu0 %v4155_v2 }
0x1ce5   : > { %v4157_v3 = vpop.xlane.xlu0 %4156 }
0x1ce6   : > { %v4158_v4 = vmul.f32 0.03125, %v4157_v3 }
0x1ce8   : > { %v4159_v5 = vsub.f32 %v4154_v63, %v4158_v4 }
0x1cea   : > { %v4160_v7 = vmul.f32 %v4159_v5, %v4159_v5 }
0x1cec   : > { %v4161_v9 = vsel %vm1722_vm2, %v4160_v7, 0.0 }
0x1ced   : > { %4162 = vadd.xlane.f32.xlu0 %v4161_v9 }
0x1d7a   : > { %v4163_v21 = vpop.xlane.xlu0 %4162 }
0x1d7b   : > { %v4164_v22 = vmul.f32 0.03125, %v4163_v21 }
0x1d7d   : > { %v4165_v24 = vadd.f32 1e-05, %v4164_v22 }
0x1d7f   : > { %8500 = vrsqrt.f32 %v4165_v24 }
0x1d89   : > { %v8501_v25 = vpop.eup %8500 }
0x1d8a   : > { %v4167_v27 = vmul.f32 %v8501_v25, %v4159_v5 }
0x1d8c   : > { %v4168_v28 = vmul.f32 %v10177_v6, %v4167_v27 }
0x1d8e   : > { %v10347_v29 = vadd.f32 %v10179_v8, %v4168_v28 }
0x1d90   : > { %7722 = vmatmul.mubr.msk.f32.vlgmr.msra.gmra.mrb[26].mxu1 %vm1722_vm2, %v10347_v29 }
0x1d91   : > { %7726 = vmatprep.mubr.msk.f32.mxu1 %vm9374_vm0, %v9375_v1 }
0x1e63   : > { %v4252_v23 = vpop.f32.mrb[26].mxu1 }
0x1e64   : > { %v10353_v31 = vadd.f32 %v7273_v30, %v4252_v23  ;;  %v7723_v32 = vpop.f32.mrb[27].mxu1 }
0x1e66   : > { %4426 = vrot.lane.b32.xlu1 %v10353_v31, %s10804_s2  ;;  %4261 = vrot.lane.b32.xlu0 %v10353_v31, %s10805_s6 }
0x1e6a   : > { %4424 = vrot.lane.b32.xlu1 %v10353_v31, %s10806_s9 }
0x1ed8   : > { %v4262_v6 = vpop.permute.xlu0 %4261  ;;  %v4427_v8 = vpop.permute.xlu1 %4426 }
0x1ed9   : > { %7725 = vmatpush3.xpose.msk.msra.mxu1 %vm1803_vm3, %v4262_v6 }
0x1eda   : > { %7734 = vmatprep.subr.mxu1 %v9375_v1 }
0x1edc   : > { %7727 = vmatmul.mubr.msk.f32.vlgmr.msra.gmra.mrb[28].mxu1 %vm1803_vm3, %v10353_v31  ;;  %v4425_v10 = vpop.permute.xlu1 %4424 }
0x1edd   : > { %7735 = vmatpush3.xpose.msk.msra.mxu1 %vm1803_vm3, %v4427_v8  ;;  %7736 = vmatprep.mubr.msk.f32.mxu1 %vm9374_vm0, %v9375_v1 }
0x1ede   : > { %7744 = vmatprep.subr.mxu1 %v9375_v1 }
0x1ee0   : > { %7737 = vmatmul.mubr.msk.f32.vlgmr.msra.gmra.mrb[30].mxu1 %vm1803_vm3, %v4425_v10 }
0x1ee1   : > { %7746 = vmatprep.mubr.msk.f32.mxu1 %vm9374_vm0, %v9375_v1  ;;  %7745 = vmatpush3.msra.mxu1 %v4257_v53 }
0x1ee2   : > { %7754 = vmatprep.subr.mxu1 %v9375_v1 }
0x1faf   : > { %v4333_v33 = vpop.f32.mrb[28].mxu1 }
0x1fb0   : > { %v4334_v35 = vadd.f32 %v10373_v34, %v4333_v33  ;;  %v7728_v18 = vpop.f32.mrb[29].mxu1  ;;  %v4258_v33 = vld [vmem:[%s10808_s1 + $0x10] sm:$0xff] }
0x1fb2   : > { %v4337_v36 = vsel %vm1803_vm3, %v4334_v35, -inf }
0x1fb3   : > { %4338 = vmax.xlane.f32.xlu0 %v4337_v36  ;;  %v4498_v37 = vpop.f32.mrb[30].mxu1 }
0x1fb4   : > { %v4499_v39 = vadd.f32 %v10373_v34, %v4498_v37  ;;  %v7738_v40 = vpop.f32.mrb[31].mxu1 }
0x1fb6   : > { %v4502_v41 = vsel %vm1803_vm3, %v4499_v39, -inf }
0x1fb7   : > { %4503 = vmax.xlane.f32.xlu1 %v4502_v41 }
0x1fc8   : > { %4348 = vrot.lane.b32.xlu1 %v10353_v31, %s10807_s12  ;;  %s10809_s12 = smov 56  }
0x1fcc   : > { %4737 = vrot.lane.b32.xlu1 %v10353_v31, %s10799_s13 }
0x1fd0   : > { %4735 = vrot.lane.b32.xlu1 %v10353_v31, %s10797_s11 }
0x2040   : > { %v4339_v42 = vpop.xlane.xlu0 %4338 }
0x2041   : > { %v4340_v43 = vsub.f32 %v4334_v35, %v4339_v42 }
0x2043   : > { %v4341_v44 = vmul.f32 1.442695, %v4340_v43 }
0x2044   : > { %v4504_v45 = vpop.xlane.xlu1 %4503 }
0x2045   : > { %8502 = vpow2.f32 %v4341_v44  ;;  %v4505_v46 = vsub.f32 %v4499_v39, %v4504_v45 }
0x2047   : > { %v4506_v47 = vmul.f32 1.442695, %v4505_v46  ;;  %v4259_v46 = vld [vmem:[%s10808_s1 + $0x18] sm:$0xff] }
0x2048   : > { %v4349_v48 = vpop.permute.xlu1 %4348 }
0x2049   : > { %8504 = vpow2.f32 %v4506_v47  ;;  %7730 = vmatpush3.msra.mxu0 %v4349_v48 }
0x204a   : > { %7739 = vmatprep.subr.mxu0 %v9375_v1 }
0x204c   : > { %v4738_v2 = vpop.permute.xlu1 %4737 }
0x204f   : > { %v8503_v49 = vpop.eup %8502 }
0x2050   : > { %v4343_v50 = vsel %vm1803_vm3, %v8503_v49, 0.0  ;;  %v4736_v5 = vpop.permute.xlu1 %4735 }
0x2051   : > { %4344 = vadd.xlane.f32.xlu0 %v4343_v50 }
0x2053   : > { %v8505_v51 = vpop.eup %8504 }
0x2054   : > { %v4508_v52 = vsel %vm1803_vm3, %v8505_v51, 0.0 }
0x2055   : > { %4509 = vadd.xlane.f32.xlu0 %v4508_v52 }
0x206b   : > { %4513 = vrot.lane.b32.xlu0 %v10353_v31, %s10809_s12  ;;  %s10810_s12 = smov 48  }
0x20de   : > { %v4345_v14 = vpop.xlane.xlu0 %4344 }
0x20df   : > { %8506 = vrcp.f32 %v4345_v14 }
0x20e2   : > { %v4510_v54 = vpop.xlane.xlu0 %4509 }
0x20e3   : > { %8508 = vrcp.f32 %v4510_v54  ;;  %v7291_v54 = vld [vmem:[%s10812_s14] ss:$0 sm:$0xff]  ;;  %s10813_s14 = sld [smem:[#allocation84_spill]] }
0x20e6   : > { %v4514_v58 = vpop.permute.xlu0 %4513 }
0x20e9   : > { %v8507_v55 = vpop.eup %8506 }
0x20ea   : > { %v4347_v19 = vmul.f32 %v8507_v55, %v8503_v49 }
0x20ec   : > { %7732 = vmatmul.mubr.msk.f32.vlgmr.msra.gmra.mrb[34].mxu0 %vm1803_vm3, %v4347_v19 }
0x20ed   : > { %v8509_v59 = vpop.eup %8508  ;;  %7740 = vmatpush3.msra.mxu0 %v4514_v58  ;;  %7741 = vmatprep.mubr.msk.f32.mxu0 %vm9374_vm0, %v9375_v1 }
0x20ee   : > { %v4512_v60 = vmul.f32 %v8509_v59, %v8505_v51  ;;  %7749 = vmatprep.subr.mxu0 %v9375_v1 }
0x20f0   : > { %7742 = vmatmul.mubr.msk.f32.vlgmr.msra.gmra.mrb[36].mxu0 %vm1803_vm3, %v4512_v60 }
0x20f1   : > { %7751 = vmatprep.mubr.msk.f32.mxu0 %vm9374_vm0, %v9375_v1  ;;  %7750 = vmatpush3.msra.mxu0 %v4256_v61 }
0x20f2   : > { %7759 = vmatprep.subr.mxu0 %v9375_v1 }
0x21bf   : > { %v4420_v62 = vpop.f32.mrb[34].mxu0 }
0x21c0   : > { %v7733_v63 = vpop.f32.mrb[35].mxu0  ;;  %7752 = vmatmul.mubr.msk.f32.vlgmr.msra.gmra.mrb[38].mxu0 %vm1803_vm3, %v4420_v62 }
0x21c1   : > { %7761 = vmatprep.mubr.msk.f32.mxu0 %vm9374_vm0, %v9375_v1 }
0x21c3   : > { %v4585_v3 = vpop.f32.mrb[36].mxu0 }
0x21c4   : > { %v7743_v4 = vpop.f32.mrb[37].mxu0  ;;  %7747 = vmatmul.mubr.msk.f32.vlgmr.msra.gmra.mrb[32].mxu1 %vm1803_vm3, %v4585_v3 }
0x21c5   : > { %7755 = vmatpush3.xpose.msk.msra.mxu1 %vm1803_vm3, %v4738_v2  ;;  %7756 = vmatprep.mubr.msk.f32.mxu1 %vm9374_vm0, %v9375_v1  ;;  %v5333_v4 = vld [vmem:[#allocation30] sm:$0xff] }
0x21c6   : > { %7764 = vmatprep.subr.mxu1 %v9375_v1 }
0x21c8   : > { %7757 = vmatmul.mubr.msk.f32.vlgmr.msra.gmra.mrb[34].mxu1 %vm1803_vm3, %v4736_v5  ;;  %v5334_v5 = vld [vmem:[#allocation30 + $0x8] sm:$0xff] }
0x21c9   : > { %7766 = vmatprep.mubr.msk.f32.mxu1 %vm9374_vm0, %v9375_v1  ;;  %7765 = vmatpush3.msra.mxu1 %v4258_v33 }
0x21ca   : > { %7774 = vmatprep.subr.mxu1 %v9375_v1 }
0x2293   : > { %v4731_v7 = vpop.f32.mrb[38].mxu0 }
0x2294   : > { %v7753_v9 = vpop.f32.mrb[39].mxu0 }
0x2295   : > { %v5336_v9 = vld [vmem:[#allocation30 + $0x18] sm:$0xff] }
0x2297   : > { %v4658_v11 = vpop.f32.mrb[32].mxu1 }
0x2298   : > { %v4732_v12 = vadd.f32 %v4731_v7, %v4658_v11  ;;  %v7748_v13 = vpop.f32.mrb[33].mxu1  ;;  %v5335_v7 = vld [vmem:[#allocation30 + $0x10] sm:$0xff] }
0x2299   : > { %v8001_v11 = vpack.c.bf16 %v5336_v9, %v5335_v7 }
0x229b   : > { %v4809_v15 = vpop.f32.mrb[34].mxu1 }
0x229c   : > { %v4810_v16 = vadd.f32 %v10373_v34, %v4809_v15  ;;  %v7758_v20 = vpop.f32.mrb[35].mxu1  ;;  %v5251_v15 = vld [vmem:[#allocation27 + $0x10] sm:$0xff] }
0x229e   : > { %v4813_v21 = vsel %vm1803_vm3, %v4810_v16, -inf }
0x229f   : > { %4814 = vmax.xlane.f32.xlu0 %v4813_v21 }
0x22b5   : > { %4824 = vrot.lane.b32.xlu0 %v10353_v31, %s10810_s12  ;;  %s10811_s12 = smov 40  }
0x22b9   : > { %4974 = vrot.lane.b32.xlu0 %v10353_v31, %s10798_s7 }
0x232c   : > { %v4815_v22 = vpop.xlane.xlu0 %4814 }
0x232d   : > { %v4816_v24 = vsub.f32 %v4810_v16, %v4815_v22  ;;  %v5252_v16 = vld [vmem:[#allocation27 + $0x18] sm:$0xff] }
0x232e   : > { %v7995_v20 = vpack.c.bf16 %v5252_v16, %v5251_v15 }
0x232f   : > { %v4817_v25 = vmul.f32 1.442695, %v4816_v24 }
0x2330   : > { %v4825_v27 = vpop.permute.xlu0 %4824 }
0x2331   : > { %8510 = vpow2.f32 %v4817_v25  ;;  %7760 = vmatpush3.msra.mxu0 %v4825_v27  ;;  %v10459_v25 = vld [vmem:[#allocation22] ss:$0 sm:$0xff] }
0x2332   : > { %7769 = vmatprep.subr.mxu0 %v9375_v1 }
0x2334   : > { %v4975_v10 = vpop.permute.xlu0 %4974 }
0x233b   : > { %v8511_v28 = vpop.eup %8510 }
0x233c   : > { %v4819_v30 = vsel %vm1803_vm3, %v8511_v28, 0.0 }
0x233d   : > { %4820 = vadd.xlane.f32.xlu1 %v4819_v30 }
0x234e   : > { %4976 = vrot.lane.b32.xlu1 %v10353_v31, %s10800_s4 }
0x23ca   : > { %v4821_v23 = vpop.xlane.xlu1 %4820 }
0x23cb   : > { %8512 = vrcp.f32 %v4821_v23 }
0x23ce   : > { %v4977_v8 = vpop.permute.xlu1 %4976 }
0x23d5   : > { %v8513_v32 = vpop.eup %8512 }
0x23d6   : > { %v4823_v6 = vmul.f32 %v8513_v32, %v8511_v28  ;;  %v10461_v28 = vld [vmem:[#allocation24] ss:$0 sm:$0xff]  ;;  %v7296_v32 = vld [vmem:[#allocation31] ss:$0 sm:$0xff] }
0x23d8   : > { %7762 = vmatmul.mubr.msk.f32.vlgmr.msra.gmra.mrb[40].mxu0 %vm1803_vm3, %v4823_v6 }
0x23d9   : > { %7770 = vmatpush3.xpose.msk.msra.mxu0 %vm1803_vm3, %v4977_v8  ;;  %7771 = vmatprep.mubr.msk.f32.mxu0 %vm9374_vm0, %v9375_v1 }
0x23da   : > { %7779 = vmatprep.subr.mxu0 %v9375_v1 }
0x23dc   : > { %7772 = vmatmul.mubr.msk.f32.vlgmr.msra.gmra.mrb[42].mxu0 %vm1803_vm3, %v4975_v10 }
0x23dd   : > { %7781 = vmatprep.mubr.msk.f32.mxu0 %vm9374_vm0, %v9375_v1  ;;  %7780 = vmatpush3.msra.mxu0 %v4259_v46 }
0x24ab   : > { %v4896_v35 = vpop.f32.mrb[40].mxu0 }
0x24ac   : > { %v7763_v18 = vpop.f32.mrb[41].mxu0  ;;  %7767 = vmatmul.mubr.msk.f32.vlgmr.msra.gmra.mrb[36].mxu1 %vm1803_vm3, %v4896_v35 }
0x24ad   : > { %7776 = vmatprep.mubr.msk.f32.mxu1 %vm9374_vm0, %v9375_v1 }
0x24af   : > { %v5048_v36 = vpop.f32.mrb[42].mxu0 }
0x24b0   : > { %v5049_v37 = vadd.f32 %v10373_v34, %v5048_v36  ;;  %v7773_v39 = vpop.f32.mrb[43].mxu0  ;;  %v7294_v36 = vld [vmem:[#allocation28] ss:$0 sm:$0xff] }
0x24b2   : > { %v5052_v40 = vsel %vm1803_vm3, %v5049_v37, -inf }
0x24b3   : > { %5053 = vmax.xlane.f32.xlu1 %v5052_v40 }
0x2540   : > { %v5054_v41 = vpop.xlane.xlu1 %5053 }
0x2541   : > { %v5055_v42 = vsub.f32 %v5049_v37, %v5054_v41 }
0x2543   : > { %v5056_v43 = vmul.f32 1.442695, %v5055_v42 }
0x2545   : > { %8514 = vpow2.f32 %v5056_v43 }
0x254f   : > { %v8515_v44 = vpop.eup %8514 }
0x2550   : > { %v5058_v45 = vsel %vm1803_vm3, %v8515_v44, 0.0 }
0x2551   : > { %5059 = vadd.xlane.f32.xlu0 %v5058_v45 }
0x2567   : > { %5063 = vrot.lane.b32.xlu0 %v10353_v31, %s10811_s12 }
0x257f   : > { %v4969_v47 = vpop.f32.mrb[36].mxu1 }
0x2580   : > { %v4973_v48 = vadd.f32 %v4969_v47, %v4732_v12  ;;  %v7768_v34 = vpop.f32.mrb[37].mxu1  ;;  %v5250_v12 = vld [vmem:[#allocation27 + $0x8] sm:$0xff] }
0x25de   : > { %v5060_v49 = vpop.xlane.xlu0 %5059 }
0x25df   : > { %8516 = vrcp.f32 %v5060_v49 }
0x25e2   : > { %v5064_v50 = vpop.permute.xlu0 %5063 }
0x25e3   : > { %7775 = vmatpush3.msra.mxu1 %v5064_v50 }
0x25e4   : > { %7991 = vmatprep.subr.bf16.mxu1 %v9373_v0 }
0x25e9   : > { %v8517_v51 = vpop.eup %8516 }
0x25ea   : > { %v5062_v52 = vmul.f32 %v8517_v51, %v8515_v44 }
0x25ec   : > { %7777 = vmatmul.mubr.msk.f32.vlgmr.msra.gmra.mrb[38].mxu1 %vm1803_vm3, %v5062_v52 }
0x25ed   : > { %7792 = vmatprep.mubr.msk.f32.mxu1 %vm9374_vm0, %v9375_v1 }
0x26bf   : > { %v5135_v31 = vpop.f32.mrb[38].mxu1 }
0x26c0   : > { %v7778_v53 = vpop.f32.mrb[39].mxu1  ;;  %7782 = vmatmul.mubr.msk.f32.vlgmr.msra.gmra.mrb[44].mxu0 %vm1803_vm3, %v5135_v31 }
0x26c1   : > { %7803 = vmatprep.mubr.msk.f32.mxu0 %vm1722_vm2, %v10160_v56  ;;  %v7997_v56 = vpack.c.bf16 %v5334_v5, %v5333_v4 }
0x26c3   : > { %7998 = vmatprep.subr.bf16.mxu0 %v7997_v56 }
0x26c4   : > { %8000 = vmatpush3.bf16.msra.mxu0 %v7997_v56 }
0x26c5   : > { %8002 = vmatprep.subr.bf16.mxu0 %v8001_v11 }
0x26c8   : > { %8004 = vmatpush3.bf16.msra.mxu0 %v8001_v11 }
0x26c9   : > { %8009 = vmatprep.subr.bf16.mxu0 %v9373_v0 }
0x26cb   : > { %7804 = vmatmul.mubr.msk.f32.vlgmr.msra.gmra.mrb[46].mxu0 %vm1722_vm2, %v10163_v57 }
0x26cc   : > { %7817 = vmatprep.mubr.msk.f32.mxu0 %vm9374_vm0, %v9375_v1 }
0x2793   : > { %v5208_v14 = vpop.f32.mrb[44].mxu0 }
0x2794   : > { %v5212_v55 = vadd.f32 %v5208_v14, %v4973_v48  ;;  %v7783_v19 = vpop.f32.mrb[45].mxu0 }
0x2796   : > { %v5220_v58 = vadd.f32 %v7291_v54, %v5212_v55 }
0x2798   : > { %v5221_v59 = vadd.f32 %v5220_v58, %v10347_v29  ;;  %v5249_v29 = vld [vmem:[#allocation27] sm:$0xff] }
0x2799   : > { %v7992_v13 = vpack.c.bf16 %v5250_v12, %v5249_v29 }
0x279a   : > { %v5222_v60 = vsel %vm1722_vm2, %v5221_v59, 0.0 }
0x279b   : > { %5223 = vadd.xlane.f32.xlu1 %v5222_v60  ;;  %7993 = vmatpush3.bf16.msra.mxu1 %v7992_v13 }
0x279c   : > { %7994 = vmatprep.subr.bf16.mxu1 %v9373_v0 }
0x279e   : > { %v7805_v6 = vpop.f32.mrb[46].mxu0 }
0x279f   : > { %7996 = vmatpush3.bf16.msra.mxu1 %v7995_v20  ;;  %v5416_v8 = vadd.f32 %v7805_v6, %v7296_v32  ;;  %v5410_v10 = vpop.f32.mrb[47].mxu0 }
0x27a0   : > { %8005 = vmatprep.subr.bf16.mxu1 %v9373_v0  ;;  %v5411_v33 = vadd.f32 %v7296_v32, %v5410_v10 }
0x27a2   : > { %v10471_v35 = vpack.i.bf16 %v5416_v8, %v5411_v33  ;;  %v8006_v18 = vpack.c.bf16 %v5416_v8, %v5411_v33 }
0x27a4   : > { %8434 = vrot.lane.b32.xlu0 %v10471_v35, %s10806_s9 }
0x2816   : > { %v8435_v31 = vpop.permute.xlu0 %8434 }
0x2817   : > { %v8437_v14 = vunpack.i.h.bf16 %v8435_v31  ;;  %v8436_v54 = vunpack.i.l.bf16 %v8435_v31 }
0x2819   : > { %v8014_v19 = vpack.c.bf16 %v8437_v14, %v8436_v54 }
0x2828   : > { %v5224_v61 = vpop.xlane.xlu1 %5223 }
0x2829   : > { %v5225_v62 = vmul.f32 0.03125, %v5224_v61 }
0x282b   : > { %v5226_v63 = vsub.f32 %v5221_v59, %v5225_v62  ;;  %v5419_v59 = vld [vmem:[#allocation33] sm:$0xff] }
0x282d   : > { %v5227_v2 = vmul.f32 %v5226_v63, %v5226_v63 }
0x282f   : > { %v5228_v3 = vsel %vm1722_vm2, %v5227_v2, 0.0 }
0x2830   : > { %5229 = vadd.xlane.f32.xlu1 %v5228_v3 }
0x28bd   : > { %v5230_v21 = vpop.xlane.xlu1 %5229 }
0x28be   : > { %v5231_v22 = vmul.f32 0.03125, %v5230_v21 }
0x28c0   : > { %v5232_v24 = vadd.f32 1e-05, %v5231_v22 }
0x28c2   : > { %8518 = vrsqrt.f32 %v5232_v24 }
0x28cc   : > { %v8519_v57 = vpop.eup %8518 }
0x28cd   : > { %v5234_v27 = vmul.f32 %v8519_v57, %v5226_v63  ;;  %v10508_v63 = vld [vmem:[%s10208_s28] sm:$0xff]  ;;  %v5420_v57 = vld [vmem:[#allocation33 + $0x8] sm:$0xff] }
0x28cf   : > { %v5241_v30 = vmul.f32 %v10459_v25, %v5234_v27 }
0x28d1   : > { %v10465_v23 = vadd.f32 %v10461_v28, %v5241_v30 }
0x28d3   : > { %7793 = vmatmul.mubr.msk.f32.vlgmr.msra.gmra.mrb[40].mxu1 %vm1722_vm2, %v10465_v23 }
0x28d4   : > { %7810 = vmatprep.mubr.msk.f32.mxu1 %vm9374_vm0, %v9375_v1  ;;  %8008 = vmatpush3.bf16.xpose.msk.msra.mxu1 %vm10191_vm4, %v8006_v18 }
0x28d5   : > { %8017 = vmatprep.subr.bf16.mxu1 %v9373_v0 }
0x29a6   : > { %v5329_v37 = vpop.f32.mrb[40].mxu1 }
0x29a7   : > { %v10478_v39 = vadd.f32 %v7294_v36, %v5329_v37  ;;  %v7794_v40 = vpop.f32.mrb[41].mxu1 }
0x29a9   : > { %5593 = vrot.lane.b32.xlu0 %v10478_v39, %s10806_s9  ;;  %7811 = vmatmul.mubr.msk.f32.vlgmr.msra.gmra.mrb[42].mxu1 %vm1803_vm3, %v10478_v39  ;;  %s10816_s9 = sld [smem:[#allocation57_spill]] }
0x29aa   : > { %7831 = vmatprep.mubr.msk.f32.mxu1 %vm9374_vm0, %v9375_v1 }
0x2a1b   : > { %v5594_v58 = vpop.permute.xlu0 %5593 }
0x2a7c   : > { %v5498_v41 = vpop.f32.mrb[42].mxu1 }
0x2a7d   : > { %v5499_v42 = vadd.f32 %v5498_v41, %v10211_v26  ;;  %v7812_v43 = vpop.f32.mrb[43].mxu1 }
0x2a7f   : > { %v5502_v44 = vsel %vm3050_vm5, %v5499_v42, -inf }
0x2a80   : > { %5503 = vmax.xlane.f32.xlu1 %v5502_v44 }
0x2b0d   : > { %v5504_v45 = vpop.xlane.xlu1 %5503 }
0x2b0e   : > { %v5505_v46 = vsub.f32 %v5499_v42, %v5504_v45 }
0x2b10   : > { %v5506_v47 = vmul.f32 1.442695, %v5505_v46 }
0x2b12   : > { %8520 = vpow2.f32 %v5506_v47 }
0x2b1c   : > { %v8521_v48 = vpop.eup %8520 }
0x2b1d   : > { %v5508_v34 = vsel %vm3050_vm5, %v8521_v48, 0.0 }
0x2b1e   : > { %5509 = vadd.xlane.f32.xlu1 %v5508_v34 }
0x2b2f   : > { %8429 = vrot.lane.b32.xlu1 %v10471_v35, %s10805_s6 }
0x2bab   : > { %v5510_v49 = vpop.xlane.xlu1 %5509 }
0x2bac   : > { %8522 = vrcp.f32 %v5510_v49 }
0x2baf   : > { %v8430_v50 = vpop.permute.xlu1 %8429 }
0x2bb0   : > { %v8432_v51 = vunpack.i.h.bf16 %v8430_v50  ;;  %v8431_v26 = vunpack.i.l.bf16 %v8430_v50 }
0x2bb2   : > { %v8010_v52 = vpack.c.bf16 %v8432_v51, %v8431_v26 }
0x2bb4   : > { %8012 = vmatpush3.bf16.msk.msra.mxu0 %vm10218_vm8, %v8010_v52 }
0x2bb5   : > { %8013 = vmatprep.subr.bf16.mxu0 %v9373_v0 }
0x2bb6   : > { %v8523_v53 = vpop.eup %8522 }
0x2bb7   : > { %v5512_v55 = vmul.f32 %v8523_v53, %v8521_v48 }
0x2bb9   : > { %7818 = vmatmul.mubr.msk.f32.vlgmr.msra.gmra.mrb[48].mxu0 %vm3050_vm5, %v5512_v55 }
0x2bba   : > { %7824 = vmatprep.mubr.msk.f32.mxu0 %vm9374_vm0, %v9375_v1 }
0x2bbd   : > { %8016 = vmatpush3.bf16.xpose.msk.msra.mxu0 %vm10191_vm4, %v8014_v19 }
0x2bbe   : > { %7839 = vmatprep.subr.mxu0 %v9375_v1 }
0x2bc4   : > { %7825 = vmatmul.mubr.msk.f32.vlgmr.msra.gmra.mrb[50].mxu0 %vm1803_vm3, %v5594_v58 }
0x2bc5   : > { %7841 = vmatprep.mubr.msk.f32.mxu0 %vm9374_vm0, %v9375_v1  ;;  %7840 = vmatpush3.msra.mxu0 %v5419_v59 }
0x2bc6   : > { %8025 = vmatprep.subr.bf16.mxu0 %v9373_v0 }
0x2c8c   : > { %v5589_v60 = vpop.f32.mrb[48].mxu0 }
0x2c8d   : > { %v7819_v61 = vpop.f32.mrb[49].mxu0  ;;  %7842 = vmatmul.mubr.msk.f32.vlgmr.msra.gmra.mrb[52].mxu0 %vm1803_vm3, %v5589_v60 }
0x2c8e   : > { %7855 = vmatprep.mubr.msk.f32.mxu0 %vm9374_vm0, %v9375_v1 }
0x2c97   : > { %v5671_v62 = vpop.f32.mrb[50].mxu0 }
0x2c98   : > { %v5672_v2 = vadd.f32 %v10508_v63, %v5671_v62  ;;  %v7826_v3 = vpop.f32.mrb[51].mxu0 }
0x2c99   : > { %v5421_v3 = vld [vmem:[#allocation33 + $0x10] sm:$0xff] }
0x2c9a   : > { %v5675_v4 = vsel %vm3050_vm5, %v5672_v2, -inf }
0x2c9b   : > { %5676 = vmax.xlane.f32.xlu0 %v5675_v4 }
0x2cb1   : > { %8439 = vrot.lane.b32.xlu0 %v10471_v35, %s10804_s2  ;;  %s7215_s2 = sshll.u32 %s10823_s18, 1 }
0x2cb5   : > { %5912 = vrot.lane.b32.xlu0 %v10478_v39, %s10797_s11 }
0x2cb9   : > { %8449 = vrot.lane.b32.xlu0 %v10471_v35, %s10798_s7 }
0x2d28   : > { %v5677_v5 = vpop.xlane.xlu0 %5676 }
0x2d29   : > { %v5678_v56 = vsub.f32 %v5672_v2, %v5677_v5 }
0x2d2b   : > { %v5679_v7 = vmul.f32 1.442695, %v5678_v56 }
0x2d2c   : > { %v8440_v9 = vpop.permute.xlu0 %8439 }
0x2d2d   : > { %8524 = vpow2.f32 %v5679_v7  ;;  %v8442_v11 = vunpack.i.h.bf16 %v8440_v9  ;;  %v8441_v29 = vunpack.i.l.bf16 %v8440_v9 }
0x2d2f   : > { %v8018_v12 = vpack.c.bf16 %v8442_v11, %v8441_v29 }
0x2d30   : > { %v5913_v30 = vpop.permute.xlu0 %5912 }
0x2d31   : > { %8020 = vmatpush3.bf16.msk.msra.mxu1 %vm10218_vm8, %v8018_v12 }
0x2d32   : > { %7834 = vmatprep.subr.mxu1 %v9375_v1 }
0x2d34   : > { %v8450_v33 = vpop.permute.xlu0 %8449 }
0x2d35   : > { %v8452_v36 = vunpack.i.h.bf16 %v8450_v33  ;;  %v8451_v37 = vunpack.i.l.bf16 %v8450_v33 }
0x2d37   : > { %v8525_v13 = vpop.eup %8524 }
0x2d38   : > { %v5681_v15 = vsel %vm3050_vm5, %v8525_v13, 0.0 }
0x2d39   : > { %5682 = vadd.xlane.f32.xlu1 %v5681_v15 }
0x2d4a   : > { %8444 = vrot.lane.b32.xlu1 %v10471_v35, %s10797_s11 }
0x2d4e   : > { %6159 = vrot.lane.b32.xlu1 %v10478_v39, %s10798_s7  ;;  %v8030_v39 = vpack.c.bf16 %v8452_v36, %v8451_v37  ;;  %v6430_v37 = vld [vmem:[%s10813_s14] sm:$0xff] }
0x2d60   : > { %v5908_v16 = vpop.f32.mrb[52].mxu0 }
0x2d61   : > { %v7843_v20 = vpop.f32.mrb[53].mxu0 }
0x2dc6   : > { %v5683_v21 = vpop.xlane.xlu1 %5682 }
0x2dc7   : > { %8526 = vrcp.f32 %v5683_v21 }
0x2dca   : > { %v8445_v27 = vpop.permute.xlu1 %8444 }
0x2dcb   : > { %v8447_v32 = vunpack.i.h.bf16 %v8445_v27  ;;  %v8446_v6 = vunpack.i.l.bf16 %v8445_v27 }
0x2dcd   : > { %v8022_v8 = vpack.c.bf16 %v8447_v32, %v8446_v6 }
0x2dce   : > { %v6160_v40 = vpop.permute.xlu1 %6159 }
0x2dd1   : > { %v8527_v22 = vpop.eup %8526 }
0x2dd2   : > { %v5685_v24 = vmul.f32 %v8527_v22, %v8525_v13  ;;  %v5422_v13 = vld [vmem:[#allocation33 + $0x18] sm:$0xff] }
0x2dd4   : > { %7832 = vmatmul.mubr.msk.f32.vlgmr.msra.gmra.mrb[44].mxu1 %vm3050_vm5, %v5685_v24  ;;  %v7323_v24 = vld [vmem:[#allocation34] ss:$0 sm:$0xff] }
0x2dd5   : > { %7835 = vmatpush3.msra.mxu1 %v5420_v57  ;;  %7836 = vmatprep.mubr.msk.f32.mxu1 %vm9374_vm0, %v9375_v1 }
0x2dd6   : > { %8021 = vmatprep.subr.bf16.mxu1 %v9373_v0 }
0x2ea7   : > { %v5762_v10 = vpop.f32.mrb[44].mxu1 }
0x2ea8   : > { %v7833_v18 = vpop.f32.mrb[45].mxu1  ;;  %7837 = vmatmul.mubr.msk.f32.vlgmr.msra.gmra.mrb[46].mxu1 %vm1803_vm3, %v5762_v10 }
0x2ea9   : > { %8024 = vmatpush3.bf16.xpose.msk.msra.mxu1 %vm10191_vm4, %v8022_v8  ;;  %7848 = vmatprep.mubr.msk.f32.mxu1 %vm9374_vm0, %v9375_v1 }
0x2eaa   : > { %8029 = vmatprep.subr.bf16.mxu1 %v9373_v0 }
0x2eb0   : > { %7849 = vmatmul.mubr.msk.f32.vlgmr.msra.gmra.mrb[48].mxu1 %vm1803_vm3, %v5913_v30 }
0x2eb1   : > { %8032 = vmatpush3.bf16.xpose.msk.msra.mxu1 %vm10191_vm4, %v8030_v39  ;;  %7867 = vmatprep.mubr.msk.f32.mxu1 %vm9374_vm0, %v9375_v1  ;;  %v6431_v39 = vld [vmem:[%s10813_s14 + $0x8] sm:$0xff] }
0x2eb2   : > { %8037 = vmatprep.subr.bf16.mxu1 %v9373_v0 }
0x2eb8   : > { %7868 = vmatmul.mubr.msk.f32.vlgmr.msra.gmra.mrb[50].mxu1 %vm1803_vm3, %v6160_v40  ;;  %v8038_v40 = vpack.c.bf16 %v6431_v39, %v6430_v37 }
0x2eb9   : > { %7890 = vmatprep.mubr.msk.f32.mxu1 %vm9374_vm0, %v9375_v1 }
0x2eba   : > { %8039 = vmatpush3.bf16.msra.mxu1 %v8038_v40 }
0x2ebb   : > { %8040 = vmatprep.subr.bf16.mxu1 %v9373_v0 }
0x2f7b   : > { %v5835_v41 = vpop.f32.mrb[46].mxu1 }
0x2f7c   : > { %v10545_v42 = vadd.f32 %v5908_v16, %v5835_v41  ;;  %v7838_v43 = vpop.f32.mrb[47].mxu1  ;;  %v6433_v41 = vld [vmem:[%s10813_s14 + $0x18] sm:$0xff] }
0x2f83   : > { %v5990_v44 = vpop.f32.mrb[48].mxu1 }
0x2f84   : > { %v5991_v45 = vadd.f32 %v10508_v63, %v5990_v44  ;;  %v7850_v17 = vpop.f32.mrb[49].mxu1 }
0x2f86   : > { %v5994_v46 = vsel %vm3050_vm5, %v5991_v45, -inf }
0x2f87   : > { %5995 = vmax.xlane.f32.xlu0 %v5994_v46 }
0x2f8b   : > { %v6237_v47 = vpop.f32.mrb[50].mxu1 }
0x2f8c   : > { %v7869_v48 = vpop.f32.mrb[51].mxu1  ;;  %v6238_v14 = vadd.f32 %v10508_v63, %v6237_v47 }
0x2f8e   : > { %v6241_v55 = vsel %vm3050_vm5, %v6238_v14, -inf }
0x2f9d   : > { %8454 = vrot.lane.b32.xlu0 %v10471_v35, %s10799_s13  ;;  %s10814_s13 = sld [smem:[#allocation85_spill]] }
0x2fa3   : > { %v6515_v43 = vld [vmem:[%s10814_s13] sm:$0xff]  ;;  %v6516_v44 = vld [vmem:[%s10814_s13 + $0x8] sm:$0xff]  ;;  %v6518_v46 = vld [vmem:[%s10814_s13 + $0x18] sm:$0xff] }
0x2fa4   : > { %v8044_v17 = vpack.c.bf16 %v6516_v44, %v6515_v43  ;;  %v6519_v48 = vld [vmem:[%s10814_s13 + $0x20] sm:$0xff] }
0x3014   : > { %v5996_v34 = vpop.xlane.xlu0 %5995 }
0x3015   : > { %v5997_v49 = vsub.f32 %v5991_v45, %v5996_v34  ;;  %v6517_v45 = vld [vmem:[%s10814_s13 + $0x10] sm:$0xff]  ;;  %v6520_v34 = vld [vmem:[%s10814_s13 + $0x28] sm:$0xff] }
0x3016   : > { %v8047_v47 = vpack.c.bf16 %v6518_v46, %v6517_v45 }
0x3017   : > { %v5998_v50 = vmul.f32 1.442695, %v5997_v49  ;;  %v8050_v49 = vpack.c.bf16 %v6520_v34, %v6519_v48 }
0x3018   : > { %v8455_v51 = vpop.permute.xlu0 %8454 }
0x3019   : > { %8528 = vpow2.f32 %v5998_v50  ;;  %v8457_v26 = vunpack.i.h.bf16 %v8455_v51  ;;  %v8456_v52 = vunpack.i.l.bf16 %v8455_v51 }
0x301b   : > { %v8026_v31 = vpack.c.bf16 %v8457_v26, %v8456_v52 }
0x301d   : > { %8028 = vmatpush3.bf16.msk.msra.mxu0 %vm10218_vm8, %v8026_v31 }
0x301e   : > { %7858 = vmatprep.subr.mxu0 %v9375_v1 }
0x3023   : > { %v8529_v53 = vpop.eup %8528 }
0x3024   : > { %v6000_v54 = vsel %vm3050_vm5, %v8529_v53, 0.0 }
0x3025   : > { %6001 = vadd.xlane.f32.xlu1 %v6000_v54  ;;  %v6521_v54 = vld [vmem:[%s10814_s13 + $0x30] sm:$0xff] }
0x3029   : > { %6242 = vmax.xlane.f32.xlu1 %v6241_v55  ;;  %v6522_v55 = vld [vmem:[%s10814_s13 + $0x38] sm:$0xff] }
0x30b2   : > { %v6002_v19 = vpop.xlane.xlu1 %6001 }
0x30b3   : > { %8530 = vrcp.f32 %v6002_v19  ;;  %v8053_v19 = vpack.c.bf16 %v6522_v55, %v6521_v54  ;;  %v6669_v55 = vld [vmem:[%s10816_s9 + $0x20] sm:$0xff] }
0x30b6   : > { %v6243_v58 = vpop.xlane.xlu1 %6242 }
0x30b7   : > { %v6244_v59 = vsub.f32 %v6238_v14, %v6243_v58  ;;  %v7324_v58 = vld [vmem:[#allocation36] ss:$0 sm:$0xff] }
0x30b9   : > { %v6245_v60 = vmul.f32 1.442695, %v6244_v59 }
0x30bb   : > { %8532 = vpow2.f32 %v6245_v60 }
0x30bd   : > { %v8531_v61 = vpop.eup %8530 }
0x30be   : > { %v6004_v62 = vmul.f32 %v8531_v61, %v8529_v53 }
0x30c0   : > { %7856 = vmatmul.mubr.msk.f32.vlgmr.msra.gmra.mrb[54].mxu0 %vm3050_vm5, %v6004_v62  ;;  %v7326_v62 = vld [vmem:[#allocation37] ss:$0 sm:$0xff] }
0x30c1   : > { %7860 = vmatprep.mubr.msk.f32.mxu0 %vm9374_vm0, %v9375_v1  ;;  %7859 = vmatpush3.msra.mxu0 %v5421_v3 }
0x30c2   : > { %8033 = vmatprep.subr.bf16.mxu0 %v9373_v0 }
0x30c5   : > { %v8533_v63 = vpop.eup %8532 }
0x30c6   : > { %v6247_v2 = vsel %vm3050_vm5, %v8533_v63, 0.0 }
0x30c7   : > { %6248 = vadd.xlane.f32.xlu1 %v6247_v2 }
0x30d8   : > { %8459 = vrot.lane.b32.xlu1 %v10471_v35, %s10800_s4  ;;  %s10815_s4 = sld [smem:[#allocation56_spill]] }
0x30de   : > { %s1616_s6 = scalar_lea.vmem %s10815_s4, %s10071_s5  ;;  %s10817_s5 = sld [smem:[#allocation86_spill]] }
0x30e4   : > { %s1620_s28 = scalar_lea.vmem %s10817_s5, %s7215_s2 }
0x3154   : > { %v6249_v4 = vpop.xlane.xlu1 %6248 }
0x3155   : > { %8534 = vrcp.f32 %v6249_v4 }
0x3158   : > { %v8460_v5 = vpop.permute.xlu1 %8459 }
0x3159   : > { %v8462_v56 = vunpack.i.h.bf16 %v8460_v5  ;;  %v8461_v7 = vunpack.i.l.bf16 %v8460_v5 }
0x315b   : > { %v8034_v11 = vpack.c.bf16 %v8462_v56, %v8461_v7 }
0x315f   : > { %v8535_v9 = vpop.eup %8534 }
0x3160   : > { %v6251_v35 = vmul.f32 %v8535_v9, %v8533_v63 }
0x3193   : > { %v6081_v29 = vpop.f32.mrb[54].mxu0 }
0x3194   : > { %v7857_v12 = vpop.f32.mrb[55].mxu0  ;;  %7861 = vmatmul.mubr.msk.f32.vlgmr.msra.gmra.mrb[56].mxu0 %vm1803_vm3, %v6081_v29 }
0x3195   : > { %8036 = vmatpush3.bf16.msk.msra.mxu0 %vm10218_vm8, %v8034_v11  ;;  %7874 = vmatprep.mubr.msk.f32.mxu0 %vm9374_vm0, %v9375_v1 }
0x3196   : > { %7877 = vmatprep.subr.mxu0 %v9375_v1 }
0x3198   : > { %7875 = vmatmul.mubr.msk.f32.vlgmr.msra.gmra.mrb[58].mxu0 %vm3050_vm5, %v6251_v35 }
0x3199   : > { %7879 = vmatprep.mubr.msk.f32.mxu0 %vm9374_vm0, %v9375_v1  ;;  %7878 = vmatpush3.msra.mxu0 %v5422_v13 }
0x319a   : > { %8043 = vmatprep.subr.bf16.mxu0 %v9373_v0 }
0x3267   : > { %v6154_v15 = vpop.f32.mrb[56].mxu0 }
0x3268   : > { %v6158_v16 = vadd.f32 %v6154_v15, %v10545_v42  ;;  %v7862_v38 = vpop.f32.mrb[57].mxu0 }
0x326b   : > { %v6328_v20 = vpop.f32.mrb[58].mxu0 }
0x326c   : > { %v7876_v21 = vpop.f32.mrb[59].mxu0  ;;  %7880 = vmatmul.mubr.msk.f32.vlgmr.msra.gmra.mrb[60].mxu0 %vm1803_vm3, %v6328_v20 }
0x326d   : > { %7909 = vmatprep.mubr.msk.f32.mxu0 %vm9374_vm0, %v9375_v1  ;;  %8045 = vmatpush3.bf16.msra.mxu0 %v8044_v17 }
0x326e   : > { %8046 = vmatprep.subr.bf16.mxu0 %v9373_v0 }
0x3271   : > { %8048 = vmatpush3.bf16.msra.mxu0 %v8047_v47 }
0x3272   : > { %8049 = vmatprep.subr.bf16.mxu0 %v9373_v0 }
0x3275   : > { %8051 = vmatpush3.bf16.msra.mxu0 %v8050_v49  ;;  %v6666_v49 = vld [vmem:[%s10816_s9 + $0x8] sm:$0xff] }
0x3276   : > { %8052 = vmatprep.subr.bf16.mxu0 %v9373_v0 }
0x3279   : > { %8054 = vmatpush3.bf16.msra.mxu0 %v8053_v19  ;;  %v6671_v19 = vld [vmem:[%s10816_s9 + $0x30] sm:$0xff] }
0x333f   : > { %v6401_v22 = vpop.f32.mrb[60].mxu0 }
0x3340   : > { %v6405_v57 = vadd.f32 %v6401_v22, %v6158_v16  ;;  %v7881_v27 = vpop.f32.mrb[61].mxu0  ;;  %v9388_v22 = vmov 0  }
0x3341   : > { %8463 = vset.pattern.permute.xlu0 %v9388_v22 }
0x3342   : > { %v6413_v30 = vadd.f32 %v7323_v24, %v6405_v57 }
0x3344   : > { %v6414_v32 = vadd.f32 %v6413_v30, %v10465_v23  ;;  %v6432_v23 = vld [vmem:[%s10813_s14 + $0x10] sm:$0xff]  ;;  %v6630_v30 = vld [vmem:[%s1616_s6] sm:$0xff] }
0x3345   : > { %v8041_v42 = vpack.c.bf16 %v6433_v41, %v6432_v23 }
0x3346   : > { %v6415_v6 = vsel %vm1722_vm2, %v6414_v32, 0.0 }
0x3347   : > { %6416 = vadd.xlane.f32.xlu0 %v6415_v6  ;;  %8042 = vmatpush3.bf16.msra.mxu1 %v8041_v42 }
0x33d4   : > { %v6417_v8 = vpop.xlane.xlu0 %6416 }
0x33d5   : > { %v6418_v10 = vmul.f32 0.03125, %v6417_v8 }
0x33d7   : > { %v6419_v33 = vsub.f32 %v6414_v32, %v6418_v10 }
0x33d9   : > { %v6420_v18 = vmul.f32 %v6419_v33, %v6419_v33 }
0x33db   : > { %v6421_v36 = vsel %vm1722_vm2, %v6420_v18, 0.0 }
0x33dc   : > { %6422 = vadd.xlane.f32.xlu1 %v6421_v36 }
0x3469   : > { %v6423_v50 = vpop.xlane.xlu1 %6422 }
0x346a   : > { %v6424_v51 = vmul.f32 0.03125, %v6423_v50  ;;  %v6668_v50 = vld [vmem:[%s10816_s9 + $0x18] sm:$0xff] }
0x346c   : > { %v6425_v26 = vadd.f32 1e-05, %v6424_v51  ;;  %v8055_v51 = vpack.c.bf16 %v6668_v50, %v6666_v49 }
0x346e   : > { %8536 = vrsqrt.f32 %v6425_v26  ;;  %v6665_v26 = vld [vmem:[%s10816_s9] sm:$0xff]  ;;  %8056 = vmatprep.subr.bf16.mxu1 %v8055_v51 }
0x3478   : > { %v8537_v52 = vpop.eup %8536 }
0x3479   : > { %v6427_v31 = vmul.f32 %v8537_v52, %v6419_v33  ;;  %v6667_v52 = vld [vmem:[%s10816_s9 + $0x10] sm:$0xff] }
0x347b   : > { %v6428_v53 = vmul.f32 %v10459_v25, %v6427_v31  ;;  %v8057_v31 = vpack.c.bf16 %v6667_v52, %v6665_v26 }
0x347d   : > { %v6429_v14 = vadd.f32 %v10461_v28, %v6428_v53  ;;  %v6670_v53 = vld [vmem:[%s10816_s9 + $0x28] sm:$0xff] }
0x347f   : > { %7891 = vmatmul.mubr.msk.f32.vlgmr.msra.gmra.mrb[52].mxu1 %vm1722_vm2, %v6429_v14 }
0x3480   : > { %6752 = vmatprep.mubr.f32.mxu1 %v9375_v1  ;;  %8058 = vmatpush1.bf16.msra.mxu1 %v8057_v31 }
0x3552   : > { %v6510_v0 = vpop.f32.mrb[52].mxu1 }
0x3553   : > { %v6511_v59 = vadd.f32 %v7324_v58, %v6510_v0  ;;  %v7892_v60 = vpop.f32.mrb[53].mxu1  ;;  %v8061_v58 = vpack.c.bf16 %v6671_v19, %v6669_v55 }
0x3555   : > { %v6514_v61 = vmax.f32 %v6511_v59, 0.0 }
0x3557   : > { %7910 = vmatmul.mubr.msk.f32.vlgmr.msra.gmra.mrb[62].mxu0 %vm4080_vm9, %v6514_v61 }
0x362a   : > { %v6599_v63 = vpop.f32.mrb[62].mxu0 }
0x362b   : > { %v6600_v2 = vadd.f32 %v7326_v62, %v6599_v63  ;;  %v7911_v3 = vpop.f32.mrb[63].mxu0 }
0x362d   : > { %v6603_v4 = vadd.f32 %v6600_v2, %v6429_v14  ;;  %v6672_v14 = vld [vmem:[%s10816_s9 + $0x38] sm:$0xff] }
0x362e   : > { %v8059_v54 = vpack.c.bf16 %v6672_v14, %v6670_v53 }
0x362f   : > { %v6604_v5 = vsel %vm1722_vm2, %v6603_v4, 0.0 }
0x3630   : > { %6605 = vadd.xlane.f32.xlu0 %v6604_v5  ;;  %8060 = vmatprep.subr.bf16.mxu1 %v8059_v54  ;;  %v6675_v5 = vlaneseq }
0x3631   : > { %8062 = vmatpush1.bf16.msra.mxu1 %v8061_v58 }
0x3632   : > { %vm6781_vm13 = vcmp.lt.s32.totalorder %v6675_v5, 256 }
0x36bd   : > { %v6606_v1 = vpop.xlane.xlu0 %6605 }
0x36be   : > { %v6607_v56 = vmul.f32 0.03125, %v6606_v1  ;;  %v6676_v1 = vshrl.u32 %v6675_v5, 7 }
0x36c0   : > { %v6608_v7 = vsub.f32 %v6603_v4, %v6607_v56  ;;  %v6677_v56 = vsub.s32 0, %v6676_v1 }
0x36c2   : > { %v6609_v9 = vmul.f32 %v6608_v7, %v6608_v7 }
0x36c4   : > { %v6610_v11 = vsel %vm1722_vm2, %v6609_v9, 0.0  ;;  %v6681_v9 = vsub.s32 1, %v6676_v1 }
0x36c5   : > { %6611 = vadd.xlane.f32.xlu0 %v6610_v11  ;;  %v9389_v11 = vmov 1966171168  }
0x3752   : > { %v6612_v29 = vpop.xlane.xlu0 %6611 }
0x3753   : > { %v6613_v12 = vmul.f32 0.03125, %v6612_v29  ;;  %v6765_v29 = vunpack.c.l.s4 %v9389_v11 }
0x3755   : > { %v6614_v35 = vadd.f32 1e-05, %v6613_v12 }
0x3757   : > { %8538 = vrsqrt.f32 %v6614_v35 }
0x3761   : > { %v8539_v13 = vpop.eup %8538 }
0x3762   : > { %v6616_v15 = vmul.f32 %v8539_v13, %v6608_v7  ;;  %v6673_v7 = vld [vmem:[#allocation7] sm:$0x3] }
0x3763   : > { %v6678_v12 = vrot.slane %v6673_v7, %v6677_v56  ;;  %v6682_v35 = vrot.slane %v6673_v7, %v6681_v9 }
0x3764   : > { %v6617_v16 = vmul.f32 %v10459_v25, %v6616_v15  ;;  %v6766_v15 = vunpack.c.0.s8 %v6765_v29 }
0x3766   : > { %v6618_v38 = vadd.f32 %v10461_v28, %v6617_v16 }
0x3768   : > { %v6619_v20 = vmul.f32 %v6618_v38, %v6618_v38 }
0x376a   : > { %v6620_v21 = vsel %vm1722_vm2, %v6619_v20, 0.0 }
0x376b   : > { %6621 = vadd.xlane.f32.xlu0 %v6620_v21 }
0x37f8   : > { %v6622_v24 = vpop.xlane.xlu0 %6621 }
0x37f9   : > { %8540 = vrsqrt.f32 %v6622_v24  ;;  %vm6625_vm10 = vcmp.eq.f32.partialorder %v6622_v24, inf  ;;  %v6628_v32 = vand.u32 2147483648, %v6622_v24  ;;  %vm6627_vm11 = vcmp.eq.f32.partialorder %v6622_v24, 0.0 }
0x3803   : > { %v8541_v57 = vpop.eup %8540 }
0x3804   : > { %v6624_v27 = vmul.f32 %v8541_v57, %v6622_v24 }
0x3806   : > { %v6626_v6 = vsel %vm6625_vm10, %v6622_v24, %v6624_v27  ;;  %v6769_v24 = vsub.s32 %v6766_v15, %v6676_v1 }
0x3807   : > { %v6629_v25 = vsel %vm6627_vm11, %v6628_v32, %v6626_v6 }
0x3808   : > { %v6631_v8 = vadd.f32 %v6630_v30, %v6629_v25 }
0x380a   : > { %v6633_v28 = vsel %vm6632_vm12, %v6631_v8, -inf }
0x380b   : > { %v6634_v10 = vrot.slane %v6633_v28, 4 }
0x380d   : > { %v6635_v33 = vmax.f32 %v6633_v28, %v6634_v10 }
0x380f   : > { %v6636_v18 = vrot.slane %v6635_v33, 2 }
0x3811   : > { %v6637_v36 = vmax.f32 %v6635_v33, %v6636_v18 }
0x3813   : > { %v6638_v37 = vrot.slane %v6637_v36, 1 }
0x3815   : > { %v6639_v39 = vmax.f32 %v6637_v36, %v6638_v37 }
0x3817   : > { %v6640_v40 = vsub.f32 %v6631_v8, %v6639_v39 }
0x3819   : > { %v6641_v23 = vmul.f32 1.442695, %v6640_v40 }
0x381b   : > { %8542 = vpow2.f32 %v6641_v23 }
0x3825   : > { %v8543_v41 = vpop.eup %8542 }
0x3826   : > { %v6643_v42 = vsel %vm6632_vm12, %v8543_v41, 0.0 }
0x3827   : > { %v6644_v43 = vrot.slane %v6643_v42, 4 }
0x3829   : > { %v6645_v44 = vadd.f32 %v6644_v43, %v6643_v42 }
0x382b   : > { %v6646_v45 = vrot.slane %v6645_v44, 2 }
0x382d   : > { %v6647_v17 = vadd.f32 %v6646_v45, %v6645_v44 }
0x382f   : > { %v6648_v46 = vrot.slane %v6647_v17, 1 }
0x3831   : > { %v6649_v47 = vadd.f32 %v6648_v46, %v6647_v17 }
0x3833   : > { %8544 = vrcp.f32 %v6649_v47 }
0x383d   : > { %v8545_v48 = vpop.eup %8544 }
0x383e   : > { %v6651_v34 = vmul.f32 %v8545_v48, %v8543_v41 }
0x3840   : > { %6654 = vperm.xlu0 %8463, %v6651_v34  }
0x38bf   : > { %v6655_v0 = vpop.permute.xlu0 %6654 }
0x38c0   : > { %v6657_v59 = vmul.f32 %v6655_v0, %v6618_v38 }
0x38c2   : > { %v6658_v60 = vsel %vm1722_vm2, %v6657_v59, 0.0 }
0x38c3   : > { %v6659_v61 = vrot.slane %v6658_v60, 4 }
0x38c5   : > { %v6660_v62 = vadd.f32 %v6659_v61, %v6658_v60 }
0x38c7   : > { %v6661_v63 = vrot.slane %v6660_v62, 2 }
0x38c9   : > { %v6662_v2 = vadd.f32 %v6661_v63, %v6660_v62 }
0x38cb   : > { %v6663_v3 = vrot.slane %v6662_v2, 1 }
0x38cd   : > { %v6664_v4 = vadd.f32 %v6663_v3, %v6662_v2 }
0x38cf   : > { %7328 = vmatmul.mubr.msk.f32.vlgmr.msra.gmra.mrb[54].mxu1 %vm1722_vm2, %v6664_v4 }
0x39a2   : > { %v6754_v13 = vpop.f32.mrb[54].mxu1 }
0x39a3   : > { %v6755_v16 = vadd.f32 %v6754_v13, %v6678_v12  ;;  %v6756_v38 = vpop.f32.mrb[55].mxu1 }
0x39a4   : > { %v6757_v20 = vadd.f32 %v6756_v38, %v6682_v35 }
0x39a5   : > { %v6759_v21 = vmax.f32 %v6755_v16, 0.0 }
0x39a6   : > { %v6760_v22 = vmax.f32 %v6757_v20, 0.0 }
0x39a8   : > { %v6763_v57 = vcombine.low %v6759_v21, %v6760_v22 }
0x39aa   : > { %v6770_v27 = vrot.slane %v6763_v57, %v6769_v24 }
0x39ac   : > { %v6777_v30 = vrot.slane %v6770_v27, %v6769_v24 }
0x39ae   : > { %6783 = vst.msk [vmem:[%s1620_s28] sm:$0x3] %vm6781_vm13, %v6777_v30 }
0x39af PF: > { %p105_p7 = scmp.ge.s32.totalorder %s9914_s3, 4   ;;  %s10818_s7 = smov %s9296_s10 }
0x39b0   : > { %s10819_s10 = smov %s9300_s0  ;;  %s10820_s0 = smov %s9925_s8 }
0x39b1   : > { %s10821_s11 = smov %s9914_s3  ;;  %107 = sbr.rel (!%p105_p7) target bundleno = 100 (0x64), region = 369 }
0x39b8   :  { %6803 = vsyncpa [#allocation3], 1 }
0x39b9   :  { %6805 = vsyncpa [#allocation3 + $0x1], 1 }
0x39ba   :  { %6806 = vsyncpa [#allocation5], 1 }
0x39bb   :  { %6807 = vsyncpa [#allocation8], 1 }
0x39bc   :  { %6808 = vsyncpa [#allocation11], 1 }
0x39bd   :  { %6809 = vsyncpa [#allocation14], 1 }
0x39be   :  { %6810 = vsyncpa [#allocation17], 1 }
0x39bf   :  { %6811 = vsyncpa [#allocation20], 1 }
0x39c0   :  { %6812 = vsyncpa [#allocation23], 1 }
0x39c1   :  { %6813 = vsyncpa [#allocation26], 1 }
0x39c2   :  { %6814 = vsyncpa [#allocation29], 1 }
0x39c3   :  { %6815 = vsyncpa [#allocation32], 1 }
0x39c4   :  { %6816 = vsyncpa [#allocation35], 1 }
0x39c5   :  { %6817 = vsyncpa [#allocation38], 1 }

</bundles_post_ra>
